<compile_context>
chip_gen: v6e
topology: v6e:2x2x1
jax: 0.10.0
libtpu: 0.0.40
codegen_flags: <defaults>
</compile_context>

<pallas_src>
import functools

import jax
import jax.numpy as jnp
from jax import lax
from jax.experimental import pallas as pl
from jax.experimental.pallas import tpu as pltpu


def _round_up(x, m):
    return ((x + m - 1) // m) * m


def _vmem_limit_bytes():
    """Generation-aware VMEM limit (v5e/v6e: 128 MiB physical, v7x: 64 MiB)."""
    cap = 64 * 1024 * 1024          # conservative default (v7x per-core VMEM)
    try:
        cap = int(pltpu.get_tpu_info().vmem_capacity_bytes)
    except Exception:
        pass
    # Leave headroom for Mosaic-internal scratch:
    #   128 MiB physical -> ~108 MiB limit,  64 MiB physical -> 48 MiB limit.
    return max(32 * 1024 * 1024, min(int(cap * 0.85), cap - 16 * 1024 * 1024))


# ----------------------------------------------------------------------------
# Shared epilogue: folded BN scale/bias + ReLU + lane-dense store.
# ----------------------------------------------------------------------------
def _bn_relu_store(acc, scale_ref, bias_ref, o_ref, apply_relu):
    y = acc * scale_ref[...] + bias_ref[...]          # f32 epilogue
    if apply_relu:
        y = jnp.maximum(y, 0.0)
    o_ref[...] = y.reshape(o_ref.shape).astype(o_ref.dtype)


# ----------------------------------------------------------------------------
# Fused conv+BN+ReLU, stride==1, Cin % 128 == 0: in-VMEM im2col slab and ONE
# big-K MXU matmul per (batch, channel-tile, row-tile) grid step.
# ----------------------------------------------------------------------------
def _fused_bigk_kernel(x_ref, w_ref, scale_ref, bias_ref, o_ref, slab_ref, *,
                       kh, kw, dil, tr, ow, apply_relu):
    # x_ref:     (1, HPP, WP, Cin)       zero-padded image, bf16, VMEM-resident
    # w_ref:     (KH*KW*Cin, TCN)        taps-major flattened weights, bf16
    # scale/bias:(1, TCN) f32            folded BN
    # o_ref:     (1, TR, OW, TCN)        lane-dense output tile
    # slab_ref:  (TR*OW, KH*KW*Cin) bf16 in-VMEM im2col slab (scratch)
    cin = x_ref.shape[3]
    r0 = pl.multiple_of(pl.program_id(2) * tr, tr)    # first output row of tile

    tap = 0
    for i in range(kh):                # static unroll over the KH*KW taps
        for j in range(kw):
            patch = x_ref[0, pl.ds(r0 + i * dil, tr), pl.ds(j * dil, ow), :]
            # 128-lane-aligned store (cin is a multiple of 128).
            slab_ref[:, tap * cin:(tap + 1) * cin] = patch.reshape(tr * ow, cin)
            tap += 1

    # One big-K matmul: K = KH*KW*Cin; MXU accumulates internally in f32.
    acc = jnp.dot(slab_ref[...], w_ref[...], preferred_element_type=jnp.float32)
    _bn_relu_store(acc, scale_ref, bias_ref, o_ref, apply_relu)


# ----------------------------------------------------------------------------
# Fused conv+BN+ReLU, stride==1, small Cin: per-tap dots (K = Cin), accumulator
# initialised from the first tap.
# ----------------------------------------------------------------------------
def _fused_smallk_kernel(x_ref, w_ref, scale_ref, bias_ref, o_ref, *,
                         kh, kw, dil, tr, ow, apply_relu):
    # w_ref: (KH*KW, Cin, TCN) bf16
    cin = w_ref.shape[1]
    r0 = pl.multiple_of(pl.program_id(2) * tr, tr)

    acc = None
    tap = 0
    for i in range(kh):
        for j in range(kw):
            patch = x_ref[0, pl.ds(r0 + i * dil, tr), pl.ds(j * dil, ow), :]
            contrib = jnp.dot(patch.reshape(tr * ow, cin), w_ref[tap],
                              preferred_element_type=jnp.float32)
            acc = contrib if acc is None else acc + contrib
            tap += 1
    _bn_relu_store(acc, scale_ref, bias_ref, o_ref, apply_relu)


def _conv_fused_nhwc(x_nhwc, weight, scale, shift, *, padding, dilation, relu,
                     out_dtype, vmem_limit):
    """stride==1 fused path.  Returns NHWC output or None if the whole-image
    residency scheme does not fit the (generation-aware) VMEM budget."""
    n, h, w, cin = x_nhwc.shape
    cout, _, kh, kw = weight.shape
    hp, wp = h + 2 * padding, w + 2 * padding
    oh = hp - (kh - 1) * dilation
    ow = wp - (kw - 1) * dilation
    if oh <= 0 or ow <= 0:
        return None

    big_k = (cin % 128 == 0) and (kh * kw > 1)
    k_full = kh * kw * cin

    # Output-channel tiling: lane-dense, and >=256-wide N for v6e/v7x MXUs.
    if cout <= 128:
        coutp = 128
    else:
        coutp = _round_up(cout, 256)
        if coutp - cout > 64:                 # too much padded compute
            coutp = _round_up(cout, 128)
    tcn = 512 if coutp % 512 == 0 else 256 if coutp % 256 == 0 else 128
    n_co = coutp // tcn

    out_itemsize = jnp.dtype(out_dtype).itemsize

    def vmem_estimate(tr_):
        grid_rows_ = pl.cdiv(oh, tr_)
        hpp_ = grid_rows_ * tr_ + (kh - 1) * dilation
        # image is double-buffered by the pipeline and lane-padded to 128.
        img = 2 * hpp_ * _round_up(wp, 8) * _round_up(cin, 128) * 2
        if big_k:
            wgt = 2 * _round_up(k_full, 16) * tcn * 2
            slab = _round_up(tr_ * ow, 16) * _round_up(k_full, 128) * 2
        else:
            wgt = 2 * kh * kw * _round_up(cin, 16) * tcn * 2
            slab = 0
        out = 2 * _round_up(tr_, 8) * _round_up(ow, 8) * tcn * out_itemsize
        acc = _round_up(tr_ * ow, 16) * tcn * 4
        sb = 2 * 2 * 8 * tcn * 4
        return img + wgt + slab + out + acc + sb + (2 << 20)   # +2 MiB slack

    # Row tile: multiple of 8 sublanes, ~512 GEMM rows per grid step.
    tr = min(_round_up(oh, 8), max(8, (512 // max(ow, 1)) // 8 * 8))
    budget = int(0.9 * vmem_limit)
    while vmem_estimate(tr) > budget and tr > 8:
        tr = max(8, _round_up(tr // 2, 8))
    if vmem_estimate(tr) > budget:
        return None            # graceful fallback (e.g. huge images on v7x)

    assert tr % 8 == 0
    grid_rows = pl.cdiv(oh, tr)
    oh_pad = grid_rows * tr
    extra = oh_pad - oh        # extra bottom rows keep in-kernel reads in-bounds
    hpp = hp + extra
    assert oh_pad + (kh - 1) * dilation == hpp   # in-bounds invariant

    xp = jnp.pad(x_nhwc, ((0, 0), (padding, padding + extra),
                          (padding, padding), (0, 0))).astype(jnp.bfloat16)

    # Taps-major weights, Cout padded lane-dense, bf16 for the MXU.
    w_taps = jnp.transpose(weight, (2, 3, 1, 0)).reshape(kh * kw, cin, cout)
    w_taps = jnp.pad(w_taps, ((0, 0), (0, 0), (0, coutp - cout)))
    w_taps = w_taps.astype(jnp.bfloat16)
    scale_p = jnp.pad(scale.astype(jnp.float32), (0, coutp - cout)).reshape(1, coutp)
    shift_p = jnp.pad(shift.astype(jnp.float32), (0, coutp - cout)).reshape(1, coutp)

    # Grid order (batch, channel-tile, row-tile): the image block (index only
    # depends on b) stays VMEM-resident across co/r; the weight tile is only
    # re-fetched when co changes.
    grid = (n, n_co, grid_rows)
    x_spec = pl.BlockSpec((1, hpp, wp, cin), lambda b, co, r: (b, 0, 0, 0))
    sc_spec = pl.BlockSpec((1, tcn), lambda b, co, r: (0, co))
    out_spec = pl.BlockSpec((1, tr, ow, tcn), lambda b, co, r: (b, r, 0, co))

    if big_k:
        kernel = functools.partial(_fused_bigk_kernel, kh=kh, kw=kw,
                                   dil=dilation, tr=tr, ow=ow, apply_relu=relu)
        w_arg = w_taps.reshape(k_full, coutp)
        in_specs = [x_spec,
                    pl.BlockSpec((k_full, tcn), lambda b, co, r: (0, co)),
                    sc_spec, sc_spec]
        scratch = [pltpu.VMEM((tr * ow, k_full), jnp.bfloat16)]
    else:
        kernel = functools.partial(_fused_smallk_kernel, kh=kh, kw=kw,
                                   dil=dilation, tr=tr, ow=ow, apply_relu=relu)
        w_arg = w_taps
        in_specs = [x_spec,
                    pl.BlockSpec((kh * kw, cin, tcn), lambda b, co, r: (0, 0, co)),
                    sc_spec, sc_spec]
        scratch = []

    out = pl.pallas_call(
        kernel,
        out_shape=jax.ShapeDtypeStruct((n, oh_pad, ow, coutp), out_dtype),
        grid_spec=pltpu.PrefetchScalarGridSpec(
            num_scalar_prefetch=0,
            grid=grid,
            in_specs=in_specs,
            out_specs=out_spec,
            scratch_shapes=scratch,
        ),
        compiler_params=pltpu.CompilerParams(
            dimension_semantics=("parallel", "parallel", "parallel"),
            vmem_limit_bytes=int(vmem_limit),
        ),
    )(xp, w_arg, scale_p, shift_p)

    # Drop row / lane padding (vanishes when OH, Cout already tile cleanly).
    return out[:, :oh, :, :cout]


# ----------------------------------------------------------------------------
# Fallback path (stride > 1, or residency doesn't fit): wrapper im2col +
# K-tiled bf16 GEMM with f32 accumulator and fused BN/ReLU epilogue.
# ----------------------------------------------------------------------------
def _gemm_bn_relu_kernel(p_ref, w_ref, scale_ref, bias_ref, o_ref, acc_ref, *,
                         apply_relu):
    @pl.when(pl.program_id(1) == 0)
    def _():
        acc_ref[...] = jnp.zeros_like(acc_ref)

    acc_ref[...] += jnp.dot(p_ref[...], w_ref[...],
                            preferred_element_type=jnp.float32)

    @pl.when(pl.program_id(1) == pl.num_programs(1) - 1)
    def _():
        y = acc_ref[...] * scale_ref[...] + bias_ref[...]
        if apply_relu:
            y = jnp.maximum(y, 0.0)
        o_ref[...] = y.astype(o_ref.dtype)


def _im2col_nhwc(x_nhwc, kh, kw, stride, padding, dilation):
    n, h, w, cin = x_nhwc.shape
    xp = jnp.pad(x_nhwc, ((0, 0), (padding, padding), (padding, padding), (0, 0)))
    hp, wp = h + 2 * padding, w + 2 * padding
    oh = (hp - (kh - 1) * dilation - 1) // stride + 1
    ow = (wp - (kw - 1) * dilation - 1) // stride + 1
    cols = []
    for i in range(kh):
        for j in range(kw):
            r0, c0 = i * dilation, j * dilation
            sl = xp[:, r0:r0 + (oh - 1) * stride + 1:stride,
                    c0:c0 + (ow - 1) * stride + 1:stride, :]
            cols.append(sl)
    patches = jnp.concatenate(cols, axis=-1)          # (N, OH, OW, KH*KW*Cin)
    return patches.reshape(n * oh * ow, kh * kw * cin), (oh, ow)


def _conv_im2col_nhwc(x_nhwc, weight, scale, shift, *, stride, padding,
                      dilation, relu, out_dtype, vmem_limit, tm=512):
    n = x_nhwc.shape[0]
    cout, cin, kh, kw = weight.shape
    patches, (oh, ow) = _im2col_nhwc(x_nhwc.astype(jnp.bfloat16), kh, kw,
                                     stride, padding, dilation)
    m, k = patches.shape
    coutp = _round_up(cout, 128)                      # lane-dense output stores

    # K tiling ('arbitrary' reduction axis) keeps patch/weight blocks in VMEM.
    k_pad0 = _round_up(k, 128)
    n_k = max(1, pl.cdiv(k_pad0, 2048))
    tk = _round_up(pl.cdiv(k_pad0, n_k), 128)
    k_pad = tk * n_k

    tm = min(tm, _round_up(m, 8))
    m_pad = _round_up(m, tm)

    patches = jnp.pad(patches, ((0, m_pad - m), (0, k_pad - k)))
    w_mat = jnp.transpose(weight, (2, 3, 1, 0)).reshape(k, cout)
    w_mat = jnp.pad(w_mat, ((0, k_pad - k), (0, coutp - cout))).astype(jnp.bfloat16)
    scale2 = jnp.pad(scale.astype(jnp.float32), (0, coutp - cout)).reshape(1, coutp)
    shift2 = jnp.pad(shift.astype(jnp.float32), (0, coutp - cout)).reshape(1, coutp)

    kernel = functools.partial(_gemm_bn_relu_kernel, apply_relu=relu)
    out_flat = pl.pallas_call(
        kernel,
        out_shape=jax.ShapeDtypeStruct((m_pad, coutp), out_dtype),
        grid_spec=pltpu.PrefetchScalarGridSpec(
            num_scalar_prefetch=0,
            grid=(m_pad // tm, n_k),
            in_specs=[
                pl.BlockSpec((tm, tk), lambda i, kk: (i, kk)),
                pl.BlockSpec((tk, coutp), lambda i, kk: (kk, 0)),
                pl.BlockSpec((1, coutp), lambda i, kk: (0, 0)),
                pl.BlockSpec((1, coutp), lambda i, kk: (0, 0)),
            ],
            out_specs=pl.BlockSpec((tm, coutp), lambda i, kk: (i, 0)),
            scratch_shapes=[pltpu.VMEM((tm, coutp), jnp.float32)],
        ),
        compiler_params=pltpu.CompilerParams(
            dimension_semantics=("parallel", "arbitrary"),
            vmem_limit_bytes=int(vmem_limit),
        ),
    )(patches, w_mat, scale2, shift2)

    return out_flat[:m, :cout].reshape(n, oh, ow, cout)


# ----------------------------------------------------------------------------
# Public wrapper: BasicConv forward.
# ----------------------------------------------------------------------------
def basic_conv_pallas(x, params, *, kernel_size=None, stride=1, padding=0,
                      dilation=1, groups=1, relu=True, bn=True, eps=1e-5,
                      in_format="NCHW", out_format="NCHW",
                      out_dtype=jnp.float32):
    """Forward of BasicConv: Conv2d(bias optional) -> BatchNorm2d(eval) -> ReLU.

    Accepts NCHW (PyTorch parity) or NHWC input / output; NHWC skips the extra
    full-HBM layout transposes and keeps the kernel's lane-dense layout.
    """
    if groups != 1:
        raise NotImplementedError("groups != 1 is not supported")
    weight = params["weight"]                 # (Cout, Cin, KH, KW)
    cout, cin_w, kh, kw = weight.shape
    if kernel_size is not None:
        assert (kh, kw) == (kernel_size, kernel_size), (
            "kernel_size does not match weight shape")

    # Fold conv bias (if any) and eval-mode BN into per-channel scale / shift.
    conv_bias = params.get("bias")
    if bn:
        scale = params["gamma"] / jnp.sqrt(params["running_var"] + eps)
        shift = params["beta"] - params["running_mean"] * scale
        if conv_bias is not None:
            shift = shift + conv_bias * scale
    else:
        scale = jnp.ones((cout,), jnp.float32)
        shift = (conv_bias.astype(jnp.float32) if conv_bias is not None
                 else jnp.zeros((cout,), jnp.float32))

    # bf16 MXU compute dtype (f32 accumulation in-kernel); cast before the
    # layout transpose to halve the wrapper-side HBM traffic.
    x = x.astype(jnp.bfloat16)
    x_nhwc = jnp.transpose(x, (0, 2, 3, 1)) if in_format == "NCHW" else x
    assert x_nhwc.shape[-1] == cin_w, (x_nhwc.shape, cin_w)

    vmem_limit = _vmem_limit_bytes()
    out_nhwc = None
    if stride == 1:
        out_nhwc = _conv_fused_nhwc(x_nhwc, weight, scale, shift,
                                    padding=padding, dilation=dilation,
                                    relu=relu, out_dtype=out_dtype,
                                    vmem_limit=vmem_limit)
    if out_nhwc is None:
        out_nhwc = _conv_im2col_nhwc(x_nhwc, weight, scale, shift,
                                     stride=stride, padding=padding,
                                     dilation=dilation, relu=relu,
                                     out_dtype=out_dtype, vmem_limit=vmem_limit)

    if out_format == "NHWC":
        return out_nhwc
    # NCHW parity costs one extra full HBM pass; prefer NHWC when chaining.
    return jnp.transpose(out_nhwc, (0, 3, 1, 2))


def _reference(x_nchw, params, *, stride, padding, dilation, relu, bn, eps=1e-5):
    """Pure-JAX reference (lax conv) for correctness checks."""
    y = lax.conv_general_dilated(
        x_nchw, params["weight"],
        window_strides=(stride, stride),
        padding=((padding, padding), (padding, padding)),
        rhs_dilation=(dilation, dilation),
        dimension_numbers=("NCHW", "OIHW", "NCHW"))
    if params.get("bias") is not None:
        y = y + params["bias"][None, :, None, None]
    if bn:
        scale = params["gamma"] / jnp.sqrt(params["running_var"] + eps)
        bias = params["beta"] - params["running_mean"] * scale
        y = y * scale[None, :, None, None] + bias[None, :, None, None]
    if relu:
        y = jnp.maximum(y, 0.0)
    return y


if __name__ == "__main__":
    key = jax.random.PRNGKey(0)

    def make_params(cin, cout, ksize, wscale, keys):
        kw_, kg, kb, km, kv = keys
        return {
            "weight": wscale * jax.random.normal(
                kw_, (cout, cin, ksize, ksize), dtype=jnp.float32),
            "gamma": 1.0 + 0.1 * jax.random.normal(kg, (cout,), jnp.float32),
            "beta": 0.1 * jax.random.normal(kb, (cout,), jnp.float32),
            "running_mean": 0.05 * jax.random.normal(km, (cout,), jnp.float32),
            "running_var": 1.0 + 0.1 * jnp.abs(
                jax.random.normal(kv, (cout,), jnp.float32)),
        }

    # --- BasicConv(4, 8, k=3, s=1, p=1): fused small-Cin path ---------------
    keys = jax.random.split(key, 7)
    x = jax.random.normal(keys[0], (2, 4, 16, 16), dtype=jnp.float32)
    params = make_params(4, 8, 3, 0.1, keys[1:6])
    ref = _reference(x, params, stride=1, padding=1, dilation=1, relu=True, bn=True)
    ref_nhwc = jnp.transpose(ref, (0, 2, 3, 1))

    out_nhwc = basic_conv_pallas(x, params, kernel_size=3, stride=1, padding=1,
                                 out_format="NHWC")
    out_nhwc = jax.block_until_ready(out_nhwc)
    assert out_nhwc.shape == (2, 16, 16, 8), out_nhwc.shape
    assert jnp.allclose(out_nhwc, ref_nhwc, atol=2e-2, rtol=2e-2), float(
        jnp.max(jnp.abs(out_nhwc - ref_nhwc)))

    out_nchw = basic_conv_pallas(x, params, kernel_size=3, stride=1, padding=1)
    out_nchw = jax.block_until_ready(out_nchw)
    assert out_nchw.shape == (2, 8, 16, 16), out_nchw.shape
    assert jnp.allclose(out_nchw, ref, atol=2e-2, rtol=2e-2), float(
        jnp.max(jnp.abs(out_nchw - ref)))

    # --- stride=2: im2col fallback (bf16 K-tiled GEMM, lane-dense Cout) -----
    out_s2 = basic_conv_pallas(x, params, kernel_size=3, stride=2, padding=1)
    out_s2 = jax.block_until_ready(out_s2)
    ref_s2 = _reference(x, params, stride=2, padding=1, dilation=1,
                        relu=True, bn=True)
    assert out_s2.shape == ref_s2.shape, (out_s2.shape, ref_s2.shape)
    assert jnp.allclose(out_s2, ref_s2, atol=2e-2, rtol=2e-2), float(
        jnp.max(jnp.abs(out_s2 - ref_s2)))

    # --- Cin = Cout = 128: fused big-K (single MXU matmul) path -------------
    keys3 = jax.random.split(keys[6], 6)
    x3 = jax.random.normal(keys3[0], (1, 128, 16, 16), dtype=jnp.float32)
    params3 = make_params(128, 128, 3, 0.05, keys3[1:6])
    # Reference on bf16-rounded conv inputs (the kernel feeds the MXU bf16
    # operands with f32 accumulation), so the comparison isolates kernel bugs.
    params3_bf = dict(params3)
    params3_bf["weight"] = params3["weight"].astype(jnp.bfloat16).astype(jnp.float32)
    x3_bf = x3.astype(jnp.bfloat16).astype(jnp.float32)
    ref3 = _reference(x3_bf, params3_bf, stride=1, padding=1, dilation=1,
                      relu=True, bn=True)
    ref3_nhwc = jnp.transpose(ref3, (0, 2, 3, 1))

    out3 = basic_conv_pallas(x3, params3, kernel_size=3, stride=1, padding=1,
                             out_format="NHWC")
    out3 = jax.block_until_ready(out3)
    assert out3.shape == (1, 16, 16, 128), out3.shape
    assert jnp.allclose(out3, ref3_nhwc, atol=2e-2, rtol=2e-2), float(
        jnp.max(jnp.abs(out3 - ref3_nhwc)))

    print("KERNEL_OK")
</pallas_src>

<mosaic_0001>
module attributes {stable_mosaic.version = 11 : i64} {
  func.func @_fused_smallk_kernel(%arg0: i32, %arg1: i32, %arg2: i32, %arg3: memref<1x18x18x4xbf16, #tpu.memory_space<vmem>>, %arg4: memref<9x4x128xbf16, #tpu.memory_space<vmem>>, %arg5: memref<1x128xf32, #tpu.memory_space<vmem>>, %arg6: memref<1x128xf32, #tpu.memory_space<vmem>>, %arg7: memref<1x16x16x128xf32, #tpu.memory_space<vmem>>) attributes {dimension_semantics = [#tpu.dimension_semantics<parallel>, #tpu.dimension_semantics<parallel>, #tpu.dimension_semantics<parallel>], iteration_bounds = array<i64: 2, 1, 1>, scalar_prefetch = 0 : i64, scratch_operands = 0 : i64, tpu.core_type = #tpu.core_type<tc>, window_params = [{transform_indices = @transform_0, window_bounds = array<i64: 1, 18, 18, 4>}, {transform_indices = @transform_1, window_bounds = array<i64: 9, 4, 128>}, {transform_indices = @transform_2, window_bounds = array<i64: 1, 128>}, {transform_indices = @transform_3, window_bounds = array<i64: 1, 128>}, {transform_indices = @transform_4, window_bounds = array<i64: 1, 16, 16, 128>}]} {
    %c16_i32 = arith.constant 16 : i32
    %0 = arith.muli %arg2, %c16_i32 : i32
    %1 = tpu.assume_multiple %0, 16 : i32
    %c0_i32 = arith.constant 0 : i32
    %2 = arith.addi %1, %c0_i32 : i32
    %c0 = arith.constant 0 : index
    %3 = arith.index_cast %2 : i32 to index
    %c0_0 = arith.constant 0 : index
    %c0_1 = arith.constant 0 : index
    %4 = vector.load %arg3[%c0, %3, %c0_0, %c0_1] : memref<1x18x18x4xbf16, #tpu.memory_space<vmem>>, vector<1x16x16x4xbf16>
    %5 = vector.shape_cast %4 : vector<1x16x16x4xbf16> to vector<16x16x4xbf16>
    %6 = vector.shape_cast %5 : vector<16x16x4xbf16> to vector<256x4xbf16>
    %c0_2 = arith.constant 0 : index
    %c0_3 = arith.constant 0 : index
    %c0_4 = arith.constant 0 : index
    %7 = vector.load %arg4[%c0_2, %c0_3, %c0_4] : memref<9x4x128xbf16, #tpu.memory_space<vmem>>, vector<1x4x128xbf16>
    %8 = vector.shape_cast %7 : vector<1x4x128xbf16> to vector<4x128xbf16>
    %cst = arith.constant dense<0.000000e+00> : vector<256x128xf32>
    %9 = tpu.matmul %6, %8, %cst {dimension_numbers = #tpu.dot_dimension_numbers<[1], [0], [0], [1], [0, 0, 1, 1], [], []>} : vector<256x4xbf16>, vector<4x128xbf16>, vector<256x128xf32> -> vector<256x128xf32>
    %c0_i32_5 = arith.constant 0 : i32
    %10 = arith.addi %1, %c0_i32_5 : i32
    %c0_6 = arith.constant 0 : index
    %11 = arith.index_cast %10 : i32 to index
    %c1 = arith.constant 1 : index
    %c0_7 = arith.constant 0 : index
    %12 = vector.load %arg3[%c0_6, %11, %c1, %c0_7] : memref<1x18x18x4xbf16, #tpu.memory_space<vmem>>, vector<1x16x16x4xbf16>
    %13 = vector.shape_cast %12 : vector<1x16x16x4xbf16> to vector<16x16x4xbf16>
    %14 = vector.shape_cast %13 : vector<16x16x4xbf16> to vector<256x4xbf16>
    %c1_8 = arith.constant 1 : index
    %c0_9 = arith.constant 0 : index
    %c0_10 = arith.constant 0 : index
    %15 = vector.load %arg4[%c1_8, %c0_9, %c0_10] : memref<9x4x128xbf16, #tpu.memory_space<vmem>>, vector<1x4x128xbf16>
    %16 = vector.shape_cast %15 : vector<1x4x128xbf16> to vector<4x128xbf16>
    %cst_11 = arith.constant dense<0.000000e+00> : vector<256x128xf32>
    %17 = tpu.matmul %14, %16, %cst_11 {dimension_numbers = #tpu.dot_dimension_numbers<[1], [0], [0], [1], [0, 0, 1, 1], [], []>} : vector<256x4xbf16>, vector<4x128xbf16>, vector<256x128xf32> -> vector<256x128xf32>
    %18 = arith.addf %9, %17 : vector<256x128xf32>
    %c0_i32_12 = arith.constant 0 : i32
    %19 = arith.addi %1, %c0_i32_12 : i32
    %c0_13 = arith.constant 0 : index
    %20 = arith.index_cast %19 : i32 to index
    %c2 = arith.constant 2 : index
    %c0_14 = arith.constant 0 : index
    %21 = vector.load %arg3[%c0_13, %20, %c2, %c0_14] : memref<1x18x18x4xbf16, #tpu.memory_space<vmem>>, vector<1x16x16x4xbf16>
    %22 = vector.shape_cast %21 : vector<1x16x16x4xbf16> to vector<16x16x4xbf16>
    %23 = vector.shape_cast %22 : vector<16x16x4xbf16> to vector<256x4xbf16>
    %c2_15 = arith.constant 2 : index
    %c0_16 = arith.constant 0 : index
    %c0_17 = arith.constant 0 : index
    %24 = vector.load %arg4[%c2_15, %c0_16, %c0_17] : memref<9x4x128xbf16, #tpu.memory_space<vmem>>, vector<1x4x128xbf16>
    %25 = vector.shape_cast %24 : vector<1x4x128xbf16> to vector<4x128xbf16>
    %cst_18 = arith.constant dense<0.000000e+00> : vector<256x128xf32>
    %26 = tpu.matmul %23, %25, %cst_18 {dimension_numbers = #tpu.dot_dimension_numbers<[1], [0], [0], [1], [0, 0, 1, 1], [], []>} : vector<256x4xbf16>, vector<4x128xbf16>, vector<256x128xf32> -> vector<256x128xf32>
    %27 = arith.addf %18, %26 : vector<256x128xf32>
    %c1_i32 = arith.constant 1 : i32
    %28 = arith.addi %1, %c1_i32 : i32
    %c0_19 = arith.constant 0 : index
    %29 = arith.index_cast %28 : i32 to index
    %c0_20 = arith.constant 0 : index
    %c0_21 = arith.constant 0 : index
    %30 = vector.load %arg3[%c0_19, %29, %c0_20, %c0_21] : memref<1x18x18x4xbf16, #tpu.memory_space<vmem>>, vector<1x16x16x4xbf16>
    %31 = vector.shape_cast %30 : vector<1x16x16x4xbf16> to vector<16x16x4xbf16>
    %32 = vector.shape_cast %31 : vector<16x16x4xbf16> to vector<256x4xbf16>
    %c3 = arith.constant 3 : index
    %c0_22 = arith.constant 0 : index
    %c0_23 = arith.constant 0 : index
    %33 = vector.load %arg4[%c3, %c0_22, %c0_23] : memref<9x4x128xbf16, #tpu.memory_space<vmem>>, vector<1x4x128xbf16>
    %34 = vector.shape_cast %33 : vector<1x4x128xbf16> to vector<4x128xbf16>
    %cst_24 = arith.constant dense<0.000000e+00> : vector<256x128xf32>
    %35 = tpu.matmul %32, %34, %cst_24 {dimension_numbers = #tpu.dot_dimension_numbers<[1], [0], [0], [1], [0, 0, 1, 1], [], []>} : vector<256x4xbf16>, vector<4x128xbf16>, vector<256x128xf32> -> vector<256x128xf32>
    %36 = arith.addf %27, %35 : vector<256x128xf32>
    %c1_i32_25 = arith.constant 1 : i32
    %37 = arith.addi %1, %c1_i32_25 : i32
    %c0_26 = arith.constant 0 : index
    %38 = arith.index_cast %37 : i32 to index
    %c1_27 = arith.constant 1 : index
    %c0_28 = arith.constant 0 : index
    %39 = vector.load %arg3[%c0_26, %38, %c1_27, %c0_28] : memref<1x18x18x4xbf16, #tpu.memory_space<vmem>>, vector<1x16x16x4xbf16>
    %40 = vector.shape_cast %39 : vector<1x16x16x4xbf16> to vector<16x16x4xbf16>
    %41 = vector.shape_cast %40 : vector<16x16x4xbf16> to vector<256x4xbf16>
    %c4 = arith.constant 4 : index
    %c0_29 = arith.constant 0 : index
    %c0_30 = arith.constant 0 : index
    %42 = vector.load %arg4[%c4, %c0_29, %c0_30] : memref<9x4x128xbf16, #tpu.memory_space<vmem>>, vector<1x4x128xbf16>
    %43 = vector.shape_cast %42 : vector<1x4x128xbf16> to vector<4x128xbf16>
    %cst_31 = arith.constant dense<0.000000e+00> : vector<256x128xf32>
    %44 = tpu.matmul %41, %43, %cst_31 {dimension_numbers = #tpu.dot_dimension_numbers<[1], [0], [0], [1], [0, 0, 1, 1], [], []>} : vector<256x4xbf16>, vector<4x128xbf16>, vector<256x128xf32> -> vector<256x128xf32>
    %45 = arith.addf %36, %44 : vector<256x128xf32>
    %c1_i32_32 = arith.constant 1 : i32
    %46 = arith.addi %1, %c1_i32_32 : i32
    %c0_33 = arith.constant 0 : index
    %47 = arith.index_cast %46 : i32 to index
    %c2_34 = arith.constant 2 : index
    %c0_35 = arith.constant 0 : index
    %48 = vector.load %arg3[%c0_33, %47, %c2_34, %c0_35] : memref<1x18x18x4xbf16, #tpu.memory_space<vmem>>, vector<1x16x16x4xbf16>
    %49 = vector.shape_cast %48 : vector<1x16x16x4xbf16> to vector<16x16x4xbf16>
    %50 = vector.shape_cast %49 : vector<16x16x4xbf16> to vector<256x4xbf16>
    %c5 = arith.constant 5 : index
    %c0_36 = arith.constant 0 : index
    %c0_37 = arith.constant 0 : index
    %51 = vector.load %arg4[%c5, %c0_36, %c0_37] : memref<9x4x128xbf16, #tpu.memory_space<vmem>>, vector<1x4x128xbf16>
    %52 = vector.shape_cast %51 : vector<1x4x128xbf16> to vector<4x128xbf16>
    %cst_38 = arith.constant dense<0.000000e+00> : vector<256x128xf32>
    %53 = tpu.matmul %50, %52, %cst_38 {dimension_numbers = #tpu.dot_dimension_numbers<[1], [0], [0], [1], [0, 0, 1, 1], [], []>} : vector<256x4xbf16>, vector<4x128xbf16>, vector<256x128xf32> -> vector<256x128xf32>
    %54 = arith.addf %45, %53 : vector<256x128xf32>
    %c2_i32 = arith.constant 2 : i32
    %55 = arith.addi %1, %c2_i32 : i32
    %c0_39 = arith.constant 0 : index
    %56 = arith.index_cast %55 : i32 to index
    %c0_40 = arith.constant 0 : index
    %c0_41 = arith.constant 0 : index
    %57 = vector.load %arg3[%c0_39, %56, %c0_40, %c0_41] : memref<1x18x18x4xbf16, #tpu.memory_space<vmem>>, vector<1x16x16x4xbf16>
    %58 = vector.shape_cast %57 : vector<1x16x16x4xbf16> to vector<16x16x4xbf16>
    %59 = vector.shape_cast %58 : vector<16x16x4xbf16> to vector<256x4xbf16>
    %c6 = arith.constant 6 : index
    %c0_42 = arith.constant 0 : index
    %c0_43 = arith.constant 0 : index
    %60 = vector.load %arg4[%c6, %c0_42, %c0_43] : memref<9x4x128xbf16, #tpu.memory_space<vmem>>, vector<1x4x128xbf16>
    %61 = vector.shape_cast %60 : vector<1x4x128xbf16> to vector<4x128xbf16>
    %cst_44 = arith.constant dense<0.000000e+00> : vector<256x128xf32>
    %62 = tpu.matmul %59, %61, %cst_44 {dimension_numbers = #tpu.dot_dimension_numbers<[1], [0], [0], [1], [0, 0, 1, 1], [], []>} : vector<256x4xbf16>, vector<4x128xbf16>, vector<256x128xf32> -> vector<256x128xf32>
    %63 = arith.addf %54, %62 : vector<256x128xf32>
    %c2_i32_45 = arith.constant 2 : i32
    %64 = arith.addi %1, %c2_i32_45 : i32
    %c0_46 = arith.constant 0 : index
    %65 = arith.index_cast %64 : i32 to index
    %c1_47 = arith.constant 1 : index
    %c0_48 = arith.constant 0 : index
    %66 = vector.load %arg3[%c0_46, %65, %c1_47, %c0_48] : memref<1x18x18x4xbf16, #tpu.memory_space<vmem>>, vector<1x16x16x4xbf16>
    %67 = vector.shape_cast %66 : vector<1x16x16x4xbf16> to vector<16x16x4xbf16>
    %68 = vector.shape_cast %67 : vector<16x16x4xbf16> to vector<256x4xbf16>
    %c7 = arith.constant 7 : index
    %c0_49 = arith.constant 0 : index
    %c0_50 = arith.constant 0 : index
    %69 = vector.load %arg4[%c7, %c0_49, %c0_50] : memref<9x4x128xbf16, #tpu.memory_space<vmem>>, vector<1x4x128xbf16>
    %70 = vector.shape_cast %69 : vector<1x4x128xbf16> to vector<4x128xbf16>
    %cst_51 = arith.constant dense<0.000000e+00> : vector<256x128xf32>
    %71 = tpu.matmul %68, %70, %cst_51 {dimension_numbers = #tpu.dot_dimension_numbers<[1], [0], [0], [1], [0, 0, 1, 1], [], []>} : vector<256x4xbf16>, vector<4x128xbf16>, vector<256x128xf32> -> vector<256x128xf32>
    %72 = arith.addf %63, %71 : vector<256x128xf32>
    %c2_i32_52 = arith.constant 2 : i32
    %73 = arith.addi %1, %c2_i32_52 : i32
    %c0_53 = arith.constant 0 : index
    %74 = arith.index_cast %73 : i32 to index
    %c2_54 = arith.constant 2 : index
    %c0_55 = arith.constant 0 : index
    %75 = vector.load %arg3[%c0_53, %74, %c2_54, %c0_55] : memref<1x18x18x4xbf16, #tpu.memory_space<vmem>>, vector<1x16x16x4xbf16>
    %76 = vector.shape_cast %75 : vector<1x16x16x4xbf16> to vector<16x16x4xbf16>
    %77 = vector.shape_cast %76 : vector<16x16x4xbf16> to vector<256x4xbf16>
    %c8 = arith.constant 8 : index
    %c0_56 = arith.constant 0 : index
    %c0_57 = arith.constant 0 : index
    %78 = vector.load %arg4[%c8, %c0_56, %c0_57] : memref<9x4x128xbf16, #tpu.memory_space<vmem>>, vector<1x4x128xbf16>
    %79 = vector.shape_cast %78 : vector<1x4x128xbf16> to vector<4x128xbf16>
    %cst_58 = arith.constant dense<0.000000e+00> : vector<256x128xf32>
    %80 = tpu.matmul %77, %79, %cst_58 {dimension_numbers = #tpu.dot_dimension_numbers<[1], [0], [0], [1], [0, 0, 1, 1], [], []>} : vector<256x4xbf16>, vector<4x128xbf16>, vector<256x128xf32> -> vector<256x128xf32>
    %81 = arith.addf %72, %80 : vector<256x128xf32>
    %c0_59 = arith.constant 0 : index
    %c0_60 = arith.constant 0 : index
    %82 = vector.load %arg5[%c0_59, %c0_60] : memref<1x128xf32, #tpu.memory_space<vmem>>, vector<1x128xf32>
    %83 = vector.broadcast %82 : vector<1x128xf32> to vector<256x128xf32>
    %84 = arith.mulf %81, %83 : vector<256x128xf32>
    %c0_61 = arith.constant 0 : index
    %c0_62 = arith.constant 0 : index
    %85 = vector.load %arg6[%c0_61, %c0_62] : memref<1x128xf32, #tpu.memory_space<vmem>>, vector<1x128xf32>
    %86 = vector.broadcast %85 : vector<1x128xf32> to vector<256x128xf32>
    %87 = arith.addf %84, %86 : vector<256x128xf32>
    %cst_63 = arith.constant 0.000000e+00 : f32
    %88 = vector.broadcast %cst_63 : f32 to vector<256x128xf32>
    %89 = arith.maximumf %87, %88 : vector<256x128xf32>
    %90 = vector.shape_cast %89 : vector<256x128xf32> to vector<1x16x16x128xf32>
    %c0_64 = arith.constant 0 : index
    %c0_65 = arith.constant 0 : index
    %c0_66 = arith.constant 0 : index
    %c0_67 = arith.constant 0 : index
    %91 = vector.load %arg7[%c0_64, %c0_65, %c0_66, %c0_67] : memref<1x16x16x128xf32, #tpu.memory_space<vmem>>, vector<1x16x16x128xf32>
    tpu.vector_store %arg7[%c0_64, %c0_65, %c0_66, %c0_67], %90 {strides = array<i32>} : memref<1x16x16x128xf32, #tpu.memory_space<vmem>>, vector<1x16x16x128xf32>,
    return
  }
  func.func @transform_0(%arg0: i32, %arg1: i32, %arg2: i32) -> (i32, i32, i32, i32) {
    %c0_i32 = arith.constant 0 : i32
    %c0_i32_0 = arith.constant 0 : i32
    %c0_i32_1 = arith.constant 0 : i32
    %c0_i32_2 = arith.constant 0 : i32
    return %arg0, %c0_i32, %c0_i32_0, %c0_i32_1 : i32, i32, i32, i32
  }
  func.func @transform_1(%arg0: i32, %arg1: i32, %arg2: i32) -> (i32, i32, i32) {
    %c0_i32 = arith.constant 0 : i32
    %c0_i32_0 = arith.constant 0 : i32
    %c0_i32_1 = arith.constant 0 : i32
    return %c0_i32, %c0_i32_0, %arg1 : i32, i32, i32
  }
  func.func @transform_2(%arg0: i32, %arg1: i32, %arg2: i32) -> (i32, i32) {
    %c0_i32 = arith.constant 0 : i32
    %c0_i32_0 = arith.constant 0 : i32
    return %c0_i32, %arg1 : i32, i32
  }
  func.func @transform_3(%arg0: i32, %arg1: i32, %arg2: i32) -> (i32, i32) {
    %c0_i32 = arith.constant 0 : i32
    %c0_i32_0 = arith.constant 0 : i32
    return %c0_i32, %arg1 : i32, i32
  }
  func.func @transform_4(%arg0: i32, %arg1: i32, %arg2: i32) -> (i32, i32, i32, i32) {
    %c0_i32 = arith.constant 0 : i32
    %c0_i32_0 = arith.constant 0 : i32
    return %arg0, %arg2, %c0_i32, %arg1 : i32, i32, i32, i32
  }
}

</mosaic_0001>

<bundles_post_ra>
// kernel: tpu_custom_call.1
= control target key start
LH: loop header
LB: loop body
LE: loop exit
PB: predicated region body
PF: predicated region fallthrough
CT: control target
= control target key end

     0   :  { %9 = vsyncpa [#allocation3], 0  ;;  %s9140_s0 = inlined_call_operand.vmem [shape: bf16[2,18,18,4], index: 0, kind: input, shape index: {}]   ;;  %s9141_s1 = inlined_call_operand.vmem [shape: bf16[9,4,128], index: 1, kind: input, shape index: {}]   ;;  %s9142_s2 = inlined_call_operand.vmem [shape: f32[1,128], index: 2, kind: input, shape index: {}]   ;;  %s9143_s3 = inlined_call_operand.vmem [shape: f32[1,128], index: 3, kind: input, shape index: {}]   ;;  %s9144_s4 = inlined_call_operand.hbm [shape: f32[2,16,16,128], index: 4, kind: output, shape index: {}]  }
   0x1   :  { %11 = vsyncpa [#allocation3 + $0x1], 0  ;;  %s6360_s15 = smov 0   ;;  %s6362_s16 = smov 0  }
   0x2   :  { %s6364_s17 = smov 0   ;;  %s6366_s18 = smov 0  }
   0x3   :  { %s6368_s19 = smov 0   ;;  %s6370_s20 = smov 0  }
   0x4 LB: > { %s5121_s21 = sadd.s32 4294967295, %s6330_s20   ;;  %s5122_s22 = sadd.s32 4294967294, %s6330_s20   ;;  %s6330_s20 = sphi %s6370_s20, %s17_s20   ;;  %s6326_s19 = sphi %s6368_s19, %s9423_s19   ;;  %s6322_s18 = sphi %s6366_s18, %s9422_s18   ;;  %s6318_s17 = sphi %s6364_s17, %s9421_s17   ;;  %s6314_s16 = sphi %s6362_s16, %s9420_s16   ;;  %s6310_s15 = sphi %s6360_s15, %s9419_s15  }
   0x5   : > { %s36_s23 = sadd.s32 1, %s6326_s19  ;;  %s151_s24 = sadd.s32 1, %s6318_s17 }
   0x6   : > { %p38_p0 = scmp.ge.s32.totalorder %s36_s23, 2  ;;  %p161_p1 = scmp.ne.s32.totalorder %s6318_s17, %s6314_s16 }
   0x7   : > { %p162_p2 = scmp.eq.s32.totalorder %s5121_s21, 1  ;;  %p167_p3 = scmp.ne.s32.totalorder %s6314_s16, %s6310_s15 }
   0x8   : > { %s9425_s23 = smov (%p38_p0, %s36_s23), 0  ;;  %p168_p5 = scmp.eq.s32.totalorder %s5122_s22, 1 }
   0x9   : > { %p6400_p4 = por %p162_p2, %p161_p1  ;;  %s144_s26 = ssub.s32 %s6326_s19, %s9425_s23 }
   0xa   : > { %p5128_p6 = scmp.ge.s32.totalorder %s6330_s20, 1  ;;  %p149_p7 = scmp.eq.s32.totalorder %s144_s26, 0 }
   0xb   : > { %p6407_p8 = por %p168_p5, %p167_p3  ;;  %p213_p9 = scmp.lt.s32.totalorder %s6330_s20, 3 }
   0xc   : > { %s6413_s28 = scalar_select %p149_p7, %s6318_s17, %s151_s24  }
   0xd   : > { %p214_p10 = pnand %p5128_p6, %p213_p9 }
   0xf   : > { %217 = sbr.rel (%p214_p10) target bundleno = 581 (0x245), region = 36 }
  0x14   : > { %v5131_v0 = vld [vmem:[%s9141_s1 + $0x2] sm:$0x3]  ;;  %vm805_vm0 = vcmask 1041408   ;;  %p249_p11 = scmp.lt.s32.totalorder %s6322_s18, 1  ;;  %v302_v2 = vld [vmem:[%s9141_s1] sm:$0x3] }
  0x15   : > { %6137 = vmatprep.subr.msk.bf16.mxu1 %vm805_vm0, %v5131_v0  ;;  %6136 = vmatprep.subr.msk.bf16.mxu0 %vm805_vm0, %v5131_v0  ;;  %v807_v1 = vsel %vm805_vm0, %v5131_v0, 0  ;;  %v5212_v3 = vld [vmem:[%s9141_s1 + $0x4] sm:$0x3]  ;;  %vm319_vm1 = vsmask.f32 3328  ;;  %v6437_v4 = vsel %vm805_vm0, %v302_v2, 0 }
  0x16   : > { %6135 = vmatpush3.bf16.msra.mxu1 %v807_v1  ;;  %5829 = vmatpush3.bf16.msra.mxu0 %v807_v1  ;;  %s250_s7 = scalar_select %p249_p11, %s6322_s18, 1  ;;  %vm320_vm2 = vsmask.f32 7440  ;;  %vm756_vm3 = vcmask 31744   ;;  %v6463_v16 = vsel %vm805_vm0, %v5212_v3, 0  ;;  %vm1310_vm5 = vcmask 1042432  }
  0x17   : > { %6138 = vmatprep.subr.msk.bf16.mxu1 %vm805_vm0, %v302_v2  ;;  %6139 = vmatprep.subr.msk.bf16.mxu0 %vm805_vm0, %v5212_v3  ;;  %vm6478_vm4 = vmor %vm319_vm1, %vm320_vm2  ;;  %vm1311_vm6 = vcmask 1046532   ;;  %s5674_s24 = sshll.u32 %s6322_s18, 12 }
  0x18   : > { %s6146_s10 = smul.u32 216, %s250_s7  ;;  %vm6764_vm7 = vmor %vm1310_vm5, %vm1311_vm6  ;;  %s9087_s5 = scalar_lea.hbm %s9144_s4, %s5674_s24 }
  0x19   : > { %s6332_s7 = smov [#allocation2]  }
  0x1a   : > { %s6434_s13 = scalar_lea.vmem %s9140_s0, %s6146_s10  ;;  %s246_s10 = sand.u32 1, %s6314_s16  }
  0x1b   : > { %v6440_v5 = vld [vmem:[%s6434_s13] sm:$0xf]  ;;  %v6443_v6 = vld [vmem:[%s6434_s13 + $0x4] sm:$0xf]  ;;  %v6446_v7 = vld [vmem:[%s6434_s13 + $0x8] sm:$0x1] }
  0x1c   : > { %v323_v8 = vshrl.u32 %v6440_v5, 16  ;;  %v326_v9 = vshll.u32 %v6440_v5, 16  ;;  %v332_v10 = vshll.u32 %v6443_v6, 16  ;;  %v336_v11 = vshrl.u32 %v6443_v6, 16  ;;  %v6453_v12 = vld [vmem:[%s6434_s13 + $0x60] sm:$0xf] }
  0x1d   : > { %v342_v13 = vshll.u32 %v6446_v7, 16  ;;  %v6457_v14 = vld [vmem:[%s6434_s13 + $0x64] sm:$0xf]  ;;  %v6460_v15 = vld [vmem:[%s6434_s13 + $0x68] sm:$0x1]  ;;  %v515_v22 = vshrl.u32 %v6453_v12, 16 }
  0x1e   : > { %v325_v17 = vrot.slane %v323_v8, 4  ;;  %v328_v18 = vrot.slane %v326_v9, 5  ;;  %v334_v19 = vrot.slane %v332_v10, 5  ;;  %v338_v20 = vrot.slane %v336_v11, 4  ;;  %v6471_v29 = vld [vmem:[%s6434_s13 + $0xc] sm:$0xf] }
  0x1f   : > { %v344_v21 = vrot.slane %v342_v13, 5  ;;  %v518_v23 = vshll.u32 %v6453_v12, 16  ;;  %v524_v24 = vshll.u32 %v6457_v14, 16  ;;  %v528_v27 = vshrl.u32 %v6457_v14, 16  ;;  %v6474_v30 = vld [vmem:[%s6434_s13 + $0x10] sm:$0xf] }
  0x20   : > { %v329_v25 = vor.u32 %v328_v18, %v325_v17  ;;  %v339_v26 = vor.u32 %v338_v20, %v334_v19  ;;  %v534_v28 = vshll.u32 %v6460_v15, 16  ;;  %v517_v33 = vrot.slane %v515_v22, 4  ;;  %v6484_v41 = vld [vmem:[%s6434_s13 + $0x14] sm:$0x1]  ;;  %v6495_v53 = vld [vmem:[%s6434_s13 + $0x6c] sm:$0xf] }
  0x21   : > { %v520_v34 = vrot.slane %v518_v23, 5  ;;  %v526_v35 = vrot.slane %v524_v24, 5  ;;  %v530_v38 = vrot.slane %v528_v27, 4  ;;  %v347_v42 = vshrl.u32 %v6471_v29, 16  ;;  %v6499_v58 = vld [vmem:[%s6434_s13 + $0x70] sm:$0xf] }
  0x22   : > { %v330_v36 = vrot.slane %v329_v25, 4  ;;  %v340_v37 = vrot.slane %v339_v26, 4  ;;  %v536_v39 = vrot.slane %v534_v28, 5  ;;  %v350_v43 = vshll.u32 %v6471_v29, 16  ;;  %v6507_v63 = vld [vmem:[%s6434_s13 + $0x74] sm:$0x1] }
  0x23   : > { %v521_v40 = vor.u32 %v520_v34, %v517_v33  ;;  %v356_v44 = vshll.u32 %v6474_v30, 16  ;;  %v531_v47 = vor.u32 %v530_v38, %v526_v35  ;;  %v360_v48 = vshrl.u32 %v6474_v30, 16  ;;  %v6513_v8 = vld [vmem:[%s6434_s13 + $0x18] sm:$0xf]  ;;  %v6526_v25 = vld [vmem:[%s6434_s13 + $0x20] sm:$0x1] }
  0x24   : > { %v335_v45 = vsel %vm6478_vm4, %v330_v36, %v334_v19  ;;  %v345_v46 = vsel %vm6478_vm4, %v340_v37, %v344_v21  ;;  %v349_v51 = vrot.slane %v347_v42, 4  ;;  %v352_v52 = vrot.slane %v350_v43, 5  ;;  %v6520_v21 = vld [vmem:[%s6434_s13 + $0x1c] sm:$0xf]  ;;  %s5129_s21 = sshll.u32 %s246_s10, 8  ;;  %s9095_s18 = scalar_lea.sflag [#allocation3], %s246_s10 }
  0x25   : > { %v5132_v49 = vcombine.low %v335_v45, %v345_v46  ;;  %v522_v50 = vrot.slane %v521_v40, 4  ;;  %v532_v54 = vrot.slane %v531_v47, 4  ;;  %v358_v55 = vrot.slane %v356_v44, 5  ;;  %v6539_v40 = vld [vmem:[%s9141_s1 + $0x8] sm:$0x3]  ;;  %s8920_s22 = scalar_lea.vmem [#allocation2], %s5129_s21 }
  0x26   : > { %v362_v56 = vrot.slane %v360_v48, 4  ;;  %v366_v57 = vshll.u32 %v6484_v41, 16  ;;  %v353_v60 = vor.u32 %v352_v52, %v349_v51  ;;  %v539_v3 = vshrl.u32 %v6495_v53, 16  ;;  %v6544_v46 = vld [vmem:[%s6434_s13 + $0x7c] sm:$0xf]  ;;  %s4995_s26 = sshll.u32 %s8920_s22, 4  ;;  %s9089_s26 = int_to_ptr.vmem [resolvable:$true] %s4995_s26 }
  0x27   : > { %5830 = vmatprep.mubr.msk.bf16.mxu0 %vm756_vm3, %v5132_v49  ;;  %v527_v59 = vsel %vm6478_vm4, %v522_v50, %v526_v35  ;;  %v537_v0 = vsel %vm6478_vm4, %v532_v54, %v536_v39  ;;  %v542_v11 = vshll.u32 %v6495_v53, 16  ;;  %v548_v13 = vshll.u32 %v6499_v58, 16  ;;  %v6533_v35 = vld [vmem:[%s6434_s13 + $0x78] sm:$0xf]  ;;  %s6254_s6 = scalar_lea.vmem %s9089_s26, 4096  ;;  %s6258_s8 = sshll.u32 %s6332_s7, 4  ;;  %s6259_s8 = int_to_ptr.vmem [resolvable:$false] %s6258_s8 }
  0x28   : > { %v363_v1 = vor.u32 %v362_v56, %v358_v55  ;;  %v368_v2 = vrot.slane %v366_v57, 5  ;;  %v5140_v9 = vcombine.low %v527_v59, %v537_v0  ;;  %v354_v10 = vrot.slane %v353_v60, 4  ;;  %v6551_v56 = vld [vmem:[%s6434_s13 + $0x80] sm:$0x1]  ;;  %p6255_p12 = scmp.ne.s32.totalorder %s9089_s26, %s6254_s6  ;;  %s6260_s9 = scalar_lea.vmem %s6259_s8, 8192 }
  0x29   : > { %v541_v18 = vrot.slane %v539_v3, 4  ;;  %v552_v19 = vshrl.u32 %v6499_v58, 16  ;;  %v558_v20 = vshll.u32 %v6507_v63, 16  ;;  %v544_v23 = vrot.slane %v542_v11, 5  ;;  %9182 = vst [vmem:[#allocation5_spill] sm:$0xff] %v6551_v56  ;;  %p6261_p1 = scmp.lt.s32.totalorder %s9089_s26, %s6259_s8  ;;  %p6262_p2 = scmp.lt.s32.totalorder %s6260_s9, %s6254_s6 }
  0x2a   : > { %v364_v17 = vrot.slane %v363_v1, 4  ;;  %5846 = vmatprep.mubr.msk.bf16.mxu1 %vm756_vm3, %v5140_v9  ;;  %v359_v22 = vsel %vm6478_vm4, %v354_v10, %v358_v55  ;;  %v550_v24 = vrot.slane %v548_v13, 5  ;;  %v371_v26 = vshrl.u32 %v6513_v8, 16  ;;  %v6557_v1 = vld [vmem:[%s6434_s13 + $0x24] sm:$0xf]  ;;  %p6256_p13 = pnand %p6255_p12, %p6400_p4 }
  0x2b   : > { %v554_v28 = vrot.slane %v552_v19, 4  ;;  %v560_v33 = vrot.slane %v558_v20, 5  ;;  %v374_v34 = vshll.u32 %v6513_v8, 16  ;;  %v545_v37 = vor.u32 %v544_v23, %v541_v18  ;;  %v6565_v10 = vld [vmem:[%s6434_s13 + $0x28] sm:$0xf]  ;;  %p6263_p3 = por %p6262_p2, %p6261_p1 }
  0x2c   : > { %v369_v27 = vsel %vm6478_vm4, %v364_v17, %v368_v2  ;;  %v373_v38 = vrot.slane %v371_v26, 4  ;;  %v380_v39 = vshll.u32 %v6520_v21, 16  ;;  %v384_v44 = vshrl.u32 %v6520_v21, 16  ;;  %v6571_v19 = vld [vmem:[%s9141_s1 + $0x6] sm:$0x3]  ;;  %p6257_p0 = pneg %p6256_p13 }
  0x2d   : > { %v5133_v36 = vcombine.low %v359_v22, %v369_v27  ;;  %v555_v42 = vor.u32 %v554_v28, %v550_v24  ;;  %v376_v43 = vrot.slane %v374_v34, 5  ;;  %v390_v45 = vshll.u32 %v6526_v25, 16 }
  0x2e   : > { %v546_v47 = vrot.slane %v545_v37, 4  ;;  %v382_v48 = vrot.slane %v380_v39, 5  ;;  %v563_v49 = vshrl.u32 %v6533_v35, 16  ;;  %v566_v50 = vshll.u32 %v6533_v35, 16  ;;  %p6264_p5 = pnand %p6263_p3, %p6257_p0 }
  0x2f   : > { %5831 = vmatmul.mubr.msk.bf16.vlgmr.msra.gmra.mxu0 %vm756_vm3, %v5133_v36  ;;  %v556_v51 = vrot.slane %v555_v42, 4  ;;  %v377_v52 = vor.u32 %v376_v43, %v373_v38  ;;  %v386_v54 = vrot.slane %v384_v44, 4  ;;  %v392_v55 = vrot.slane %v390_v45, 5  ;;  %v6583_v36 = vld [vmem:[%s6434_s13 + $0x84] sm:$0xf] }
  0x30   : > { %5897 = vmatpush3.bf16.msra.mxu0 %v6463_v16  ;;  %v551_v57 = vsel %vm6478_vm4, %v546_v47, %v550_v24  ;;  %v565_v59 = vrot.slane %v563_v49, 4  ;;  %v568_v60 = vrot.slane %v566_v50, 5  ;;  %v572_v0 = vshll.u32 %v6544_v46, 16  ;;  %v6576_v24 = vld [vmem:[%s6434_s13 + $0x2c] sm:$0x1] }
  0x31   : > { %6141 = vmatprep.subr.msk.bf16.mxu0 %vm805_vm0, %v6539_v40  ;;  %v561_v16 = vsel %vm6478_vm4, %v556_v51, %v560_v33  ;;  %v378_v2 = vrot.slane %v377_v52, 4  ;;  %v387_v3 = vor.u32 %v386_v54, %v382_v48  ;;  %v576_v9 = vshrl.u32 %v6544_v46, 16  ;;  %v6590_v43 = vld [vmem:[%s6434_s13 + $0x88] sm:$0xf]  ;;  %v6598_v51 = vld [vmem:[%s6434_s13 + $0x8c] sm:$0x1] }
  0x32   : > { %v5141_v11 = vcombine.low %v551_v57, %v561_v16  ;;  %v569_v13 = vor.u32 %v568_v60, %v565_v59  ;;  %v574_v17 = vrot.slane %v572_v0, 5  ;;  %v582_v18 = vshll.u32 %v6551_v56, 16  ;;  %9183 = vst [vmem:[#allocation6_spill] sm:$0xff] %v6598_v51  ;;  %v6606_v60 = vld [vmem:[%s6434_s13 + $0x30] sm:$0xf] }
  0x33   : > { %v383_v20 = vsel %vm6478_vm4, %v378_v2, %v382_v48  ;;  %v388_v22 = vrot.slane %v387_v3, 4  ;;  %v578_v23 = vrot.slane %v576_v9, 4  ;;  %v395_v26 = vshrl.u32 %v6557_v1, 16  ;;  %v6611_v9 = vld [vmem:[%s6434_s13 + $0x34] sm:$0xf] }
  0x34   : > { %5847 = vmatmul.mubr.msk.bf16.vlgmr.msra.gmra.mxu1 %vm756_vm3, %v5141_v11  ;;  %v570_v27 = vrot.slane %v569_v13, 4  ;;  %v584_v28 = vrot.slane %v582_v18, 5  ;;  %v398_v33 = vshll.u32 %v6557_v1, 16  ;;  %v404_v34 = vshll.u32 %v6565_v10, 16 }
  0x35   : > { %5863 = vmatpush3.bf16.msra.mxu1 %v6437_v4  ;;  %v393_v37 = vsel %vm6478_vm4, %v388_v22, %v392_v55  ;;  %v579_v38 = vor.u32 %v578_v23, %v574_v17  ;;  %v397_v39 = vrot.slane %v395_v26, 4  ;;  %v408_v42 = vshrl.u32 %v6565_v10, 16 }
  0x36   : > { %v5134_v44 = vcombine.low %v383_v20, %v393_v37  ;;  %v575_v45 = vsel %vm6478_vm4, %v570_v27, %v574_v17  ;;  %v400_v47 = vrot.slane %v398_v33, 5  ;;  %v406_v48 = vrot.slane %v404_v34, 5  ;;  %6140 = vmatprep.subr.msk.bf16.mxu1 %vm805_vm0, %v6571_v19  ;;  %v6619_v33 = vld [vmem:[%s6434_s13 + $0x38] sm:$0x1] }
  0x37   : > { %v580_v4 = vrot.slane %v579_v38, 4  ;;  %v410_v49 = vrot.slane %v408_v42, 4  ;;  %v414_v50 = vshll.u32 %v6576_v24, 16  ;;  %v587_v52 = vshrl.u32 %v6583_v36, 16  ;;  %v6624_v38 = vld [vmem:[%s6434_s13 + $0x90] sm:$0xf] }
  0x38   : > { %5834 = vmatprep.mubr.msk.bf16.mxu0 %vm756_vm3, %v5134_v44  ;;  %v401_v54 = vor.u32 %v400_v47, %v397_v39  ;;  %v590_v55 = vshll.u32 %v6583_v36, 16  ;;  %v596_v57 = vshll.u32 %v6590_v43, 16  ;;  %v600_v59 = vshrl.u32 %v6590_v43, 16  ;;  %9184 = vst [vmem:[#allocation7_spill] sm:$0xff] %v6624_v38  ;;  %v6629_v47 = vld [vmem:[%s6434_s13 + $0x94] sm:$0xf] }
  0x39   : > { %v585_v0 = vsel %vm6478_vm4, %v580_v4, %v584_v28  ;;  %v411_v16 = vor.u32 %v410_v49, %v406_v48  ;;  %v416_v2 = vrot.slane %v414_v50, 5  ;;  %v589_v3 = vrot.slane %v587_v52, 4  ;;  %9185 = vst [vmem:[#allocation8_spill] sm:$0xff] %v6629_v47 }
  0x3a   : > { %v5142_v11 = vcombine.low %v575_v45, %v585_v0  ;;  %v402_v13 = vrot.slane %v401_v54, 4  ;;  %v592_v17 = vrot.slane %v590_v55, 5  ;;  %v598_v18 = vrot.slane %v596_v57, 5 }
  0x3b   : > { %v412_v20 = vrot.slane %v411_v16, 4  ;;  %v602_v22 = vrot.slane %v600_v59, 4  ;;  %v606_v23 = vshll.u32 %v6598_v51, 16  ;;  %v419_v26 = vshrl.u32 %v6606_v60, 16  ;;  %v6638_v16 = vld [vmem:[%s6434_s13 + $0x98] sm:$0x1] }
  0x3c   : > { %5850 = vmatprep.mubr.msk.bf16.mxu1 %vm756_vm3, %v5142_v11  ;;  %v407_v27 = vsel %vm6478_vm4, %v402_v13, %v406_v48  ;;  %v593_v28 = vor.u32 %v592_v17, %v589_v3  ;;  %v422_v34 = vshll.u32 %v6606_v60, 16  ;;  %v428_v37 = vshll.u32 %v6611_v9, 16  ;;  %9186 = vst [vmem:[#allocation9_spill] sm:$0xff] %v6638_v16  ;;  %v6643_v11 = vld [vmem:[%s6434_s13 + $0x3c] sm:$0xf] }
  0x3d   : > { %v417_v39 = vsel %vm6478_vm4, %v412_v20, %v416_v2  ;;  %v603_v42 = vor.u32 %v602_v22, %v598_v18  ;;  %v608_v44 = vrot.slane %v606_v23, 5  ;;  %v421_v45 = vrot.slane %v419_v26, 4  ;;  %v6648_v23 = vld [vmem:[%s6434_s13 + $0x40] sm:$0xf]  ;;  %v1263_v51 = vld [vmem:[%s6434_s13 + $0xc] sm:$0xe] }
  0x3e   : > { %v5135_v48 = vcombine.low %v407_v27, %v417_v39  ;;  %v594_v4 = vrot.slane %v593_v28, 4  ;;  %v424_v49 = vrot.slane %v422_v34, 5  ;;  %v430_v50 = vrot.slane %v428_v37, 5 }
  0x3f   : > { %v604_v52 = vrot.slane %v603_v42, 4  ;;  %v432_v54 = vshrl.u32 %v6611_v9, 16  ;;  %v438_v55 = vshll.u32 %v6619_v33, 16  ;;  %v611_v57 = vshrl.u32 %v6624_v38, 16 }
  0x40   : > { %5835 = vmatmul.mubr.msk.bf16.gmra.mxu0 %vm756_vm3, %v5135_v48  ;;  %v599_v59 = vsel %vm6478_vm4, %v594_v4, %v598_v18  ;;  %v425_v0 = vor.u32 %v424_v49, %v421_v45  ;;  %v614_v2 = vshll.u32 %v6624_v38, 16  ;;  %v620_v3 = vshll.u32 %v6629_v47, 16  ;;  %v6657_v48 = vld [vmem:[%s6434_s13 + $0x44] sm:$0x1] }
  0x41   : > { %v609_v13 = vsel %vm6478_vm4, %v604_v52, %v608_v44  ;;  %v434_v17 = vrot.slane %v432_v54, 4  ;;  %v440_v20 = vrot.slane %v438_v55, 5  ;;  %v613_v22 = vrot.slane %v611_v57, 4  ;;  %v6662_v52 = vld [vmem:[%s6434_s13 + $0x9c] sm:$0xf] }
  0x42   : > { %v5143_v18 = vcombine.low %v599_v59, %v609_v13  ;;  %v426_v26 = vrot.slane %v425_v0, 4  ;;  %v616_v27 = vrot.slane %v614_v2, 5  ;;  %v622_v28 = vrot.slane %v620_v3, 5  ;;  %9187 = vst [vmem:[#allocation10_spill] sm:$0xff] %v6662_v52  ;;  %v6666_v13 = vld [vmem:[%s6434_s13 + $0xa0] sm:$0xf] }
  0x43   : > { %v435_v34 = vor.u32 %v434_v17, %v430_v50  ;;  %v624_v37 = vshrl.u32 %v6629_v47, 16  ;;  %v630_v39 = vshll.u32 %v6638_v16, 16  ;;  %v443_v42 = vshrl.u32 %v6643_v11, 16  ;;  %9188 = vst [vmem:[#allocation11_spill] sm:$0xff] %v6666_v13 }
  0x44   : > { %5851 = vmatmul.mubr.msk.bf16.gmra.mxu1 %vm756_vm3, %v5143_v18  ;;  %v431_v44 = vsel %vm6478_vm4, %v426_v26, %v430_v50  ;;  %v617_v45 = vor.u32 %v616_v27, %v613_v22  ;;  %v446_v4 = vshll.u32 %v6643_v11, 16  ;;  %v452_v49 = vshll.u32 %v6648_v23, 16  ;;  %v6672_v26 = vld [vmem:[%s6434_s13 + $0xa4] sm:$0x1] }
  0x45   : > { %v436_v54 = vrot.slane %v435_v34, 4  ;;  %v626_v55 = vrot.slane %v624_v37, 4  ;;  %v632_v57 = vrot.slane %v630_v39, 5  ;;  %v445_v59 = vrot.slane %v443_v42, 4  ;;  %9189 = vst [vmem:[#allocation12_spill] sm:$0xff] %v6672_v26 }
  0x46   : > { %v618_v0 = vrot.slane %v617_v45, 4  ;;  %v448_v2 = vrot.slane %v446_v4, 5  ;;  %v454_v3 = vrot.slane %v452_v49, 5  ;;  %v456_v50 = vshrl.u32 %v6648_v23, 16  ;;  %v6676_v34 = vld [vmem:[%s6434_s13 + $0x48] sm:$0xf] }
  0x47   : > { %v441_v17 = vsel %vm6478_vm4, %v436_v54, %v440_v20  ;;  %v627_v22 = vor.u32 %v626_v55, %v622_v28  ;;  %v462_v18 = vshll.u32 %v6657_v48, 16  ;;  %v635_v27 = vshrl.u32 %v6662_v52, 16 }
  0x48   : > { %v5136_v37 = vcombine.low %v431_v44, %v441_v17  ;;  %v623_v39 = vsel %vm6478_vm4, %v618_v0, %v622_v28  ;;  %v449_v42 = vor.u32 %v448_v2, %v445_v59  ;;  %v458_v45 = vrot.slane %v456_v50, 4  ;;  %v6685_v17 = vld [vmem:[%s6434_s13 + $0x4c] sm:$0xf]  ;;  %v6691_v2 = vld [vmem:[%s6434_s13 + $0x50] sm:$0x1] }
  0x49   : > { %v628_v4 = vrot.slane %v627_v22, 4  ;;  %v464_v49 = vrot.slane %v462_v18, 5  ;;  %v637_v20 = vrot.slane %v635_v27, 4  ;;  %v638_v54 = vshll.u32 %v6662_v52, 16 }
  0x4a   : > { %5838 = vmatprep.mubr.msk.bf16.mxu0 %vm756_vm3, %v5136_v37  ;;  %v450_v55 = vrot.slane %v449_v42, 4  ;;  %v459_v62 = vor.u32 %v458_v45, %v454_v3  ;;  %v644_v32 = vshll.u32 %v6666_v13, 16  ;;  %v648_v44 = vshrl.u32 %v6666_v13, 16  ;;  %v6697_v42 = vld [vmem:[%s6434_s13 + $0xa8] sm:$0xf] }
  0x4b   : > { %v633_v28 = vsel %vm6478_vm4, %v628_v4, %v632_v57  ;;  %v640_v59 = vrot.slane %v638_v54, 5  ;;  %v654_v0 = vshll.u32 %v6672_v26, 16  ;;  %v467_v50 = vshrl.u32 %v6676_v34, 16  ;;  %9190 = vst [vmem:[#allocation13_spill] sm:$0xff] %v6697_v42 }
  0x4c   : > { %v5144_v22 = vcombine.low %v623_v39, %v633_v28  ;;  %v455_v18 = vsel %vm6478_vm4, %v450_v55, %v454_v3  ;;  %v460_v27 = vrot.slane %v459_v62, 4  ;;  %v646_v37 = vrot.slane %v644_v32, 5 }
  0x4d   : > { %v641_v45 = vor.u32 %v640_v59, %v637_v20  ;;  %v650_v61 = vrot.slane %v648_v44, 4  ;;  %v656_v57 = vrot.slane %v654_v0, 5  ;;  %v469_v4 = vrot.slane %v467_v50, 4  ;;  %v6707_v44 = vld [vmem:[%s6434_s13 + $0xac] sm:$0xf] }
  0x4e   : > { %5854 = vmatprep.mubr.msk.bf16.mxu1 %vm756_vm3, %v5144_v22  ;;  %v465_v54 = vsel %vm6478_vm4, %v460_v27, %v464_v49  ;;  %v470_v39 = vshll.u32 %v6676_v34, 16  ;;  %v476_v28 = vshll.u32 %v6685_v17, 16  ;;  %v480_v62 = vshrl.u32 %v6685_v17, 16  ;;  %9191 = vst [vmem:[#allocation14_spill] sm:$0xff] %v6707_v44  ;;  %v6710_v22 = vld [vmem:[%s6434_s13 + $0xb0] sm:$0x1] }
  0x4f   : > { %v5137_v3 = vcombine.low %v455_v18, %v465_v54  ;;  %v642_v32 = vrot.slane %v641_v45, 4  ;;  %v651_v55 = vor.u32 %v650_v61, %v646_v37  ;;  %v486_v20 = vshll.u32 %v6691_v2, 16  ;;  %9192 = vst [vmem:[#allocation15_spill] sm:$0xff] %v6710_v22 }
  0x50   : > { %v472_v59 = vrot.slane %v470_v39, 5  ;;  %v478_v0 = vrot.slane %v476_v28, 5  ;;  %v482_v50 = vrot.slane %v480_v62, 4  ;;  %v659_v49 = vshrl.u32 %v6697_v42, 16  ;;  %v6719_v62 = vld [vmem:[%s6434_s13 + $0x54] sm:$0xf] }
  0x51   : > { %5839 = vmatmul.mubr.msk.bf16.gmra.mxu0 %vm756_vm3, %v5137_v3  ;;  %v647_v18 = vsel %vm6478_vm4, %v642_v32, %v646_v37  ;;  %v652_v27 = vrot.slane %v651_v55, 4  ;;  %v488_v61 = vrot.slane %v486_v20, 5  ;;  %v662_v45 = vshll.u32 %v6697_v42, 16  ;;  %v6726_v55 = vld [vmem:[%s6434_s13 + $0x58] sm:$0xf] }
  0x52   : > { %v473_v54 = vor.u32 %v472_v59, %v469_v4  ;;  %v483_v56 = vor.u32 %v482_v50, %v478_v0  ;;  %v661_v39 = vrot.slane %v659_v49, 4  ;;  %v668_v28 = vshll.u32 %v6707_v44, 16  ;;  %v6729_v49 = vld [vmem:[%s6434_s13 + $0x5c] sm:$0x1] }
  0x53   : > { %v657_v3 = vsel %vm6478_vm4, %v652_v27, %v656_v57  ;;  %v664_v26 = vrot.slane %v662_v45, 5  ;;  %v672_v37 = vshrl.u32 %v6707_v44, 16  ;;  %v678_v32 = vshll.u32 %v6710_v22, 16  ;;  %v1262_v22 = vld [vmem:[%s6434_s13] sm:$0xe] }
  0x54   : > { %v5145_v4 = vcombine.low %v647_v18, %v657_v3  ;;  %v474_v20 = vrot.slane %v473_v54, 4  ;;  %v484_v59 = vrot.slane %v483_v56, 4  ;;  %v670_v50 = vrot.slane %v668_v28, 5  ;;  %v6740_v54 = vld [vmem:[%s6434_s13 + $0xb4] sm:$0xf] }
  0x55   : > { %v665_v42 = vor.u32 %v664_v26, %v661_v39  ;;  %v674_v52 = vrot.slane %v672_v37, 4  ;;  %v680_v13 = vrot.slane %v678_v32, 5  ;;  %v491_v57 = vshrl.u32 %v6719_v62, 16  ;;  %9193 = vst [vmem:[#allocation16_spill] sm:$0xff] %v6740_v54  ;;  %v6743_v37 = vld [vmem:[%s6434_s13 + $0xb8] sm:$0xf] }
  0x56   : > { %5855 = vmatmul.mubr.msk.bf16.gmra.mxu1 %vm756_vm3, %v5145_v4  ;;  %v479_v27 = vsel %vm6478_vm4, %v474_v20, %v478_v0  ;;  %v489_v18 = vsel %vm6478_vm4, %v484_v59, %v488_v61  ;;  %v494_v56 = vshll.u32 %v6719_v62, 16  ;;  %v500_v45 = vshll.u32 %v6726_v55, 16  ;;  %v6748_v61 = vld [vmem:[%s6434_s13 + $0xbc] sm:$0x1] }
  0x57   : > { %v5138_v26 = vcombine.low %v479_v27, %v489_v18  ;;  %v666_v39 = vrot.slane %v665_v42, 4  ;;  %v675_v28 = vor.u32 %v674_v52, %v670_v50  ;;  %v493_v3 = vrot.slane %v491_v57, 4 }
  0x58   : > { %v496_v32 = vrot.slane %v494_v56, 5  ;;  %v502_v4 = vrot.slane %v500_v45, 5  ;;  %v504_v0 = vshrl.u32 %v6726_v55, 16  ;;  %v510_v20 = vshll.u32 %v6729_v49, 16 }
  0x59   : > { %5842 = vmatprep.mubr.msk.bf16.mxu0 %vm756_vm3, %v5138_v26  ;;  %v671_v59 = vsel %vm6478_vm4, %v666_v39, %v670_v50  ;;  %v676_v27 = vrot.slane %v675_v28, 4  ;;  %v683_v52 = vshrl.u32 %v6740_v54, 16  ;;  %v686_v42 = vshll.u32 %v6740_v54, 16 }
  0x5a   : > { %v497_v57 = vor.u32 %v496_v32, %v493_v3  ;;  %v506_v18 = vrot.slane %v504_v0, 4  ;;  %v512_v56 = vrot.slane %v510_v20, 5  ;;  %v692_v45 = vshll.u32 %v6743_v37, 16 }
  0x5b   : > { %v681_v44 = vsel %vm6478_vm4, %v676_v27, %v680_v13  ;;  %v685_v16 = vrot.slane %v683_v52, 4  ;;  %v688_v26 = vrot.slane %v686_v42, 5  ;;  %v696_v38 = vshrl.u32 %v6743_v37, 16 }
  0x5c   : > { %v5146_v50 = vcombine.low %v671_v59, %v681_v44  ;;  %v498_v39 = vrot.slane %v497_v57, 4  ;;  %v507_v28 = vor.u32 %v506_v18, %v502_v4  ;;  %v694_v47 = vrot.slane %v692_v45, 5  ;;  %v1264_v57 = vld [vmem:[%s6434_s13 + $0x18] sm:$0xe] }
  0x5d   : > { %v689_v54 = vor.u32 %v688_v26, %v685_v16  ;;  %v698_v3 = vrot.slane %v696_v38, 4  ;;  %v702_v32 = vshll.u32 %v6748_v61, 16  ;;  %v5196_v13 = vrot.slane %v1262_v22, 9 }
  0x5e   : > { %5858 = vmatprep.mubr.msk.bf16.mxu1 %vm756_vm3, %v5146_v50  ;;  %v503_v44 = vsel %vm6478_vm4, %v498_v39, %v502_v4  ;;  %v508_v20 = vrot.slane %v507_v28, 4  ;;  %v1315_v59 = vrot.slane %v6443_v6, 5  ;;  %v5165_v38 = vcombine.low %v6471_v29, %v6474_v30 }
  0x5f   : > { %v690_v16 = vrot.slane %v689_v54, 4  ;;  %v699_v27 = vor.u32 %v698_v3, %v694_v47  ;;  %v704_v52 = vrot.slane %v702_v32, 5  ;;  %v5197_v42 = vrot.slane %v1263_v51, 9 }
  0x60   : > { %v513_v18 = vsel %vm6478_vm4, %v508_v20, %v512_v56  ;;  %v1316_v22 = vsel %vm6764_vm7, %v5196_v13, %v1315_v59  ;;  %v1317_v45 = vrot.slane %v1315_v59, 4  ;;  %v9196_v4 = vrot.slane %v6474_v30, 5 }
  0x61   : > { %v5139_v50 = vcombine.low %v503_v44, %v513_v18  ;;  %v695_v54 = vsel %vm6478_vm4, %v690_v16, %v694_v47  ;;  %v700_v39 = vrot.slane %v699_v27, 4  ;;  %v5164_v51 = vcombine.low %v6440_v5, %v6443_v6  ;;  %v1265_v27 = vld [vmem:[%s6434_s13 + $0x24] sm:$0xe] }
  0x62   : > { %v1324_v26 = vrot.slane %v9196_v4, 4  ;;  %v9197_v28 = vrot.slane %v6446_v7, 5  ;;  %v9198_v3 = vmov %v9196_v4  ;;  %v5166_v13 = vcombine.low %v6513_v8, %v6520_v21  ;;  %v1267_v4 = vld [vmem:[%s6434_s13 + $0x3c] sm:$0xe] }
  0x63   : > { %v1323_v32 = vsel %vm6764_vm7, %v5197_v42, %v9198_v3  ;;  %v5198_v44 = vrot.slane %v1264_v57, 9  ;;  %5843 = vmatmul.mubr.msk.bf16.gmra.mxu0 %vm756_vm3, %v5139_v50  ;;  %v705_v47 = vsel %vm6478_vm4, %v700_v39, %v704_v52  ;;  %v9199_v6 = vrot.slane %v6484_v41, 5  ;;  %v1266_v42 = vld [vmem:[%s6434_s13 + $0x30] sm:$0xe]  ;;  %v1268_v39 = vld [vmem:[%s6434_s13 + $0x48] sm:$0xe] }
  0x64   : > { %v1319_v56 = vsel %vm6764_vm7, %v1317_v45, %v9197_v28  ;;  %v1329_v20 = vrot.slane %v6520_v21, 5  ;;  %v5147_v59 = vcombine.low %v695_v54, %v705_v47  ;;  %v1332_v16 = vrot.slane %v6526_v25, 5  ;;  %v1269_v47 = vld [vmem:[%s6434_s13 + $0x54] sm:$0xe]  ;;  %v7059_v21 = vld [vmem:[%s6434_s13 + $0x2c] sm:$0x1] }
  0x65   : > { %v5213_v5 = vcombine.low %v1316_v22, %v1319_v56  ;;  %v1326_v7 = vsel %vm6764_vm7, %v1324_v26, %v9199_v6  ;;  %v1886_v52 = vsel %vm805_vm0, %v6571_v19, 0  ;;  %v1336_v18 = vrot.slane %v6565_v10, 5 }
  0x66   : > { %v1330_v41 = vsel %vm6764_vm7, %v5198_v44, %v1329_v20  ;;  %v1331_v57 = vrot.slane %v1329_v20, 4  ;;  %5859 = vmatmul.mubr.msk.bf16.gmra.mxu1 %vm756_vm3, %v5147_v59  ;;  %v5214_v22 = vcombine.low %v1323_v32, %v1326_v7  ;;  %v2612_v25 = vsel %vm805_vm0, %v6539_v40, 0 }
  0x67   : > { %5898 = vmatprep.mubr.msk.bf16.mxu0 %vm756_vm3, %v5213_v5  ;;  %v1343_v45 = vrot.slane %v6611_v9, 5  ;;  %5864 = vmatprep.mubr.msk.bf16.mxu1 %vm756_vm3, %v5164_v51  ;;  %v5199_v26 = vrot.slane %v1265_v27, 9  ;;  %v1339_v50 = vrot.slane %v6576_v24, 5  ;;  %v5200_v54 = vrot.slane %v1266_v42, 9  ;;  %v6831_v24 = vld [vmem:[%s9141_s1 + $0xc] sm:$0x3] }
  0x68   : > { %v1333_v19 = vsel %vm6764_vm7, %v1331_v57, %v1332_v16  ;;  %v1338_v56 = vrot.slane %v1336_v18, 4  ;;  %v1346_v32 = vrot.slane %v6619_v33, 5  ;;  %v5201_v44 = vrot.slane %v1267_v4, 9 }
  0x69   : > { %v5215_v28 = vcombine.low %v1330_v41, %v1333_v19  ;;  %v1345_v3 = vrot.slane %v1343_v45, 4  ;;  %v1350_v40 = vrot.slane %v6648_v23, 5  ;;  %v1374_v5 = vrot.slane %v6460_v15, 5 }
  0x6a   : > { %v1353_v51 = vrot.slane %v6657_v48, 5  ;;  %v5202_v6 = vrot.slane %v1268_v39, 9  ;;  %v1357_v7 = vrot.slane %v6685_v17, 5  ;;  %v5167_v33 = vcombine.low %v6557_v1, %v6565_v10  ;;  %v1270_v1 = vld [vmem:[%s6434_s13 + $0x60] sm:$0xe] }
  0x6b   : > { %5899 = vmatmul.mubr.msk.bf16.vlgmr.msra.gmra.mxu0 %vm756_vm3, %v5214_v22  ;;  %v1337_v20 = vsel %vm6764_vm7, %v5199_v26, %v1336_v18  ;;  %v1352_v59 = vrot.slane %v1350_v40, 4  ;;  %v1360_v16 = vrot.slane %v6691_v2, 5  ;;  %v1340_v48 = vsel %vm6764_vm7, %v1338_v56, %v1339_v50  ;;  %v6859_v22 = vld [vmem:[%s9141_s1 + $0xa] sm:$0x3]  ;;  %v6884_v50 = vld [vmem:[%s6434_s13 + $0x6c] sm:$0xe] }
  0x6c   : > { %5965 = vmatpush3.bf16.msra.mxu0 %v2612_v25  ;;  %5902 = vmatprep.mubr.msk.bf16.mxu0 %vm756_vm3, %v5215_v28  ;;  %v1344_v27 = vsel %vm6764_vm7, %v5200_v54, %v1343_v45  ;;  %v1347_v42 = vsel %vm6764_vm7, %v1345_v3, %v1346_v32  ;;  %v1359_v41 = vrot.slane %v1357_v7, 4  ;;  %v6849_v10 = vsel %vm6764_vm7, %v5201_v44, %v1350_v40  ;;  %v1273_v39 = vld [vmem:[%s6434_s13 + $0x84] sm:$0xe]  ;;  %v6913_v44 = vld [vmem:[%s6434_s13 + $0x78] sm:$0xe] }
  0x6d   : > { %v6853_v2 = vsel %vm6764_vm7, %v5202_v6, %v1357_v7  ;;  %v5203_v57 = vrot.slane %v1269_v47, 9  ;;  %v1364_v18 = vrot.slane %v6726_v55, 5  ;;  %6143 = vmatprep.subr.msk.bf16.mxu0 %vm805_vm0, %v6831_v24  ;;  %v6869_v25 = vsel %vm6764_vm7, %v1352_v59, %v1353_v51  ;;  %v1274_v40 = vld [vmem:[%s6434_s13 + $0x90] sm:$0xe] }
  0x6e   : > { %5865 = vmatmul.mubr.msk.bf16.vlgmr.msra.gmra.mxu1 %vm756_vm3, %v5165_v38  ;;  %v6873_v45 = vsel %vm6764_vm7, %v1359_v41, %v1360_v16  ;;  %v1367_v4 = vrot.slane %v6729_v49, 5  ;;  %v1371_v19 = vrot.slane %v6457_v14, 5  ;;  %v5216_v29 = vcombine.low %v1337_v20, %v1340_v48  ;;  %v9200_v48 = vld [vmem:[#allocation6_spill] sm:$0xff] }
  0x6f   : > { %5931 = vmatpush3.bf16.msra.mxu1 %v1886_v52  ;;  %5868 = vmatprep.mubr.msk.bf16.mxu1 %vm756_vm3, %v5166_v13  ;;  %v5168_v30 = vcombine.low %v6606_v60, %v6611_v9  ;;  %v1366_v38 = vrot.slane %v1364_v18, 4  ;;  %v5204_v26 = vrot.slane %v1270_v1, 9  ;;  %v5217_v49 = vcombine.low %v1344_v27, %v1347_v42  ;;  %v1275_v42 = vld [vmem:[%s6434_s13 + $0x9c] sm:$0xe] }
  0x70   : > { %v5169_v52 = vcombine.low %v6643_v11, %v6648_v23  ;;  %v5170_v8 = vcombine.low %v6676_v34, %v6685_v17  ;;  %6142 = vmatprep.subr.msk.bf16.mxu1 %vm805_vm0, %v6859_v22  ;;  %v5218_v60 = vcombine.low %v6849_v10, %v6869_v25  ;;  %v5219_v9 = vcombine.low %v6853_v2, %v6873_v45  ;;  %v9201_v10 = vld [vmem:[#allocation8_spill] sm:$0xff]  ;;  %v9202_v2 = vld [vmem:[#allocation7_spill] sm:$0xff] }
  0x71   : > { %v1373_v54 = vrot.slane %v1371_v19, 4  ;;  %v6903_v28 = vsel %vm6764_vm7, %v5203_v57, %v1364_v18  ;;  %v6907_v56 = vsel %vm6764_vm7, %v1366_v38, %v1367_v4  ;;  %v5205_v32 = vrot.slane %v6884_v50, 9  ;;  %v1276_v18 = vld [vmem:[%s6434_s13 + $0xa8] sm:$0xe]  ;;  %v9204_v38 = vld [vmem:[#allocation11_spill] sm:$0xff] }
  0x72   : > { %v6919_v47 = vsel %vm6764_vm7, %v5204_v26, %v1371_v19  ;;  %v1378_v51 = vrot.slane %v6499_v58, 5  ;;  %v1381_v6 = vrot.slane %v6507_v63, 5  ;;  %v5207_v59 = vrot.slane %v1273_v39, 9  ;;  %v9203_v19 = vld [vmem:[#allocation9_spill] sm:$0xff]  ;;  %v9205_v26 = vld [vmem:[#allocation10_spill] sm:$0xff] }
  0x73   : > { %5903 = vmatmul.mubr.msk.bf16.gmra.mxu0 %vm756_vm3, %v5216_v29  ;;  %v1392_v16 = vrot.slane %v6590_v43, 5  ;;  %v1395_v27 = vrot.slane %v9200_v48, 5  ;;  %v5220_v41 = vcombine.low %v6903_v28, %v6907_v56  ;;  %v6937_v63 = vsel %vm6764_vm7, %v1373_v54, %v1374_v5  ;;  %v9207_v48 = vld [vmem:[#allocation14_spill] sm:$0xff] }
  0x74   : > { %5906 = vmatprep.mubr.msk.bf16.mxu0 %vm756_vm3, %v5217_v49  ;;  %v5206_v1 = vrot.slane %v6913_v44, 9  ;;  %v5208_v4 = vrot.slane %v1274_v40, 9  ;;  %v1399_v15 = vrot.slane %v9201_v10, 5  ;;  %v1380_v5 = vrot.slane %v1378_v51, 4  ;;  %v5310_v57 = vld [vmem:[%s6434_s13 + $0xc] sm:$0xf] }
  0x75   : > { %v6946_v25 = vsel %vm6764_vm7, %v5207_v59, %v1392_v16  ;;  %v1394_v45 = vrot.slane %v1392_v16, 4  ;;  %v1402_v29 = vrot.slane %v9203_v19, 5  ;;  %v5209_v49 = vrot.slane %v1275_v42, 9  ;;  %v9206_v59 = vld [vmem:[#allocation12_spill] sm:$0xff]  ;;  %v9208_v42 = vld [vmem:[#allocation13_spill] sm:$0xff] }
  0x76   : > { %5869 = vmatmul.mubr.msk.bf16.gmra.mxu1 %vm756_vm3, %v5167_v33  ;;  %v1385_v33 = vrot.slane %v6544_v46, 5  ;;  %v6960_v39 = vsel %vm6764_vm7, %v5208_v4, %v1399_v15  ;;  %v1401_v44 = vrot.slane %v1399_v15, 4  ;;  %v1406_v40 = vrot.slane %v9204_v38, 5  ;;  %v9209_v15 = vld [vmem:[#allocation15_spill] sm:$0xff] }
  0x77   : > { %5872 = vmatprep.mubr.msk.bf16.mxu1 %vm756_vm3, %v5168_v30  ;;  %v6956_v54 = vsel %vm6764_vm7, %v1394_v45, %v1395_v27  ;;  %v1409_v16 = vrot.slane %v9206_v59, 5  ;;  %v5210_v45 = vrot.slane %v1276_v18, 9  ;;  %v1413_v4 = vrot.slane %v9207_v48, 5 }
  0x78   : > { %v6970_v27 = vsel %vm6764_vm7, %v1401_v44, %v1402_v29  ;;  %v1416_v50 = vrot.slane %v9209_v15, 5  ;;  %v6980_v19 = vsel %vm6764_vm7, %v5209_v49, %v1406_v40  ;;  %v1408_v7 = vrot.slane %v1406_v40, 4  ;;  %v9210_v29 = vld [vmem:[#allocation16_spill] sm:$0xff]  ;;  %v9211_v15 = vld [vmem:[#allocation5_spill] sm:$0xff]  ;;  %v6995_v49 = vld [vmem:[%s6434_s13 + $0x10] sm:$0xf] }
  0x79   : > { %v6987_v18 = vsel %vm6764_vm7, %v5205_v32, %v1378_v51  ;;  %v6992_v59 = vsel %vm6764_vm7, %v5210_v45, %v1413_v4  ;;  %v1415_v30 = vrot.slane %v1413_v4, 4  ;;  %v5313_v40 = vld [vmem:[%s6434_s13 + $0x18] sm:$0xf]  ;;  %v1387_v20 = vrot.slane %v1385_v33, 4 }
  0x7a   : > { %v2130_v44 = vshrl.u32 %v5310_v57, 16  ;;  %v2133_v32 = vshll.u32 %v5310_v57, 16  ;;  %v5221_v51 = vcombine.low %v6919_v47, %v6937_v63  ;;  %v7010_v45 = vsel %vm6764_vm7, %v1380_v5, %v1381_v6  ;;  %v1277_v57 = vld [vmem:[%s6434_s13 + $0xb4] sm:$0xe]  ;;  %v7031_v47 = vld [vmem:[%s6434_s13 + $0x14] sm:$0x1] }
  0x7b   : > { %5907 = vmatmul.mubr.msk.bf16.gmra.mxu0 %vm756_vm3, %v5218_v60  ;;  %v1388_v60 = vrot.slane %v9211_v15, 5  ;;  %v7025_v11 = vsel %vm6764_vm7, %v5206_v1, %v1385_v33  ;;  %v2139_v6 = vshll.u32 %v6995_v49, 16  ;;  %v5314_v63 = vld [vmem:[%s6434_s13 + $0x1c] sm:$0xf]  ;;  %v2143_v17 = vshrl.u32 %v6995_v49, 16 }
  0x7c   : > { %5910 = vmatprep.mubr.msk.bf16.mxu0 %vm756_vm3, %v5219_v9  ;;  %v7000_v9 = vsel %vm6764_vm7, %v1408_v7, %v1409_v16  ;;  %v7016_v7 = vsel %vm6764_vm7, %v1415_v30, %v1416_v50  ;;  %v2132_v5 = vrot.slane %v2130_v44, 4  ;;  %v2135_v34 = vrot.slane %v2133_v32, 5  ;;  %v5316_v15 = vld [vmem:[%s6434_s13 + $0x24] sm:$0xf]  ;;  %v7044_v44 = vld [vmem:[%s6434_s13 + $0x28] sm:$0xf] }
  0x7d   : > { %v2154_v50 = vshrl.u32 %v5313_v40, 16  ;;  %v1389_v1 = vsel %vm6764_vm7, %v1387_v20, %v1388_v60  ;;  %v5211_v33 = vrot.slane %v1277_v57, 9  ;;  %v7039_v30 = vrot.slane %v2139_v6, 5 }
  0x7e   : > { %5873 = vmatmul.mubr.msk.bf16.gmra.mxu1 %vm756_vm3, %v5169_v52  ;;  %v1420_v52 = vrot.slane %v6743_v37, 5  ;;  %v2157_v16 = vshll.u32 %v5313_v40, 16  ;;  %v1423_v23 = vrot.slane %v6748_v61, 5  ;;  %v2145_v4 = vrot.slane %v2143_v17, 4 }
  0x7f   : > { %5876 = vmatprep.mubr.msk.bf16.mxu1 %vm756_vm3, %v5170_v8  ;;  %v5315_v8 = vld [vmem:[%s6434_s13 + $0x20] sm:$0x1]  ;;  %v2156_v3 = vrot.slane %v2154_v50, 4  ;;  %v2163_v13 = vshll.u32 %v5314_v63, 16  ;;  %v2149_v20 = vshll.u32 %v7031_v47, 16  ;;  %v2167_v57 = vshrl.u32 %v5314_v63, 16 }
  0x80   : > { %v1422_v32 = vrot.slane %v1420_v52, 4  ;;  %v2159_v60 = vrot.slane %v2157_v16, 5  ;;  %v5222_v61 = vcombine.low %v6987_v18, %v7010_v45  ;;  %v5223_v40 = vcombine.low %v7025_v11, %v1389_v1 }
  0x81   : > { %v2136_v6 = vor.u32 %v2135_v34, %v2132_v5  ;;  %v7055_v17 = vrot.slane %v2163_v13, 5  ;;  %v2146_v28 = vor.u32 %v2145_v4, %v7039_v30  ;;  %v2173_v50 = vshll.u32 %v5315_v8, 16  ;;  %v7082_v5 = vld [vmem:[%s6434_s13 + $0x34] sm:$0xf] }
  0x82   : > { %v2160_v56 = vor.u32 %v2159_v60, %v2156_v3  ;;  %v7067_v18 = vsel %vm6764_vm7, %v5211_v33, %v1420_v52  ;;  %v2178_v13 = vshrl.u32 %v5316_v15, 16  ;;  %v2181_v45 = vshll.u32 %v5316_v15, 16  ;;  %v5319_v52 = vld [vmem:[%s6434_s13 + $0x30] sm:$0xf] }
  0x83   : > { %5911 = vmatmul.mubr.msk.bf16.gmra.mxu0 %vm756_vm3, %v5220_v41  ;;  %v2169_v41 = vrot.slane %v2167_v57, 4  ;;  %v2187_v11 = vshll.u32 %v7044_v44, 16  ;;  %v9213_v3 = vcombine.low %v6453_v12, %v6457_v14  ;;  %v7076_v4 = vsel %vm6764_vm7, %v1422_v32, %v1423_v23 }
  0x84   : > { %5914 = vmatprep.mubr.msk.bf16.mxu0 %vm756_vm3, %v5221_v51  ;;  %v9212_v51 = vcombine.low %v6719_v62, %v6726_v55  ;;  %v2151_v62 = vrot.slane %v2149_v20, 5  ;;  %v2191_v63 = vshrl.u32 %v7044_v44, 16  ;;  %v2137_v34 = vrot.slane %v2136_v6, 4 }
  0x85   : > { %v2170_v55 = vor.u32 %v2169_v41, %v7055_v17  ;;  %v2180_v8 = vrot.slane %v2178_v13, 4  ;;  %v2183_v1 = vrot.slane %v2181_v45, 5  ;;  %v7084_v33 = vrot.slane %v2187_v11, 5  ;;  %v7090_v41 = vld [vmem:[%s6434_s13 + $0x38] sm:$0x1] }
  0x86   : > { %5877 = vmatmul.mubr.msk.bf16.gmra.mxu1 %vm756_vm3, %v9212_v51  ;;  %v2147_v12 = vrot.slane %v2146_v28, 4  ;;  %v2161_v14 = vrot.slane %v2160_v56, 4  ;;  %v2175_v16 = vrot.slane %v2173_v50, 5  ;;  %v2193_v23 = vrot.slane %v2191_v63, 4  ;;  %v5322_v13 = vld [vmem:[%s6434_s13 + $0x3c] sm:$0xf] }
  0x87   : > { %5880 = vmatprep.mubr.msk.bf16.mxu1 %vm756_vm3, %v9213_v3  ;;  %v2171_v15 = vrot.slane %v2170_v55, 4  ;;  %v2197_v32 = vshll.u32 %v7059_v21, 16  ;;  %v2202_v20 = vshrl.u32 %v5319_v52, 16  ;;  %v2205_v60 = vshll.u32 %v5319_v52, 16 }
  0x88   : > { %v2184_v57 = vor.u32 %v2183_v1, %v2180_v8  ;;  %v2194_v6 = vor.u32 %v2193_v23, %v7084_v33  ;;  %v2211_v28 = vshll.u32 %v7082_v5, 16  ;;  %v2215_v56 = vshrl.u32 %v7082_v5, 16  ;;  %v5325_v8 = vld [vmem:[%s6434_s13 + $0x48] sm:$0xf]  ;;  %v7117_v1 = vld [vmem:[%s6434_s13 + $0x4c] sm:$0xf] }
  0x89   : > { %v2204_v50 = vrot.slane %v2202_v20, 4  ;;  %v2207_v51 = vrot.slane %v2205_v60, 5  ;;  %v9214_v3 = vcombine.low %v6495_v53, %v6499_v58  ;;  %v5228_v55 = vcombine.low %v7067_v18, %v7076_v4 }
  0x8a   : > { %v7096_v45 = vrot.slane %v2211_v28, 5  ;;  %v2217_v11 = vrot.slane %v2215_v56, 4  ;;  %v2152_v63 = vsel %vm6478_vm4, %v2147_v12, %v2151_v62  ;;  %v2166_v52 = vsel %vm6478_vm4, %v2161_v14, %v7055_v17 }
  0x8b   : > { %5915 = vmatmul.mubr.msk.bf16.gmra.mxu0 %vm756_vm3, %v5222_v61  ;;  %v7099_v61 = vld [vmem:[%s6434_s13 + $0x40] sm:$0xf]  ;;  %v9215_v53 = vcombine.low %v6533_v35, %v6544_v46  ;;  %v2176_v58 = vsel %vm6478_vm4, %v2171_v15, %v2175_v16  ;;  %v2185_v23 = vrot.slane %v2184_v57, 4  ;;  %v2208_v20 = vor.u32 %v2207_v51, %v2204_v50  ;;  %v7151_v50 = vld [vmem:[%s6434_s13 + $0x44] sm:$0x1] }
  0x8c   : > { %5918 = vmatprep.mubr.msk.bf16.mxu0 %vm756_vm3, %v5223_v40  ;;  %v2142_v40 = vsel %vm6478_vm4, %v2137_v34, %v7039_v30  ;;  %v2195_v30 = vrot.slane %v2194_v6, 4  ;;  %v2199_v34 = vrot.slane %v2197_v32, 5  ;;  %v2221_v62 = vshll.u32 %v7090_v41, 16  ;;  %v5328_v51 = vld [vmem:[%s6434_s13 + $0x54] sm:$0xf] }
  0x8d   : > { %v2226_v12 = vshrl.u32 %v5322_v13, 16  ;;  %v2229_v17 = vshll.u32 %v5322_v13, 16  ;;  %v7128_v14 = vsel %vm805_vm0, %v6859_v22, 0  ;;  %v2218_v35 = vor.u32 %v2217_v11, %v7096_v45 }
  0x8e   : > { %5881 = vmatmul.mubr.msk.bf16.gmra.mxu1 %vm756_vm3, %v9214_v3  ;;  %v2235_v46 = vshll.u32 %v7099_v61, 16  ;;  %v2239_v16 = vshrl.u32 %v7099_v61, 16  ;;  %v7133_v15 = vcombine.low %v2142_v40, %v2152_v63  ;;  %v7137_v32 = vsel %vm805_vm0, %v6831_v24, 0  ;;  %v7160_v40 = vld [vmem:[%s6434_s13 + $0x58] sm:$0xf] }
  0x8f   : > { %5884 = vmatprep.mubr.msk.bf16.mxu1 %vm756_vm3, %v9215_v53  ;;  %v2250_v60 = vshrl.u32 %v5325_v8, 16  ;;  %v2253_v57 = vshll.u32 %v5325_v8, 16  ;;  %v9216_v6 = vcombine.low %v6946_v25, %v6956_v54  ;;  %v7143_v22 = vcombine.low %v2166_v52, %v2176_v58  ;;  %v7165_v8 = vld [vmem:[%s6434_s13 + $0x50] sm:$0x1] }
  0x90   : > { %v2190_v28 = vsel %vm6478_vm4, %v2185_v23, %v7084_v33  ;;  %v2200_v56 = vsel %vm6478_vm4, %v2195_v30, %v2199_v34  ;;  %v2259_v24 = vshll.u32 %v7117_v1, 16  ;;  %v9217_v25 = vcombine.low %v6960_v39, %v6970_v27  ;;  %v5331_v34 = vld [vmem:[%s6434_s13 + $0x60] sm:$0xf] }
  0x91   : > { %v2209_v54 = vrot.slane %v2208_v20, 4  ;;  %v2223_v13 = vrot.slane %v2221_v62, 5  ;;  %v2228_v11 = vrot.slane %v2226_v12, 4  ;;  %v2231_v3 = vrot.slane %v2229_v17, 5 }
  0x92   : > { %v2219_v33 = vrot.slane %v2218_v35, 4  ;;  %v7162_v63 = vrot.slane %v2235_v46, 5  ;;  %v2241_v52 = vrot.slane %v2239_v16, 4  ;;  %v2263_v53 = vshrl.u32 %v7117_v1, 16  ;;  %v7182_v35 = vld [vmem:[%s6434_s13 + $0x5c] sm:$0x1] }
  0x93   : > { %5919 = vmatmul.mubr.msk.bf16.gmra.mxu0 %vm756_vm3, %v9216_v6  ;;  %v9218_v39 = vcombine.low %v6583_v36, %v6590_v43  ;;  %v2252_v27 = vrot.slane %v2250_v60, 4  ;;  %v2255_v58 = vrot.slane %v2253_v57, 5  ;;  %v2274_v23 = vshrl.u32 %v5328_v51, 16 }
  0x94   : > { %5922 = vmatprep.mubr.msk.bf16.mxu0 %vm756_vm3, %v9217_v25  ;;  %v2277_v30 = vshll.u32 %v5328_v51, 16  ;;  %v9219_v20 = vcombine.low %v9202_v2, %v9201_v10  ;;  %v7177_v62 = vcombine.low %v2190_v28, %v2200_v56  ;;  %v7179_v12 = vrot.slane %v2259_v24, 5  ;;  %v7195_v28 = vld [vmem:[%s6434_s13 + $0x64] sm:$0xf] }
  0x95   : > { %v2265_v17 = vrot.slane %v2263_v53, 4  ;;  %v2283_v36 = vshll.u32 %v7160_v40, 16  ;;  %v2245_v43 = vshll.u32 %v7151_v50, 16  ;;  %v2276_v46 = vrot.slane %v2274_v23, 4 }
  0x96   : > { %5885 = vmatmul.mubr.msk.bf16.gmra.mxu1 %vm756_vm3, %v9218_v39  ;;  %v2279_v16 = vrot.slane %v2277_v30, 5  ;;  %v2287_v60 = vshrl.u32 %v7160_v40, 16  ;;  %v2214_v10 = vsel %vm6478_vm4, %v2209_v54, %v7096_v45  ;;  %v2224_v2 = vsel %vm6478_vm4, %v2219_v33, %v2223_v13  ;;  %v7217_v30 = vld [vmem:[%s6434_s13 + $0x68] sm:$0x1] }
  0x97   : > { %5888 = vmatprep.mubr.msk.bf16.mxu1 %vm756_vm3, %v9219_v20  ;;  %v2232_v57 = vor.u32 %v2231_v3, %v2228_v11  ;;  %v7192_v6 = vrot.slane %v2283_v36, 5  ;;  %v2242_v56 = vor.u32 %v2241_v52, %v7162_v63  ;;  %v2256_v24 = vor.u32 %v2255_v58, %v2252_v27  ;;  %v5334_v3 = vld [vmem:[%s6434_s13 + $0x6c] sm:$0xf]  ;;  %v7214_v27 = vld [vmem:[%s6434_s13 + $0x70] sm:$0xf] }
  0x98   : > { %v2269_v51 = vshll.u32 %v7165_v8, 16  ;;  %v2289_v25 = vrot.slane %v2287_v60, 4  ;;  %v9220_v53 = vcombine.low %v6980_v19, %v7000_v9  ;;  %v2266_v45 = vor.u32 %v2265_v17, %v7179_v12 }
  0x99   : > { %v2280_v54 = vor.u32 %v2279_v16, %v2276_v46  ;;  %v2298_v13 = vshrl.u32 %v5331_v34, 16  ;;  %v2301_v11 = vshll.u32 %v5331_v34, 16  ;;  %v9221_v33 = vcombine.low %v6992_v59, %v7016_v7  ;;  %v5337_v16 = vld [vmem:[%s6434_s13 + $0x78] sm:$0xf] }
  0x9a   : > { %v2290_v52 = vor.u32 %v2289_v25, %v7192_v6  ;;  %v2293_v39 = vshll.u32 %v7182_v35, 16  ;;  %v2307_v19 = vshll.u32 %v7195_v28, 16  ;;  %v2311_v9 = vshrl.u32 %v7195_v28, 16 }
  0x9b   : > { %5923 = vmatmul.mubr.msk.bf16.gmra.mxu0 %vm756_vm3, %v9220_v53  ;;  %v2233_v58 = vrot.slane %v2232_v57, 4  ;;  %v2247_v23 = vrot.slane %v2245_v43, 5  ;;  %v2300_v34 = vrot.slane %v2298_v13, 4  ;;  %v2303_v20 = vrot.slane %v2301_v11, 5 }
  0x9c   : > { %5926 = vmatprep.mubr.msk.bf16.mxu0 %vm756_vm3, %v9221_v33  ;;  %v9222_v59 = vcombine.low %v9205_v26, %v9204_v38  ;;  %v7223_v7 = vcombine.low %v2214_v10, %v2224_v2  ;;  %v2243_v17 = vrot.slane %v2242_v56, 4  ;;  %v2257_v36 = vrot.slane %v2256_v24, 4  ;;  %v7233_v2 = vld [vmem:[%s6434_s13 + $0x7c] sm:$0xf] }
  0x9d   : > { %v7225_v46 = vrot.slane %v2307_v19, 5  ;;  %v9223_v43 = vcombine.low %v9208_v42, %v9207_v48  ;;  %v2267_v60 = vrot.slane %v2266_v45, 4  ;;  %v2271_v57 = vrot.slane %v2269_v51, 5  ;;  %9224 = vst [vmem:[#allocation6_spill] sm:$0xff] %v7233_v2  ;;  %v5340_v19 = vld [vmem:[%s6434_s13 + $0x84] sm:$0xf] }
  0x9e   : > { %5889 = vmatmul.mubr.msk.bf16.gmra.mxu1 %vm756_vm3, %v9222_v59  ;;  %v2281_v25 = vrot.slane %v2280_v54, 4  ;;  %v2313_v38 = vrot.slane %v2311_v9, 4  ;;  %v2291_v26 = vrot.slane %v2290_v52, 4  ;;  %v2295_v53 = vrot.slane %v2293_v39, 5 }
  0x9f   : > { %5892 = vmatprep.mubr.msk.bf16.mxu1 %vm756_vm3, %v9223_v43  ;;  %v2304_v13 = vor.u32 %v2303_v20, %v2300_v34  ;;  %v2322_v10 = vshrl.u32 %v5334_v3, 16  ;;  %v2238_v56 = vsel %vm6478_vm4, %v2233_v58, %v7162_v63  ;;  %v2325_v24 = vshll.u32 %v5334_v3, 16  ;;  %v6220_v63 = vld [vmem:[%s6434_s13 + $0xc] sm:$0xff]   ;;  %v7267_v34 = vld [vmem:[%s6434_s13 + $0x88] sm:$0xf] }
  0xa0   : > { %v2331_v48 = vshll.u32 %v7214_v27, 16  ;;  %v2335_v42 = vshrl.u32 %v7214_v27, 16  ;;  %v2248_v51 = vsel %vm6478_vm4, %v2243_v17, %v2247_v23  ;;  %v2262_v45 = vsel %vm6478_vm4, %v2257_v36, %v7179_v12  ;;  %9225 = vst [vmem:[#allocation8_spill] sm:$0xff] %v7267_v34  ;;  %v7276_v36 = vld [vmem:[%s6434_s13 + $0x74] sm:$0x1] }
  0xa1   : > { %v2314_v54 = vor.u32 %v2313_v38, %v7225_v46  ;;  %v2317_v11 = vshll.u32 %v7217_v30, 16  ;;  %v2272_v3 = vsel %vm6478_vm4, %v2267_v60, %v2271_v57  ;;  %v2286_v33 = vsel %vm6478_vm4, %v2281_v25, %v7192_v6  ;;  %9227 = vst [vmem:[#allocation7_spill] sm:$0xff] %v7276_v36  ;;  %v7286_v38 = vld [vmem:[%s6434_s13 + $0x80] sm:$0x1] }
  0xa2   : > { %v2346_v52 = vshrl.u32 %v5337_v16, 16  ;;  %v2349_v12 = vshll.u32 %v5337_v16, 16  ;;  %v2296_v18 = vsel %vm6478_vm4, %v2291_v26, %v2295_v53  ;;  %v2305_v4 = vrot.slane %v2304_v13, 4  ;;  %9228 = vst [vmem:[#allocation9_spill] sm:$0xff] %v7286_v38  ;;  %v7289_v26 = vld [vmem:[%s6434_s13 + $0x8c] sm:$0x1] }
  0xa3   : > { %5927 = vmatmul.mubr.msk.bf16.gmra.mxu0 %vm756_vm3, %v5228_v55  ;;  %v2324_v55 = vrot.slane %v2322_v10, 4  ;;  %v2355_v39 = vshll.u32 %v7233_v2, 16  ;;  %v2327_v9 = vrot.slane %v2325_v24, 5  ;;  %v7263_v58 = vrot.slane %v2331_v48, 5  ;;  %9229 = vst [vmem:[#allocation11_spill] sm:$0xff] %v7289_v26  ;;  %v6221_v10 = vld [vmem:[%s6434_s13 + $0x18] sm:$0xff]  }
  0xa4   : > { %5966 = vmatprep.mubr.msk.bf16.mxu0 %vm756_vm3, %v7133_v15  ;;  %v2337_v23 = vrot.slane %v2335_v42, 4  ;;  %v2359_v6 = vshrl.u32 %v7233_v2, 16  ;;  %v9226_v15 = vcombine.low %v9210_v29, %v6743_v37  ;;  %v7273_v20 = vcombine.low %v2238_v56, %v2248_v51  ;;  %v5343_v51 = vld [vmem:[%s6434_s13 + $0x90] sm:$0xf] }
  0xa5   : > { %v2315_v59 = vrot.slane %v2314_v54, 4  ;;  %v2319_v17 = vrot.slane %v2317_v11, 5  ;;  %v2348_v16 = vrot.slane %v2346_v52, 4  ;;  %v2351_v43 = vrot.slane %v2349_v12, 5 }
  0xa6   : > { %5893 = vmatmul.mubr.msk.bf16.gmra.mxu1 %vm756_vm3, %v9226_v15  ;;  %v7279_v60 = vrot.slane %v2355_v39, 5  ;;  %v2361_v57 = vrot.slane %v2359_v6, 4  ;;  %v2370_v25 = vshrl.u32 %v5340_v19, 16  ;;  %v7281_v37 = vcombine.low %v2262_v45, %v2272_v3  ;;  %v7300_v45 = vld [vmem:[%s6434_s13 + $0x94] sm:$0xf] }
  0xa7   : > { %5932 = vmatprep.mubr.msk.bf16.mxu1 %vm756_vm3, %v6220_v63  ;;  %v7283_v29 = vcombine.low %v2286_v33, %v2296_v18  ;;  %v2373_v53 = vshll.u32 %v5340_v19, 16  ;;  %v2379_v13 = vshll.u32 %v7267_v34, 16  ;;  %v2310_v56 = vsel %vm6478_vm4, %v2305_v4, %v7225_v46  ;;  %9230 = vst [vmem:[#allocation10_spill] sm:$0xff] %v7300_v45  ;;  %v7308_v33 = vld [vmem:[%s9141_s1 + $0x10] sm:$0x3]  ;;  %v6222_v46 = vld [vmem:[%s6434_s13 + $0x24] sm:$0xff]  }
  0xa8   : > { %v2328_v24 = vor.u32 %v2327_v9, %v2324_v55  ;;  %v2338_v48 = vor.u32 %v2337_v23, %v7263_v58  ;;  %v2341_v42 = vshll.u32 %v7276_v36, 16  ;;  %v2372_v54 = vrot.slane %v2370_v25, 4  ;;  %9231 = vst [vmem:[#allocation12_spill] sm:$0xff] %v7308_v33 }
  0xa9   : > { %v2375_v11 = vrot.slane %v2373_v53, 5  ;;  %v7302_v63 = vrot.slane %v2379_v13, 5  ;;  %v2383_v3 = vshrl.u32 %v7267_v34, 16  ;;  %v2320_v52 = vsel %vm6478_vm4, %v2315_v59, %v2319_v17 }
  0xaa   : > { %v2352_v12 = vor.u32 %v2351_v43, %v2348_v16  ;;  %v2362_v18 = vor.u32 %v2361_v57, %v7279_v60  ;;  %v2365_v4 = vshll.u32 %v7286_v38, 16  ;;  %v2394_v19 = vshrl.u32 %v5343_v51, 16  ;;  %v7342_v57 = vld [vmem:[%s6434_s13 + $0xa0] sm:$0xf] }
  0xab   : > { %5967 = vmatmul.mubr.msk.bf16.vlgmr.msra.gmra.mxu0 %vm756_vm3, %v7143_v22  ;;  %v2376_v55 = vor.u32 %v2375_v11, %v2372_v54  ;;  %v2385_v39 = vrot.slane %v2383_v3, 4  ;;  %v2397_v9 = vshll.u32 %v5343_v51, 16  ;;  %v5346_v22 = vld [vmem:[%s6434_s13 + $0x9c] sm:$0xf]  ;;  %v7321_v23 = vrot.slane %v2328_v24, 4  ;;  %9233 = vst [vmem:[#allocation13_spill] sm:$0xff] %v7342_v57 }
  0xac   : > { %6033 = vmatpush3.bf16.msra.mxu0 %v7137_v32  ;;  %5970 = vmatprep.mubr.msk.bf16.mxu0 %vm756_vm3, %v7177_v62  ;;  %v7323_v6 = vrot.slane %v2341_v42, 5  ;;  %v2389_v15 = vshll.u32 %v7289_v26, 16  ;;  %v2403_v59 = vshll.u32 %v7300_v45, 16  ;;  %v7330_v32 = vld [vmem:[%s9141_s1 + $0xe] sm:$0x3]  ;;  %v7335_v62 = vcombine.low %v2310_v56, %v2320_v52 }
  0xad   : > { %9232 = vst [vmem:[#allocation14_spill] sm:$0xff] %v7330_v32  ;;  %6145 = vmatprep.subr.msk.bf16.mxu0 %vm805_vm0, %v7308_v33  ;;  %v7337_v17 = vrot.slane %v2338_v48, 4  ;;  %v2386_v16 = vor.u32 %v2385_v39, %v7302_v63  ;;  %v2407_v43 = vshrl.u32 %v7300_v45, 16  ;;  %v7346_v25 = vrot.slane %v2352_v12, 4  ;;  %v7355_v56 = vld [vmem:[%s6434_s13 + $0x98] sm:$0x1] }
  0xae   : > { %5933 = vmatmul.mubr.msk.bf16.vlgmr.msra.gmra.mxu1 %vm756_vm3, %v6221_v10  ;;  %v7348_v53 = vrot.slane %v2362_v18, 4  ;;  %v7350_v13 = vrot.slane %v2365_v4, 5  ;;  %v7352_v10 = vrot.slane %v2376_v55, 4  ;;  %9234 = vst [vmem:[#allocation15_spill] sm:$0xff] %v7355_v56  ;;  %v2396_v24 = vrot.slane %v2394_v19, 4  ;;  %v6224_v19 = vld [vmem:[%s6434_s13 + $0x3c] sm:$0xff]  }
  0xaf   : > { %5999 = vmatpush3.bf16.msra.mxu1 %v7128_v14  ;;  %5936 = vmatprep.mubr.msk.bf16.mxu1 %vm756_vm3, %v6222_v46  ;;  %v2399_v48 = vrot.slane %v2397_v9, 5  ;;  %v2418_v42 = vshrl.u32 %v5346_v22, 16  ;;  %v2421_v51 = vshll.u32 %v5346_v22, 16  ;;  %v6223_v14 = vld [vmem:[%s6434_s13 + $0x30] sm:$0xff]   ;;  %v7364_v11 = vrot.slane %v2389_v15, 5 }
  0xb0   : > { %6144 = vmatprep.subr.msk.bf16.mxu1 %vm805_vm0, %v7330_v32  ;;  %v7366_v3 = vrot.slane %v2403_v59, 5  ;;  %v2427_v46 = vshll.u32 %v7342_v57, 16  ;;  %v5349_v52 = vld [vmem:[%s6434_s13 + $0xa8] sm:$0xf]  ;;  %v7370_v12 = vrot.slane %v2386_v16, 4  ;;  %v2409_v18 = vrot.slane %v2407_v43, 4 }
  0xb1   : > { %v2413_v4 = vshll.u32 %v7355_v56, 16  ;;  %v2431_v55 = vshrl.u32 %v7342_v57, 16  ;;  %v7375_v39 = vld [vmem:[%s6434_s13 + $0xac] sm:$0xf]  ;;  %v2400_v59 = vor.u32 %v2399_v48, %v2396_v24  ;;  %v7399_v16 = vld [vmem:[%s6434_s13 + $0xa4] sm:$0x1] }
  0xb2   : > { %9235 = vst [vmem:[#allocation16_spill] sm:$0xff] %v7375_v39  ;;  %9236 = vst [vmem:[#allocation5_spill] sm:$0xff] %v7399_v16  ;;  %v2420_v43 = vrot.slane %v2418_v42, 4  ;;  %v2423_v22 = vrot.slane %v2421_v51, 5  ;;  %v2442_v54 = vshrl.u32 %v5349_v52, 16  ;;  %v7401_v9 = vrot.slane %v2427_v46, 5 }
  0xb3   : > { %5971 = vmatmul.mubr.msk.bf16.gmra.mxu0 %vm756_vm3, %v7223_v7  ;;  %v2433_v32 = vrot.slane %v2431_v55, 4  ;;  %v2445_v15 = vshll.u32 %v5349_v52, 16  ;;  %v2451_v33 = vshll.u32 %v7375_v39, 16  ;;  %v5352_v57 = vld [vmem:[%s6434_s13 + $0xb4] sm:$0xf]  ;;  %v2410_v24 = vor.u32 %v2409_v18, %v7366_v3 }
  0xb4   : > { %5974 = vmatprep.mubr.msk.bf16.mxu0 %vm756_vm3, %v7273_v20  ;;  %v2392_v20 = vsel %vm6478_vm4, %v7370_v12, %v7364_v11  ;;  %v7411_v48 = vrot.slane %v2413_v4, 5  ;;  %v7414_v42 = vld [vmem:[%s6434_s13 + $0xb0] sm:$0x1]  ;;  %v2444_v51 = vrot.slane %v2442_v54, 4  ;;  %v7417_v46 = vld [vmem:[%s6434_s13 + $0xb8] sm:$0xf]  ;;  %v2424_v18 = vor.u32 %v2423_v22, %v2420_v43 }
  0xb5   : > { %9237 = vst [vmem:[#allocation17_spill] sm:$0xff] %v7414_v42  ;;  %9238 = vst [vmem:[#allocation18_spill] sm:$0xff] %v7417_v46  ;;  %v2447_v52 = vrot.slane %v2445_v15, 5  ;;  %v7421_v55 = vrot.slane %v2451_v33, 5  ;;  %v2455_v11 = vshrl.u32 %v7375_v39, 16  ;;  %v7424_v12 = vrot.slane %v2400_v59, 4 }
  0xb6   : > { %5937 = vmatmul.mubr.msk.bf16.gmra.mxu1 %vm756_vm3, %v6223_v14  ;;  %v2437_v14 = vshll.u32 %v7399_v16, 16  ;;  %v7427_v4 = vld [vmem:[%s6434_s13 + $0xbc] sm:$0x1]  ;;  %v2466_v54 = vshrl.u32 %v5352_v57, 16  ;;  %v2469_v7 = vshll.u32 %v5352_v57, 16  ;;  %v2434_v56 = vor.u32 %v2433_v32, %v7401_v9  ;;  %v6225_v16 = vld [vmem:[%s6434_s13 + $0x48] sm:$0xff]  }
  0xb7   : > { %5940 = vmatprep.mubr.msk.bf16.mxu1 %vm756_vm3, %v6224_v19  ;;  %v2457_v45 = vrot.slane %v2455_v11, 4  ;;  %v2461_v19 = vshll.u32 %v7414_v42, 16  ;;  %v2475_v15 = vshll.u32 %v7417_v46, 16  ;;  %v5355_v33 = vld [vmem:[%s6434_s13 + $0xc0] sm:$0xf]  ;;  %v2448_v26 = vor.u32 %v2447_v52, %v2444_v51  ;;  %v6226_v57 = vld [vmem:[%s6434_s13 + $0x54] sm:$0xff]  }
  0xb8   : > { %v2468_v39 = vrot.slane %v2466_v54, 4  ;;  %v2471_v34 = vrot.slane %v2469_v7, 5  ;;  %v2479_v59 = vshrl.u32 %v7417_v46, 16  ;;  %v7436_v22 = vld [vmem:[%s6434_s13 + $0xc4] sm:$0xf]  ;;  %v2411_v43 = vrot.slane %v2410_v24, 4 }
  0xb9   : > { %v2439_v32 = vrot.slane %v2437_v14, 5  ;;  %v2458_v11 = vor.u32 %v2457_v45, %v7421_v55  ;;  %v2477_v42 = vrot.slane %v2475_v15, 5  ;;  %v2485_v7 = vshll.u32 %v7427_v4, 16  ;;  %v7448_v45 = vld [vmem:[%s6434_s13 + $0xc8] sm:$0x1] }
  0xba   : > { %v2472_v51 = vor.u32 %v2471_v34, %v2468_v39  ;;  %v2481_v52 = vrot.slane %v2479_v59, 4  ;;  %v2490_v54 = vshrl.u32 %v5355_v33, 16  ;;  %v2425_v46 = vrot.slane %v2424_v18, 4 }
  0xbb   : > { %5975 = vmatmul.mubr.msk.bf16.gmra.mxu0 %vm756_vm3, %v7281_v37  ;;  %v2435_v38 = vrot.slane %v2434_v56, 4  ;;  %v2493_v2 = vshll.u32 %v5355_v33, 16  ;;  %v2499_v37 = vshll.u32 %v7436_v22, 16  ;;  %v2449_v24 = vrot.slane %v2448_v26, 4 }
  0xbc   : > { %5978 = vmatprep.mubr.msk.bf16.mxu0 %vm756_vm3, %v7283_v29  ;;  %v2463_v14 = vrot.slane %v2461_v19, 5  ;;  %v2482_v36 = vor.u32 %v2481_v52, %v2477_v42  ;;  %v2492_v15 = vrot.slane %v2490_v54, 4  ;;  %v2459_v34 = vrot.slane %v2458_v11, 4 }
  0xbd   : > { %v2495_v29 = vrot.slane %v2493_v2, 5  ;;  %v7451_v39 = vrot.slane %v2499_v37, 5  ;;  %v2503_v56 = vshrl.u32 %v7436_v22, 16  ;;  %v9239_v26 = vsel %vm6478_vm4, %v7337_v17, %v7323_v6 }
  0xbe   : > { %5941 = vmatmul.mubr.msk.bf16.gmra.mxu1 %vm756_vm3, %v6225_v16  ;;  %v9240_v16 = vsel %vm6478_vm4, %v7321_v23, %v7263_v58  ;;  %v2473_v19 = vrot.slane %v2472_v51, 4  ;;  %v2483_v33 = vrot.slane %v2482_v36, 4  ;;  %v2487_v2 = vrot.slane %v2485_v7, 5  ;;  %v6227_v23 = vld [vmem:[%s6434_s13 + $0x60] sm:$0xff]  }
  0xbf   : > { %5944 = vmatprep.mubr.msk.bf16.mxu1 %vm756_vm3, %v6226_v57  ;;  %v5367_v18 = vcombine.low %v9240_v16, %v9239_v26  ;;  %v9241_v59 = vsel %vm6478_vm4, %v7348_v53, %v7350_v13  ;;  %v9242_v6 = vsel %vm6478_vm4, %v7346_v25, %v7279_v60  ;;  %v2496_v57 = vor.u32 %v2495_v29, %v2492_v15  ;;  %v5393_v13 = vld [vmem:[%s6434_s13 + $0x24] sm:$0xe]  ;;  %v5396_v26 = vld [vmem:[%s6434_s13 + $0x48] sm:$0xe] }
  0xc0   : > { %v5368_v17 = vcombine.low %v9242_v6, %v9241_v59  ;;  %v2505_v11 = vrot.slane %v2503_v56, 4  ;;  %v2509_v58 = vshll.u32 %v7448_v45, 16  ;;  %v9243_v36 = vsel %vm6478_vm4, %v7352_v10, %v7302_v63  ;;  %v6228_v63 = vld [vmem:[%s6434_s13 + $0x6c] sm:$0xff]   ;;  %v5397_v6 = vld [vmem:[%s6434_s13 + $0x54] sm:$0xe] }
  0xc1   : > { %v5369_v51 = vcombine.low %v9243_v36, %v2392_v20  ;;  %v2406_v53 = vsel %vm6478_vm4, %v7424_v12, %v7366_v3  ;;  %v2416_v60 = vsel %vm6478_vm4, %v2411_v43, %v7411_v48  ;;  %v2430_v25 = vsel %vm6478_vm4, %v2425_v46, %v7401_v9  ;;  %v7504_v12 = vld [vmem:[%s6434_s13 + $0xc] sm:$0xe] }
  0xc2   : > { %v2440_v10 = vsel %vm6478_vm4, %v2435_v38, %v2439_v32  ;;  %v2454_v3 = vsel %vm6478_vm4, %v2449_v24, %v7421_v55  ;;  %v2464_v20 = vsel %vm6478_vm4, %v2459_v34, %v2463_v14  ;;  %v2506_v48 = vor.u32 %v2505_v11, %v7451_v39  ;;  %v5394_v55 = vld [vmem:[%s6434_s13 + $0x30] sm:$0xe]  ;;  %v5395_v14 = vld [vmem:[%s6434_s13 + $0x3c] sm:$0xe] }
  0xc3   : > { %5979 = vmatmul.mubr.msk.bf16.gmra.mxu0 %vm756_vm3, %v7335_v62  ;;  %v2478_v62 = vsel %vm6478_vm4, %v2473_v19, %v2477_v42  ;;  %v2488_v38 = vsel %vm6478_vm4, %v2483_v33, %v2487_v2  ;;  %v7511_v9 = vrot.slane %v2496_v57, 4  ;;  %v2873_v46 = vrot.slane %v6995_v49, 5  ;;  %v6229_v57 = vld [vmem:[%s6434_s13 + $0x78] sm:$0xff]  }
  0xc4   : > { %5982 = vmatprep.mubr.msk.bf16.mxu0 %vm756_vm3, %v5367_v18  ;;  %v7515_v43 = vcombine.low %v2406_v53, %v2416_v60  ;;  %v7517_v32 = vrot.slane %v2506_v48, 4  ;;  %v7519_v52 = vrot.slane %v2509_v58, 5  ;;  %v5409_v7 = vrot.slane %v5393_v13, 9  ;;  %v6230_v53 = vld [vmem:[%s6434_s13 + $0x84] sm:$0xff]   ;;  %v5398_v13 = vld [vmem:[%s6434_s13 + $0x60] sm:$0xe] }
  0xc5   : > { %v7522_v54 = vcombine.low %v2430_v25, %v2440_v10  ;;  %v7524_v42 = vcombine.low %v2454_v3, %v2464_v20  ;;  %v5407_v37 = vrot.slane %v7504_v12, 9  ;;  %v2887_v24 = vrot.slane %v7044_v44, 5  ;;  %v6236_v49 = vld [vmem:[%s6434_s13 + $0x18] sm:$0xff]  }
  0xc6   : > { %5945 = vmatmul.mubr.msk.bf16.gmra.mxu1 %vm756_vm3, %v6227_v23  ;;  %v7530_v15 = vcombine.low %v2478_v62, %v2488_v38  ;;  %v2876_v34 = vrot.slane %v7031_v47, 5  ;;  %v2890_v29 = vrot.slane %v7059_v21, 5  ;;  %v5410_v56 = vrot.slane %v5394_v55, 9  ;;  %v5400_v55 = vld [vmem:[%s6434_s13 + $0x78] sm:$0xe] }
  0xc7   : > { %5948 = vmatprep.mubr.msk.bf16.mxu1 %vm756_vm3, %v6228_v63  ;;  %v2502_v16 = vsel %vm6478_vm4, %v7511_v9, %v7451_v39  ;;  %v7541_v44 = vrot.slane %v2873_v46, 4  ;;  %v7545_v18 = vsel %vm6764_vm7, %v5409_v7, %v2887_v24  ;;  %v2889_v19 = vrot.slane %v2887_v24, 4 }
  0xc8   : > { %v2512_v21 = vsel %vm6478_vm4, %v7517_v32, %v7519_v52  ;;  %v2894_v33 = vrot.slane %v7082_v5, 5  ;;  %v2897_v2 = vrot.slane %v7090_v41, 5  ;;  %v5411_v59 = vrot.slane %v5395_v14, 9  ;;  %v6235_v52 = vld [vmem:[%s6434_s13 + $0xc0] sm:$0xff]  }
  0xc9   : > { %v7557_v11 = vsel %vm6764_vm7, %v2889_v19, %v2890_v29  ;;  %v2901_v58 = vrot.slane %v7099_v61, 5  ;;  %v2904_v23 = vrot.slane %v7151_v50, 5  ;;  %v5412_v36 = vrot.slane %v5396_v26, 9  ;;  %v5401_v19 = vld [vmem:[%s6434_s13 + $0x84] sm:$0xe] }
  0xca   : > { %v5426_v5 = vcombine.low %v7545_v18, %v7557_v11  ;;  %v7567_v41 = vsel %vm6764_vm7, %v5410_v56, %v2894_v33  ;;  %v2896_v60 = vrot.slane %v2894_v33, 4  ;;  %v2908_v25 = vrot.slane %v7117_v1, 5 }
  0xcb   : > { %5983 = vmatmul.mubr.msk.bf16.gmra.mxu0 %vm756_vm3, %v5368_v17  ;;  %v7574_v61 = vsel %vm6764_vm7, %v5411_v59, %v2901_v58  ;;  %v2903_v50 = vrot.slane %v2901_v58, 4  ;;  %v2911_v17 = vrot.slane %v7165_v8, 5  ;;  %v5413_v63 = vrot.slane %v5397_v6, 9  ;;  %v9244_v59 = vld [vmem:[#allocation7_spill] sm:$0xff] }
  0xcc   : > { %5986 = vmatprep.mubr.msk.bf16.mxu0 %vm756_vm3, %v5369_v51  ;;  %v7579_v10 = vsel %vm6764_vm7, %v2896_v60, %v2897_v2  ;;  %v7583_v3 = vsel %vm6764_vm7, %v5412_v36, %v2908_v25  ;;  %v2910_v1 = vrot.slane %v2908_v25, 4  ;;  %v2915_v20 = vrot.slane %v7160_v40, 5  ;;  %v5399_v51 = vld [vmem:[%s6434_s13 + $0x6c] sm:$0xe]  ;;  %v6231_v58 = vld [vmem:[%s6434_s13 + $0x90] sm:$0xff]  }
  0xcd   : > { %v5427_v48 = vcombine.low %v7567_v41, %v7579_v10  ;;  %v7592_v8 = vsel %vm6764_vm7, %v2903_v50, %v2904_v23  ;;  %v2918_v62 = vrot.slane %v7182_v35, 5  ;;  %v5414_v38 = vrot.slane %v5398_v13, 9  ;;  %v9245_v36 = vld [vmem:[#allocation6_spill] sm:$0xff]  ;;  %v5402_v60 = vld [vmem:[%s6434_s13 + $0x90] sm:$0xe]  ;;  %v9246_v50 = vld [vmem:[#allocation9_spill] sm:$0xff] }
  0xce   : > { %5949 = vmatmul.mubr.msk.bf16.gmra.mxu1 %vm756_vm3, %v6229_v57  ;;  %v5428_v40 = vcombine.low %v7574_v61, %v7592_v8  ;;  %v7601_v7 = vsel %vm6764_vm7, %v2910_v1, %v2911_v17  ;;  %v7605_v24 = vsel %vm6764_vm7, %v5413_v63, %v2915_v20  ;;  %v2917_v14 = vrot.slane %v2915_v20, 4 }
  0xcf   : > { %5952 = vmatprep.mubr.msk.bf16.mxu1 %vm756_vm3, %v6230_v53  ;;  %v5429_v35 = vcombine.low %v7583_v3, %v7601_v7  ;;  %v2922_v29 = vrot.slane %v7195_v28, 5  ;;  %v2925_v56 = vrot.slane %v7217_v30, 5  ;;  %v5415_v26 = vrot.slane %v5399_v51, 9  ;;  %v9247_v51 = vld [vmem:[#allocation8_spill] sm:$0xff]  ;;  %v5533_v3 = vld [vmem:[%s6434_s13 + $0x48] sm:$0xf] }
  0xd0   : > { %v7614_v33 = vsel %vm6764_vm7, %v2917_v14, %v2918_v62  ;;  %v2929_v2 = vrot.slane %v7214_v27, 5  ;;  %v2932_v6 = vrot.slane %v9244_v59, 5  ;;  %v5416_v57 = vrot.slane %v5400_v55, 9  ;;  %v6232_v27 = vld [vmem:[%s6434_s13 + $0x9c] sm:$0xff]   ;;  %v9255_v55 = vld [vmem:[#allocation18_spill] sm:$0xff] }
  0xd1   : > { %v5430_v23 = vcombine.low %v7605_v24, %v7614_v33  ;;  %v7623_v28 = vsel %vm6764_vm7, %v5414_v38, %v2922_v29  ;;  %v2924_v30 = vrot.slane %v2922_v29, 4  ;;  %v2936_v53 = vrot.slane %v9245_v36, 5  ;;  %v5403_v38 = vld [vmem:[%s6434_s13 + $0x9c] sm:$0xe]  ;;  %v9250_v36 = vld [vmem:[#allocation15_spill] sm:$0xff] }
  0xd2   : > { %v7632_v25 = vsel %vm6764_vm7, %v5415_v26, %v2929_v2  ;;  %v2931_v13 = vrot.slane %v2929_v2, 4  ;;  %v2939_v17 = vrot.slane %v9246_v50, 5  ;;  %v5417_v63 = vrot.slane %v5401_v19, 9  ;;  %v5404_v26 = vld [vmem:[%s6434_s13 + $0xa8] sm:$0xe] }
  0xd3   : > { %5987 = vmatmul.mubr.msk.bf16.gmra.mxu0 %vm756_vm3, %v7515_v43  ;;  %v7639_v1 = vsel %vm6764_vm7, %v2924_v30, %v2925_v56  ;;  %v7643_v43 = vsel %vm6764_vm7, %v5416_v57, %v2936_v53  ;;  %v2938_v20 = vrot.slane %v2936_v53, 4  ;;  %v2943_v62 = vrot.slane %v9247_v51, 5  ;;  %v5406_v57 = vld [vmem:[%s6434_s13 + $0xc0] sm:$0xe]  ;;  %v6233_v19 = vld [vmem:[%s6434_s13 + $0xa8] sm:$0xff]  }
  0xd4   : > { %5990 = vmatprep.mubr.msk.bf16.mxu0 %vm756_vm3, %v7522_v54  ;;  %v7651_v14 = vsel %vm6764_vm7, %v2931_v13, %v2932_v6  ;;  %v9248_v54 = vld [vmem:[#allocation11_spill] sm:$0xff]  ;;  %v5418_v56 = vrot.slane %v5402_v60, 9  ;;  %v2953_v53 = vrot.slane %v9250_v36, 5  ;;  %v5419_v60 = vrot.slane %v5403_v38, 9  ;;  %v9253_v38 = vld [vmem:[#allocation16_spill] sm:$0xff] }
  0xd5   : > { %v2946_v29 = vrot.slane %v9248_v54, 5  ;;  %v7660_v2 = vsel %vm6764_vm7, %v2938_v20, %v2939_v17  ;;  %v7664_v59 = vsel %vm6764_vm7, %v5417_v63, %v2943_v62  ;;  %v2945_v6 = vrot.slane %v2943_v62, 4  ;;  %v5405_v13 = vld [vmem:[%s6434_s13 + $0xb4] sm:$0xe]  ;;  %v9251_v17 = vld [vmem:[#allocation13_spill] sm:$0xff] }
  0xd6   : > { %5953 = vmatmul.mubr.msk.bf16.gmra.mxu1 %vm756_vm3, %v6231_v58  ;;  %v9249_v58 = vld [vmem:[#allocation10_spill] sm:$0xff]  ;;  %v2957_v63 = vrot.slane %v9251_v17, 5  ;;  %v9252_v20 = vld [vmem:[#allocation5_spill] sm:$0xff]  ;;  %v5420_v62 = vrot.slane %v5404_v26, 9  ;;  %v2964_v36 = vrot.slane %v9253_v38, 5  ;;  %v5421_v26 = vrot.slane %v5405_v13, 9 }
  0xd7   : > { %5956 = vmatprep.mubr.msk.bf16.mxu1 %vm756_vm3, %v6232_v27  ;;  %v2950_v30 = vrot.slane %v9249_v58, 5  ;;  %v7674_v50 = vsel %vm6764_vm7, %v2945_v6, %v2946_v29  ;;  %v2960_v51 = vrot.slane %v9252_v20, 5  ;;  %v9254_v17 = vld [vmem:[#allocation17_spill] sm:$0xff]  ;;  %v6234_v27 = vld [vmem:[%s6434_s13 + $0xb4] sm:$0xff]   ;;  %v2877_v39 = vsel %vm6764_vm7, %v7541_v44, %v2876_v34  ;;  %v7891_v7 = vld [vmem:[%s6434_s13 + $0x4c] sm:$0xf] }
  0xd8   : > { %v7689_v29 = vsel %vm6764_vm7, %v5419_v60, %v2957_v63  ;;  %v2959_v6 = vrot.slane %v2957_v63, 4  ;;  %v2967_v20 = vrot.slane %v9254_v17, 5  ;;  %v2966_v38 = vrot.slane %v2964_v36, 4  ;;  %v6253_v44 = vld [vmem:[%s6434_s13 + $0x20] sm:$0x1] }
  0xd9   : > { %v7682_v54 = vsel %vm6764_vm7, %v5418_v56, %v2950_v30  ;;  %v2952_v58 = vrot.slane %v2950_v30, 4  ;;  %v7701_v30 = vsel %vm6764_vm7, %v5420_v62, %v2964_v36  ;;  %v2971_v60 = vrot.slane %v9255_v55, 5 }
  0xda   : > { %v5422_v63 = vrot.slane %v5406_v57, 9  ;;  %v7717_v55 = vsel %vm6764_vm7, %v2966_v38, %v2967_v20  ;;  %v2978_v57 = vrot.slane %v7436_v22, 5  ;;  %v2874_v22 = vsel %vm6764_vm7, %v5407_v37, %v2873_v46  ;;  %v6238_v38 = vld [vmem:[%s6434_s13 + $0x30] sm:$0xff]  }
  0xdb   : > { %5991 = vmatmul.mubr.msk.bf16.gmra.mxu0 %vm756_vm3, %v7524_v42  ;;  %v7697_v56 = vsel %vm6764_vm7, %v2952_v58, %v2953_v53  ;;  %v7710_v42 = vsel %vm6764_vm7, %v2959_v6, %v2960_v51  ;;  %v2974_v53 = vrot.slane %v7427_v4, 5  ;;  %v2973_v58 = vrot.slane %v2971_v60, 4 }
  0xdc   : > { %5994 = vmatprep.mubr.msk.bf16.mxu0 %vm756_vm3, %v7530_v15  ;;  %v7721_v15 = vsel %vm6764_vm7, %v5421_v26, %v2971_v60  ;;  %v2981_v51 = vrot.slane %v7448_v45, 5  ;;  %v5392_v45 = vld [vmem:[%s6434_s13 + $0x18] sm:$0xe]  ;;  %v7761_v9 = vsel %vm6764_vm7, %v5422_v63, %v2978_v57  ;;  %v2980_v46 = vrot.slane %v2978_v57, 4  ;;  %v6237_v26 = vld [vmem:[%s6434_s13 + $0x24] sm:$0xff]  }
  0xdd   : > { %v7749_v32 = vsel %vm6764_vm7, %v2973_v58, %v2974_v53  ;;  %v5408_v37 = vrot.slane %v5392_v45, 9  ;;  %v5424_v34 = vcombine.low %v2874_v22, %v2877_v39  ;;  %v9256_v60 = vld [vmem:[#allocation12_spill] sm:$0xff] }
  0xde   : > { %5957 = vmatmul.mubr.msk.bf16.gmra.mxu1 %vm756_vm3, %v6233_v19  ;;  %v5374_v19 = vcombine.low %v2502_v16, %v2512_v21  ;;  %v7766_v47 = vsel %vm6764_vm7, %v2980_v46, %v2981_v51  ;;  %v2883_v21 = vrot.slane %v6253_v44, 5  ;;  %v4640_v53 = vsel %vm805_vm0, %v9256_v60, 0  ;;  %v5521_v63 = vld [vmem:[%s6434_s13 + $0x18] sm:$0xf]  ;;  %v5522_v57 = vld [vmem:[%s6434_s13 + $0x1c] sm:$0xf] }
  0xdf   : > { %5960 = vmatprep.mubr.msk.bf16.mxu1 %vm756_vm3, %v6234_v27  ;;  %v6252_v27 = vld [vmem:[%s6434_s13 + $0x1c] sm:$0xf]  ;;  %v5524_v51 = vld [vmem:[%s6434_s13 + $0x24] sm:$0xf]  ;;  %v3688_v45 = vshrl.u32 %v5521_v63, 16  ;;  %v3697_v39 = vshll.u32 %v5522_v57, 16 }
  0xe0   : > { %v2880_v36 = vrot.slane %v6252_v27, 5  ;;  %v3691_v27 = vshll.u32 %v5521_v63, 16  ;;  %v3712_v46 = vshrl.u32 %v5524_v51, 16  ;;  %v6240_v44 = vld [vmem:[%s6434_s13 + $0x48] sm:$0xff]   ;;  %v5602_v60 = vld [vmem:[%s6434_s13 + $0x18] sm:$0xe] }
  0xe1   : > { %v7807_v63 = vld [vmem:[%s6434_s13 + $0x2c] sm:$0x1] }
  0xe2   : > { %v2882_v16 = vrot.slane %v2880_v36, 4  ;;  %v2881_v17 = vsel %vm6764_vm7, %v5408_v37, %v2880_v36  ;;  %v7791_v36 = vld [vmem:[%s6434_s13 + $0x28] sm:$0xf]  ;;  %v6239_v37 = vld [vmem:[%s6434_s13 + $0x3c] sm:$0xff]   ;;  %v3714_v18 = vrot.slane %v3712_v46, 4 }
  0xe3   : > { %5995 = vmatmul.mubr.msk.bf16.gmra.mxu0 %vm756_vm3, %v5374_v19  ;;  %v9257_v19 = vld [vmem:[#allocation14_spill] sm:$0xff] }
  0xe4   : > { %6034 = vmatprep.mubr.msk.bf16.mxu0 %vm756_vm3, %v6236_v49  ;;  %v2884_v20 = vsel %vm6764_vm7, %v2882_v16, %v2883_v21  ;;  %v4170_v22 = vsel %vm805_vm0, %v9257_v19, 0  ;;  %v3701_v49 = vshrl.u32 %v5522_v57, 16  ;;  %v3725_v16 = vshrl.u32 %v7791_v36, 16  ;;  %v5523_v21 = vld [vmem:[%s6434_s13 + $0x20] sm:$0x1] }
  0xe5   : > { %v5425_v58 = vcombine.low %v2881_v17, %v2884_v20  ;;  %v3690_v17 = vrot.slane %v3688_v45, 4  ;;  %v3693_v20 = vrot.slane %v3691_v27, 5  ;;  %v5527_v19 = vld [vmem:[%s6434_s13 + $0x30] sm:$0xf]  ;;  %v3707_v45 = vshll.u32 %v5523_v21, 16 }
  0xe6   : > { %5961 = vmatmul.mubr.msk.bf16.gmra.mxu1 %vm756_vm3, %v6235_v52  ;;  %v3715_v52 = vshll.u32 %v5524_v51, 16  ;;  %v3727_v51 = vrot.slane %v3725_v16, 4  ;;  %v5618_v27 = vrot.slane %v5602_v60, 9  ;;  %v4434_v46 = vrot.slane %v5523_v21, 5  ;;  %v5603_v16 = vld [vmem:[%s6434_s13 + $0x24] sm:$0xe] }
  0xe7   : > { %6000 = vmatprep.mubr.msk.bf16.mxu1 %vm756_vm3, %v5424_v34  ;;  %v3721_v34 = vshll.u32 %v7791_v36, 16  ;;  %v6241_v21 = vld [vmem:[%s6434_s13 + $0x54] sm:$0xff]   ;;  %v3739_v10 = vshll.u32 %v5527_v19, 16  ;;  %v6242_v60 = vld [vmem:[%s6434_s13 + $0x60] sm:$0xff]  }
  0xe8   : > { %v3717_v11 = vrot.slane %v3715_v52, 5  ;;  %v3731_v52 = vshll.u32 %v7807_v63, 16 }
  0xeb   : > { %6035 = vmatmul.mubr.msk.bf16.vlgmr.msra.gmra.mxu0 %vm756_vm3, %v6237_v26  ;;  %v7803_v26 = vrot.slane %v3697_v39, 5 }
  0xec   : > { %6101 = vmatpush3.bf16.msra.mxu0 %v4640_v53  ;;  %6038 = vmatprep.mubr.msk.bf16.mxu0 %vm756_vm3, %v6238_v38  ;;  %v3703_v38 = vrot.slane %v3701_v49, 4  ;;  %v4431_v53 = vrot.slane %v5522_v57, 5  ;;  %v7817_v57 = vld [vmem:[%s6434_s13 + $0x34] sm:$0xf] }
  0xee   : > { %6001 = vmatmul.mubr.msk.bf16.vlgmr.msra.gmra.mxu1 %vm756_vm3, %v5425_v58  ;;  %v7812_v58 = vrot.slane %v3721_v34, 5  ;;  %v3704_v39 = vor.u32 %v3703_v38, %v7803_v26  ;;  %v4433_v49 = vrot.slane %v4431_v53, 4  ;;  %v3718_v34 = vor.u32 %v3717_v11, %v3714_v18 }
  0xef   : > { %6067 = vmatpush3.bf16.msra.mxu1 %v4170_v22  ;;  %6004 = vmatprep.mubr.msk.bf16.mxu1 %vm756_vm3, %v5426_v5  ;;  %v7810_v5 = vpop.f32.mrf.mxu0  ;;  %v3694_v22 = vor.u32 %v3693_v20, %v3690_v17  ;;  %v3736_v17 = vshrl.u32 %v5527_v19, 16  ;;  %v3749_v38 = vshrl.u32 %v7817_v57, 16  ;;  %v7842_v61 = vsel %vm6764_vm7, %v5618_v27, %v4431_v53  ;;  %v5530_v19 = vld [vmem:[%s6434_s13 + $0x3c] sm:$0xf] }
  0xf0   : > { %v3728_v41 = vor.u32 %v3727_v51, %v7812_v58  ;;  %v3705_v8 = vrot.slane %v3704_v39, 4  ;;  %v3733_v11 = vrot.slane %v3731_v52, 5  ;;  %v5619_v51 = vrot.slane %v5603_v16, 9  ;;  %v7856_v39 = vld [vmem:[%s6434_s13 + $0x38] sm:$0x1] }
  0xf1   : > { %v7834_v20 = vpop.f32.mrf.mxu0  ;;  %v3695_v18 = vrot.slane %v3694_v22, 4  ;;  %v3719_v12 = vrot.slane %v3718_v34, 4  ;;  %v4441_v22 = vrot.slane %v7807_v63, 5  ;;  %v3751_v52 = vrot.slane %v3749_v38, 4 }
  0xf2   : > { %v3729_v27 = vrot.slane %v3728_v41, 4  ;;  %v3760_v34 = vshrl.u32 %v5530_v19, 16  ;;  %v3763_v16 = vshll.u32 %v5530_v19, 16  ;;  %v7869_v41 = vld [vmem:[%s6434_s13 + $0x40] sm:$0xf] }
  0xf3   : > { %6039 = vmatmul.mubr.msk.bf16.gmra.mxu0 %vm756_vm3, %v6239_v37  ;;  %v7853_v53 = vpop.f32.mrf.mxu0  ;;  %v3700_v63 = vsel %vm6478_vm4, %v3695_v18, %v7803_v26  ;;  %v3724_v26 = vsel %vm6478_vm4, %v3719_v12, %v7812_v58  ;;  %v5604_v18 = vld [vmem:[%s6434_s13 + $0x30] sm:$0xe]  ;;  %v3769_v24 = vshll.u32 %v7869_v41, 16  ;;  %v3773_v33 = vshrl.u32 %v7869_v41, 16 }
  0xf4   : > { %6042 = vmatprep.mubr.msk.bf16.mxu0 %vm756_vm3, %v6240_v44  ;;  %v7825_v37 = vpop.f32.mrf.mxu1  ;;  %v4438_v44 = vrot.slane %v7791_v36, 5  ;;  %v3709_v36 = vrot.slane %v3707_v45, 5  ;;  %v3738_v45 = vrot.slane %v3736_v17, 4  ;;  %v3734_v58 = vsel %vm6478_vm4, %v3729_v27, %v3733_v11 }
  0xf5   : > { %9258 = vst [vmem:[#allocation7_spill] sm:$0xff] %v7825_v37  ;;  %v7898_v12 = vpop.f32.mrf.mxu0  ;;  %v3765_v19 = vrot.slane %v3763_v16, 5  ;;  %v3797_v11 = vshrl.u32 %v7891_v7, 16 }
  0xf6   : > { %6005 = vmatmul.mubr.msk.bf16.gmra.mxu1 %vm756_vm3, %v5427_v48  ;;  %v3745_v48 = vshll.u32 %v7817_v57, 16  ;;  %v7849_v6 = vpop.f32.mrf.mxu1  ;;  %v4440_v4 = vrot.slane %v4438_v44, 4  ;;  %v3710_v17 = vsel %vm6478_vm4, %v3705_v8, %v3709_v36  ;;  %v4445_v36 = vrot.slane %v7817_v57, 5  ;;  %v6244_v8 = vld [vmem:[%s6434_s13 + $0x78] sm:$0xff]  }
  0xf7   : > { %6008 = vmatprep.mubr.msk.bf16.mxu1 %vm756_vm3, %v5428_v40  ;;  %v7846_v40 = vsel %vm6764_vm7, %v4433_v49, %v4434_v46  ;;  %9259 = vst [vmem:[#allocation6_spill] sm:$0xff] %v7849_v6  ;;  %v3741_v49 = vrot.slane %v3739_v10, 5  ;;  %v7912_v27 = vcombine.low %v3700_v63, %v3710_v17  ;;  %v7914_v57 = vcombine.low %v3724_v26, %v3734_v58  ;;  %v7928_v17 = vld [vmem:[%s6434_s13 + $0x58] sm:$0xf]  ;;  %v7934_v58 = vld [vmem:[%s6434_s13 + $0x44] sm:$0x1] }
  0xf8   : > { %v7858_v46 = vrot.slane %v3745_v48, 5  ;;  %v7875_v10 = vpop.f32.mrf.mxu1  ;;  %v7882_v48 = vsel %vm6764_vm7, %v5619_v51, %v4438_v44  ;;  %v7886_v38 = vsel %vm6764_vm7, %v4440_v4, %v4441_v22  ;;  %v3762_v51 = vrot.slane %v3760_v34, 4  ;;  %v5536_v34 = vld [vmem:[%s6434_s13 + $0x54] sm:$0xf] }
  0xf9   : > { %9260 = vst [vmem:[#allocation9_spill] sm:$0xff] %v7875_v10  ;;  %v3742_v44 = vor.u32 %v3741_v49, %v3738_v45  ;;  %v3787_v22 = vshll.u32 %v5533_v3, 16  ;;  %v4447_v13 = vrot.slane %v4445_v36, 4  ;;  %v4448_v63 = vrot.slane %v7856_v39, 5  ;;  %v5605_v49 = vld [vmem:[%s6434_s13 + $0x3c] sm:$0xe] }
  0xfa   : > { %v3752_v4 = vor.u32 %v3751_v52, %v7858_v46  ;;  %v7910_v45 = vpop.f32.mrf.mxu1  ;;  %v5620_v52 = vrot.slane %v5604_v18, 9  ;;  %v3766_v18 = vor.u32 %v3765_v19, %v3762_v51  ;;  %v9263_v6 = vcombine.low %v7623_v28, %v7639_v1 }
  0xfb   : > { %6043 = vmatmul.mubr.msk.bf16.gmra.mxu0 %vm756_vm3, %v6241_v21  ;;  %v3793_v21 = vshll.u32 %v7891_v7, 16  ;;  %9261 = vst [vmem:[#allocation8_spill] sm:$0xff] %v7910_v45  ;;  %v3789_v45 = vrot.slane %v3787_v22, 5  ;;  %v3808_v51 = vshrl.u32 %v5536_v34, 16  ;;  %v3811_v19 = vshll.u32 %v5536_v34, 16 }
  0xfc   : > { %6046 = vmatprep.mubr.msk.bf16.mxu0 %vm756_vm3, %v6242_v60  ;;  %v3755_v60 = vshll.u32 %v7856_v39, 16  ;;  %v7931_v26 = vrot.slane %v3752_v4, 4  ;;  %v3799_v39 = vrot.slane %v3797_v11, 4  ;;  %v7969_v22 = vsel %vm6764_vm7, %v4447_v13, %v4448_v63 }
  0xfd   : > { %v7939_v10 = vrot.slane %v3793_v21, 5  ;;  %v9265_v21 = vcombine.low %v7632_v25, %v7651_v14  ;;  %v4452_v25 = vrot.slane %v7869_v41, 5  ;;  %v6246_v14 = vld [vmem:[%s6434_s13 + $0x90] sm:$0xff]   ;;  %v5621_v1 = vrot.slane %v5605_v49, 9  ;;  %v5539_v41 = vld [vmem:[%s6434_s13 + $0x60] sm:$0xf] }
  0xfe   : > { %6009 = vmatmul.mubr.msk.bf16.gmra.mxu1 %vm756_vm3, %v5429_v35  ;;  %v6243_v35 = vld [vmem:[%s6434_s13 + $0x6c] sm:$0xff]   ;;  %v7924_v62 = vrot.slane %v3755_v60, 5  ;;  %v3810_v37 = vrot.slane %v3808_v51, 4 }
  0xff   : > { %6012 = vmatprep.mubr.msk.bf16.mxu1 %vm756_vm3, %v5430_v23  ;;  %v3784_v23 = vshrl.u32 %v5533_v3, 16  ;;  %v7922_v3 = vrot.slane %v3742_v44, 4  ;;  %v3775_v44 = vrot.slane %v3773_v33, 4  ;;  %v3821_v33 = vshrl.u32 %v7928_v17, 16 }
 0x100   : > { %v7920_v16 = vpop.f32.mrf.mxu0  ;;  %v3800_v13 = vor.u32 %v3799_v39, %v7939_v10  ;;  %v4459_v39 = vrot.slane %v7891_v7, 5  ;;  %v9269_v7 = vcombine.low %v7643_v43, %v7660_v2  ;;  %v9271_v43 = vcombine.low %v7664_v59, %v7674_v50  ;;  %v6247_v2 = vld [vmem:[%s6434_s13 + $0x9c] sm:$0xff]  }
 0x101   : > { %9262 = vst [vmem:[#allocation11_spill] sm:$0xff] %v7920_v16  ;;  %v3786_v60 = vrot.slane %v3784_v23, 4  ;;  %v6245_v23 = vld [vmem:[%s6434_s13 + $0x84] sm:$0xff]   ;;  %v7996_v16 = vld [vmem:[%s6434_s13 + $0x5c] sm:$0x1]  ;;  %v4466_v59 = vrot.slane %v7928_v17, 5 }
 0x102   : > { %v7957_v28 = vpop.f32.mrf.mxu0 }
 0x103   : > { %6047 = vmatmul.mubr.msk.bf16.gmra.mxu0 %vm756_vm3, %v6243_v35  ;;  %v7936_v35 = vrot.slane %v3769_v24, 5  ;;  %v3817_v24 = vshll.u32 %v7928_v17, 16  ;;  %9266 = vst [vmem:[#allocation15_spill] sm:$0xff] %v7957_v28  ;;  %v3813_v28 = vrot.slane %v3811_v19, 5 }
 0x104   : > { %6050 = vmatprep.mubr.msk.bf16.mxu0 %vm756_vm3, %v6244_v8  ;;  %v7945_v4 = vpop.f32.mrf.mxu1  ;;  %v7948_v8 = vld [vmem:[%s6434_s13 + $0x50] sm:$0x1]  ;;  %v7989_v49 = vpop.f32.mrf.mxu0 }
 0x105   : > { %9264 = vst [vmem:[#allocation10_spill] sm:$0xff] %v7945_v4  ;;  %v3776_v34 = vor.u32 %v3775_v44, %v7936_v35  ;;  %v7979_v4 = vrot.slane %v3766_v18, 4  ;;  %v7986_v11 = vrot.slane %v3817_v24, 5  ;;  %v3823_v44 = vrot.slane %v3821_v33, 4  ;;  %9268 = vst [vmem:[#allocation5_spill] sm:$0xff] %v7989_v49 }
 0x106   : > { %6013 = vmatmul.mubr.msk.bf16.gmra.mxu1 %vm756_vm3, %v9263_v6  ;;  %v7965_v6 = vsel %vm6764_vm7, %v5620_v52, %v4445_v36  ;;  %v3790_v36 = vor.u32 %v3789_v45, %v3786_v60  ;;  %v3803_v52 = vshll.u32 %v7948_v8, 16  ;;  %v7984_v63 = vpop.f32.mrf.mxu1  ;;  %v4454_v18 = vrot.slane %v4452_v25, 4  ;;  %v5606_v24 = vld [vmem:[%s6434_s13 + $0x48] sm:$0xe] }
 0x107   : > { %6016 = vmatprep.mubr.msk.bf16.mxu1 %vm756_vm3, %v9265_v21  ;;  %v3779_v21 = vshll.u32 %v7934_v58, 16  ;;  %9267 = vst [vmem:[#allocation13_spill] sm:$0xff] %v7984_v63  ;;  %v4455_v60 = vrot.slane %v7934_v58, 5  ;;  %v3777_v51 = vrot.slane %v3776_v34, 4  ;;  %v3832_v33 = vshrl.u32 %v5539_v41, 16 }
 0x108   : > { %v8002_v63 = vsel %vm6764_vm7, %v5621_v1, %v4452_v25  ;;  %v3791_v45 = vrot.slane %v3790_v36, 4  ;;  %v3801_v49 = vrot.slane %v3800_v13, 4  ;;  %v3805_v58 = vrot.slane %v3803_v52, 5  ;;  %v8017_v36 = vld [vmem:[%s6434_s13 + $0x64] sm:$0xf]  ;;  %v8024_v13 = vpop.f32.mrf.mxu0 }
 0x109   : > { %v3781_v19 = vrot.slane %v3779_v21, 5  ;;  %v3772_v34 = vsel %vm6478_vm4, %v7979_v4, %v7936_v35  ;;  %v3814_v21 = vor.u32 %v3813_v28, %v3810_v37  ;;  %v3824_v1 = vor.u32 %v3823_v44, %v7986_v11  ;;  %9272 = vst [vmem:[#allocation17_spill] sm:$0xff] %v8024_v13  ;;  %v5607_v28 = vld [vmem:[%s6434_s13 + $0x54] sm:$0xe]  ;;  %v6251_v13 = vld [vmem:[%s6434_s13 + $0xcc] sm:$0xff]  }
 0x10a   : > { %v3827_v25 = vshll.u32 %v7996_v16, 16  ;;  %v8028_v52 = vsel %vm6764_vm7, %v4454_v18, %v4455_v60  ;;  %v5622_v35 = vrot.slane %v5606_v24, 9  ;;  %v4461_v37 = vrot.slane %v4459_v39, 4 }
 0x10b   : > { %6051 = vmatmul.mubr.msk.bf16.gmra.mxu0 %vm756_vm3, %v6245_v23  ;;  %v3835_v23 = vshll.u32 %v5539_v41, 16  ;;  %v4462_v4 = vrot.slane %v7948_v8, 5  ;;  %v6248_v41 = vld [vmem:[%s6434_s13 + $0xa8] sm:$0xff]   ;;  %v3782_v44 = vsel %vm6478_vm4, %v3777_v51, %v3781_v19  ;;  %v3834_v50 = vrot.slane %v3832_v33, 4 }
 0x10c   : > { %6054 = vmatprep.mubr.msk.bf16.mxu0 %vm756_vm3, %v6246_v14  ;;  %v8008_v14 = vpop.f32.mrf.mxu1  ;;  %v3806_v18 = vsel %vm6478_vm4, %v3801_v49, %v3805_v58  ;;  %v3841_v60 = vshll.u32 %v8017_v36, 16  ;;  %v3845_v8 = vshrl.u32 %v8017_v36, 16  ;;  %v3825_v51 = vrot.slane %v3824_v1, 4  ;;  %v8046_v33 = vld [vmem:[%s6434_s13 + $0x68] sm:$0x1] }
 0x10d   : > { %9270 = vst [vmem:[#allocation16_spill] sm:$0xff] %v8008_v14  ;;  %v3815_v14 = vrot.slane %v3814_v21, 4  ;;  %v3829_v17 = vrot.slane %v3827_v25, 5  ;;  %v5623_v19 = vrot.slane %v5607_v28, 9  ;;  %v9275_v49 = vsel %vm6478_vm4, %v7931_v26, %v7924_v62  ;;  %v5542_v25 = vld [vmem:[%s6434_s13 + $0x6c] sm:$0xf] }
 0x10e   : > { %6017 = vmatmul.mubr.msk.bf16.gmra.mxu1 %vm756_vm3, %v9269_v7  ;;  %v3837_v7 = vrot.slane %v3835_v23, 5  ;;  %v8043_v24 = vpop.f32.mrf.mxu1  ;;  %v8067_v21 = vsel %vm6764_vm7, %v5622_v35, %v4459_v39  ;;  %v8071_v1 = vsel %vm6764_vm7, %v4461_v37, %v4462_v4  ;;  %v8074_v62 = vcombine.low %v3772_v34, %v3782_v44  ;;  %v5608_v4 = vld [vmem:[%s6434_s13 + $0x60] sm:$0xe]  ;;  %v5548_v44 = vld [vmem:[%s6434_s13 + $0x84] sm:$0xf] }
 0x10f   : > { %6020 = vmatprep.mubr.msk.bf16.mxu1 %vm756_vm3, %v9271_v43  ;;  %v3796_v43 = vsel %vm6478_vm4, %v3791_v45, %v7939_v10  ;;  %9273 = vst [vmem:[#allocation18_spill] sm:$0xff] %v8043_v24  ;;  %v9276_v45 = vsel %vm6478_vm4, %v7922_v3, %v7858_v46  ;;  %v4468_v46 = vrot.slane %v4466_v59, 4  ;;  %v4469_v3 = vrot.slane %v7996_v16, 5 }
 0x110   : > { %v8061_v23 = vcombine.low %v9276_v45, %v9275_v49  ;;  %9277 = vst [vmem:[#allocation14_spill] sm:$0xff] %v8074_v62  ;;  %v3838_v26 = vor.u32 %v3837_v7, %v3834_v50  ;;  %v8081_v28 = vcombine.low %v3796_v43, %v3806_v18  ;;  %v8083_v39 = vrot.slane %v3841_v60, 5 }
 0x111   : > { %v8049_v10 = vpop.f32.mrf.mxu0  ;;  %v8085_v35 = vrot.slane %v3845_v8, 4  ;;  %v3851_v37 = vshll.u32 %v8046_v33, 16  ;;  %v9279_v34 = vcombine.low %v7682_v54, %v7697_v56  ;;  %v3820_v50 = vsel %vm6478_vm4, %v3815_v14, %v7986_v11  ;;  %v5545_v54 = vld [vmem:[%s6434_s13 + $0x78] sm:$0xf] }
 0x112   : > { %9274 = vst [vmem:[#allocation12_spill] sm:$0xff] %v8049_v10  ;;  %9278 = vst [vmem:[#allocation19_spill] sm:$0xff] %v8081_v28  ;;  %v3830_v7 = vsel %vm6478_vm4, %v3825_v51, %v3829_v17  ;;  %v8105_v43 = vsel %vm6764_vm7, %v5623_v19, %v4466_v59  ;;  %v9281_v56 = vcombine.low %v7689_v29, %v7710_v42  ;;  %v3856_v60 = vshrl.u32 %v5542_v25, 16  ;;  %v8117_v51 = vld [vmem:[%s6434_s13 + $0x7c] sm:$0xf]  ;;  %v6250_v59 = vld [vmem:[%s6434_s13 + $0xc0] sm:$0xff]  }
 0x113   : > { %6055 = vmatmul.mubr.msk.bf16.gmra.mxu0 %vm756_vm3, %v6247_v2  ;;  %v8079_v2 = vld [vmem:[%s6434_s13 + $0x70] sm:$0xf]  ;;  %v8112_v18 = vpop.f32.mrf.mxu0  ;;  %v3859_v8 = vshll.u32 %v5542_v25, 16  ;;  %v8122_v17 = vsel %vm6764_vm7, %v4468_v46, %v4469_v3  ;;  %v8124_v29 = vrot.slane %v3838_v26, 4  ;;  %v5624_v42 = vrot.slane %v5608_v4, 9 }
 0x114   : > { %6058 = vmatprep.mubr.msk.bf16.mxu0 %vm756_vm3, %v6248_v41  ;;  %v6249_v41 = vld [vmem:[%s6434_s13 + $0xb4] sm:$0xff]   ;;  %9282 = vst [vmem:[#allocation21_spill] sm:$0xff] %v8112_v18  ;;  %v3865_v11 = vshll.u32 %v8079_v2, 16  ;;  %v3869_v14 = vshrl.u32 %v8079_v2, 16  ;;  %v4473_v19 = vrot.slane %v8017_v36, 5  ;;  %v8127_v49 = vcombine.low %v3820_v50, %v3830_v7 }
 0x115   : > { %v3848_v45 = vor.u32 %v8085_v35, %v8083_v39  ;;  %v8131_v25 = vrot.slane %v3851_v37, 5  ;;  %v3880_v46 = vshrl.u32 %v5545_v54, 16  ;;  %v3883_v3 = vshll.u32 %v5545_v54, 16  ;;  %v8143_v4 = vld [vmem:[%s6434_s13 + $0x88] sm:$0xf]  ;;  %v8146_v35 = vpop.f32.mrf.mxu0 }
 0x116   : > { %6021 = vmatmul.mubr.msk.bf16.gmra.mxu1 %vm756_vm3, %v9279_v34  ;;  %v8093_v16 = vpop.f32.mrf.mxu1  ;;  %9283 = vst [vmem:[#allocation22_spill] sm:$0xff] %v8127_v49  ;;  %v4476_v34 = vrot.slane %v8046_v33, 5  ;;  %v3889_v36 = vshll.u32 %v8117_v51, 16  ;;  %v3893_v26 = vshrl.u32 %v8117_v51, 16  ;;  %9285 = vst [vmem:[#allocation24_spill] sm:$0xff] %v8146_v35  ;;  %v3858_v33 = vrot.slane %v3856_v60, 4 }
 0x117   : > { %9280 = vst [vmem:[#allocation20_spill] sm:$0xff] %v8093_v16  ;;  %6024 = vmatprep.mubr.msk.bf16.mxu1 %vm756_vm3, %v9281_v56  ;;  %v8135_v56 = vld [vmem:[%s6434_s13 + $0x74] sm:$0x1]  ;;  %v3861_v37 = vrot.slane %v3859_v8, 5  ;;  %v8148_v50 = vrot.slane %v3865_v11, 5  ;;  %v3871_v7 = vrot.slane %v3869_v14, 4  ;;  %v9286_v54 = vcombine.low %v7701_v30, %v7717_v55  ;;  %v8176_v49 = vpop.f32.mrf.mxu0 }
 0x118   : > { %v8138_v58 = vpop.f32.mrf.mxu1  ;;  %v4475_v16 = vrot.slane %v4473_v19, 4  ;;  %v8161_v60 = vld [vmem:[%s6434_s13 + $0x80] sm:$0x1]  ;;  %v8164_v8 = vld [vmem:[%s6434_s13 + $0x6c] sm:$0xe]  ;;  %v3904_v11 = vshrl.u32 %v5548_v44, 16 }
 0x119   : > { %9284 = vst [vmem:[#allocation23_spill] sm:$0xff] %v8138_v58  ;;  %v8157_v58 = vsel %vm6764_vm7, %v5624_v42, %v4473_v19  ;;  %v3907_v14 = vshll.u32 %v5548_v44, 16  ;;  %v3917_v24 = vshrl.u32 %v8143_v4, 16  ;;  %v3882_v19 = vrot.slane %v3880_v46, 4  ;;  %9288 = vst [vmem:[#allocation26_spill] sm:$0xff] %v8176_v49 }
 0x11a   : > { %v8172_v42 = vpop.f32.mrf.mxu1  ;;  %v3885_v35 = vrot.slane %v3883_v3, 5  ;;  %v8174_v18 = vrot.slane %v3889_v36, 5  ;;  %v3895_v10 = vrot.slane %v3893_v26, 4  ;;  %v9289_v44 = vcombine.low %v7721_v15, %v7749_v32  ;;  %v8195_v32 = vld [vmem:[%s6434_s13 + $0x8c] sm:$0x1] }
 0x11b   : > { %6059 = vmatmul.mubr.msk.bf16.gmra.mxu0 %vm756_vm3, %v6249_v41  ;;  %v3875_v41 = vshll.u32 %v8135_v56, 16  ;;  %9287 = vst [vmem:[#allocation25_spill] sm:$0xff] %v8172_v42  ;;  %v3862_v30 = vor.u32 %v3861_v37, %v3858_v33  ;;  %v3872_v55 = vor.u32 %v3871_v7, %v8148_v50  ;;  %v3899_v46 = vshll.u32 %v8161_v60, 16  ;;  %v5610_v33 = vld [vmem:[%s6434_s13 + $0x78] sm:$0xe] }
 0x11c   : > { %6062 = vmatprep.mubr.msk.bf16.mxu0 %vm756_vm3, %v6250_v59  ;;  %v3913_v59 = vshll.u32 %v8143_v4, 16  ;;  %v8186_v3 = vrot.slane %v3848_v45, 4  ;;  %v8190_v36 = vsel %vm6764_vm7, %v4475_v16, %v4476_v34  ;;  %v5625_v26 = vrot.slane %v8164_v8, 9  ;;  %v8200_v42 = vpop.f32.mrf.mxu1  ;;  %v5551_v8 = vld [vmem:[%s6434_s13 + $0x90] sm:$0xf] }
 0x11d   : > { %v4487_v15 = vrot.slane %v8117_v51, 5  ;;  %v3906_v37 = vrot.slane %v3904_v11, 4  ;;  %v3909_v7 = vrot.slane %v3907_v14, 5  ;;  %9290 = vst [vmem:[#allocation27_spill] sm:$0xff] %v8200_v42  ;;  %v3877_v45 = vrot.slane %v3875_v41, 5 }
 0x11e   : > { %6025 = vmatmul.mubr.msk.bf16.gmra.mxu1 %vm756_vm3, %v9286_v54  ;;  %v4480_v54 = vrot.slane %v8079_v2, 5  ;;  %v8198_v2 = vrot.slane %v3913_v59, 5  ;;  %v4483_v49 = vrot.slane %v8135_v56, 5  ;;  %v3886_v16 = vor.u32 %v3885_v35, %v3882_v19  ;;  %v8209_v59 = vld [vmem:[%s6434_s13 + $0x94] sm:$0xf] }
 0x11f   : > { %6028 = vmatprep.mubr.msk.bf16.mxu1 %vm756_vm3, %v9289_v44  ;;  %v3919_v44 = vrot.slane %v3917_v24, 4  ;;  %v3896_v34 = vor.u32 %v3895_v10, %v8174_v18  ;;  %v3863_v51 = vrot.slane %v3862_v30, 4  ;;  %v3873_v11 = vrot.slane %v3872_v55, 4 }
 0x120   : > { %v4482_v62 = vrot.slane %v4480_v54, 4  ;;  %v3901_v14 = vrot.slane %v3899_v46, 5  ;;  %v9291_v24 = vcombine.low %v7842_v61, %v7846_v40  ;;  %v5626_v56 = vrot.slane %v5610_v33, 9 }
 0x121   : > { %v4489_v35 = vrot.slane %v4487_v15, 4  ;;  %v4490_v10 = vrot.slane %v8161_v60, 5  ;;  %v3923_v41 = vshll.u32 %v8195_v32, 16  ;;  %v3920_v30 = vor.u32 %v3919_v44, %v8198_v2 }
 0x122   : > { %v3928_v55 = vshrl.u32 %v5551_v8, 16  ;;  %v3931_v46 = vshll.u32 %v5551_v8, 16  ;;  %v9293_v61 = vcombine.low %v7761_v9, %v7766_v47  ;;  %v3887_v40 = vrot.slane %v3886_v16, 4 }
 0x123   : > { %v8205_v28 = vpop.f32.mrf.mxu0  ;;  %6063 = vmatmul.mubr.msk.bf16.gmra.mxu0 %vm756_vm3, %v6251_v13  ;;  %v3910_v13 = vor.u32 %v3909_v7, %v3906_v37  ;;  %v3897_v33 = vrot.slane %v3896_v34, 4  ;;  %v3937_v60 = vshll.u32 %v8209_v59, 16  ;;  %v3854_v37 = vsel %vm6478_vm4, %v8186_v3, %v8131_v25 }
 0x124   : > { %6102 = vmatprep.mubr.msk.bf16.mxu0 %vm756_vm3, %v9291_v24  ;;  %v3941_v24 = vshrl.u32 %v8209_v59, 16  ;;  %v3868_v9 = vsel %vm6478_vm4, %v3863_v51, %v8148_v50  ;;  %v8241_v47 = vsel %vm6764_vm7, %v5625_v26, %v4480_v54  ;;  %v8245_v7 = vsel %vm6764_vm7, %v4482_v62, %v4483_v49  ;;  %v5611_v54 = vld [vmem:[%s6434_s13 + $0x84] sm:$0xe]  ;;  %v9332_v31 = vld [vmem:[#allocation27_spill] sm:$0xff] }
 0x125   : > { %v8217_v19 = vpop.f32.mrf.mxu0  ;;  %v8253_v25 = vsel %vm6764_vm7, %v5626_v56, %v4487_v15  ;;  %v8257_v50 = vsel %vm6764_vm7, %v4489_v35, %v4490_v10  ;;  %v3925_v3 = vrot.slane %v3923_v41, 5  ;;  %v3911_v62 = vrot.slane %v3910_v13, 4  ;;  %v8281_v13 = vld [vmem:[%s6434_s13 + $0x98] sm:$0x1] }
 0x126   : > { %9292 = vst [vmem:[#allocation28_spill] sm:$0xff] %v8217_v19  ;;  %v8220_v42 = vpop.f32.mrf.mxu1  ;;  %6029 = vmatmul.mubr.msk.bf16.gmra.mxu1 %vm756_vm3, %v9293_v61  ;;  %v3921_v49 = vrot.slane %v3920_v30, 4  ;;  %v3930_v16 = vrot.slane %v3928_v55, 4  ;;  %v3933_v34 = vrot.slane %v3931_v46, 5  ;;  %v3892_v15 = vsel %vm6478_vm4, %v3887_v40, %v8174_v18  ;;  %v5554_v30 = vld [vmem:[%s6434_s13 + $0x9c] sm:$0xf] }
 0x127   : > { %v8228_v19 = vpop.f32.mrf.mxu0  ;;  %6068 = vmatprep.mubr.msk.bf16.mxu1 %vm756_vm3, %v7912_v27  ;;  %v3878_v27 = vsel %vm6478_vm4, %v3873_v11, %v3877_v45  ;;  %v3902_v45 = vsel %vm6478_vm4, %v3897_v33, %v3901_v14  ;;  %v8269_v51 = vrot.slane %v3937_v60, 5  ;;  %v3943_v11 = vrot.slane %v3941_v24, 4  ;;  %v8312_v24 = vld [vmem:[%s6434_s13 + $0xa0] sm:$0xf] }
 0x128   : > { %v8247_v44 = vpop.f32.mrf.mxu1  ;;  %v9294_v35 = vcombine.low %v7882_v48, %v7886_v38  ;;  %v5640_v10 = vcombine.low %v8105_v43, %v8122_v17  ;;  %v5641_v41 = vcombine.low %v8157_v58, %v8190_v36  ;;  %v5627_v18 = vrot.slane %v5611_v54, 9 }
 0x129   : > { %v8260_v26 = vpop.f32.mrf.mxu0  ;;  %v4494_v14 = vrot.slane %v8143_v4, 5  ;;  %v9295_v48 = vcombine.low %v7965_v6, %v7969_v22  ;;  %v9296_v38 = vsel %vm6478_vm4, %v8124_v29, %v8083_v39  ;;  %v8297_v61 = vcombine.low %v3868_v9, %v3878_v27  ;;  %v5612_v29 = vld [vmem:[%s6434_s13 + $0x90] sm:$0xe]  ;;  %v9303_v4 = vld [vmem:[#allocation5_spill] sm:$0xff] }
 0x12a   : > { %v8262_v8 = vpop.f32.mrf.mxu1  ;;  %v8295_v46 = vcombine.low %v9296_v38, %v3854_v37  ;;  %v8303_v60 = vcombine.low %v3892_v15, %v3902_v45  ;;  %v3916_v6 = vsel %vm6478_vm4, %v3911_v62, %v8198_v2  ;;  %v3926_v22 = vsel %vm6478_vm4, %v3921_v49, %v3925_v3 }
 0x12b   : > { %v5900_v56 = vpop.f32.mrf.mxu0  ;;  %6103 = vmatmul.mubr.msk.bf16.vlgmr.msra.gmra.mxu0 %vm756_vm3, %v9294_v35  ;;  %v3934_v39 = vor.u32 %v3933_v34, %v3930_v16  ;;  %v3944_v9 = vor.u32 %v3943_v11, %v8269_v51  ;;  %v3947_v27 = vshll.u32 %v8281_v13, 16  ;;  %v3952_v54 = vshrl.u32 %v5554_v30, 16 }
 0x12c   : > { %v8284_v55 = vpop.f32.mrf.mxu1  ;;  %6106 = vmatprep.mubr.msk.bf16.mxu0 %vm756_vm3, %v9295_v48  ;;  %v3955_v15 = vshll.u32 %v5554_v30, 16  ;;  %v8323_v3 = vsel %vm6764_vm7, %v5627_v18, %v4494_v14  ;;  %v4496_v62 = vrot.slane %v4494_v14, 4  ;;  %v4497_v49 = vrot.slane %v8195_v32, 5 }
 0x12d   : > { %v1560_v33 = vpop.f32.mrf.mxu0  ;;  %v5628_v16 = vrot.slane %v5612_v29, 9  ;;  %v4501_v34 = vrot.slane %v8209_v59, 5  ;;  %v3961_v11 = vshll.u32 %v8312_v24, 16  ;;  %v3965_v35 = vshrl.u32 %v8312_v24, 16 }
 0x12e   : > { %v5866_v37 = vpop.f32.mrf.mxu1  ;;  %6069 = vmatmul.mubr.msk.bf16.vlgmr.msra.gmra.mxu1 %vm756_vm3, %v7914_v57  ;;  %v8332_v48 = vcombine.low %v3916_v6, %v3926_v22  ;;  %v8334_v18 = vrot.slane %v3934_v39, 4  ;;  %v3945_v32 = vrot.slane %v3944_v9, 4  ;;  %v3949_v38 = vrot.slane %v3947_v27, 5  ;;  %v5557_v22 = vld [vmem:[%s6434_s13 + $0xa8] sm:$0xf] }
 0x12f   : > { %v1144_v45 = vadd.f32 %v5866_v37, %v7810_v5  ;;  %v5901_v2 = vpop.f32.mrf.mxu0  ;;  %6072 = vmatprep.mubr.msk.bf16.mxu1 %vm756_vm3, %v8061_v23  ;;  %v3954_v29 = vrot.slane %v3952_v54, 4  ;;  %v3957_v59 = vrot.slane %v3955_v15, 5  ;;  %v4504_v6 = vrot.slane %v8281_v13, 5  ;;  %v8360_v27 = vld [vmem:[%s6434_s13 + $0xac] sm:$0xf] }
 0x130   : > { %v1135_v57 = vpop.f32.mrf.mxu1  ;;  %v3967_v9 = vrot.slane %v3965_v35, 4  ;;  %v9300_v35 = vld [vmem:[#allocation11_spill] sm:$0xff] }
 0x131   : > { %v8329_v5 = vadd.f32 %v5900_v56, %v1144_v45  ;;  %v1136_v23 = vadd.f32 %v1135_v57, %v7834_v20  ;;  %v1563_v30 = vpop.f32.mrf.mxu0  ;;  %v9297_v45 = vcombine.low %v8002_v63, %v8028_v52  ;;  %v8345_v20 = vsel %vm6764_vm7, %v4496_v62, %v4497_v49  ;;  %v5613_v62 = vld [vmem:[%s6434_s13 + $0x9c] sm:$0xe] }
 0x132   : > { %v5867_v14 = vpop.f32.mrf.mxu1  ;;  %v4503_v63 = vrot.slane %v4501_v34, 4  ;;  %v8357_v52 = vrot.slane %v3961_v11, 5  ;;  %v4508_v49 = vrot.slane %v8312_v24, 5  ;;  %v3985_v24 = vshll.u32 %v8360_v27, 16 }
 0x133   : > { %v8336_v37 = vadd.f32 %v1560_v33, %v1136_v23  ;;  %v1147_v40 = vadd.f32 %v5867_v14, %v7853_v53  ;;  %v5904_v56 = vpop.f32.mrf.mxu0  ;;  %6107 = vmatmul.mubr.msk.bf16.gmra.mxu0 %vm756_vm3, %v9297_v45  ;;  %v9298_v33 = vcombine.low %v8067_v21, %v8071_v1  ;;  %v8355_v53 = vsel %vm6764_vm7, %v5628_v16, %v4501_v34  ;;  %v5556_v1 = vld [vmem:[%s6434_s13 + $0xa4] sm:$0x1]  ;;  %v9299_v16 = vld [vmem:[#allocation14_spill] sm:$0xff] }
 0x134   : > { %v1138_v39 = vpop.f32.mrf.mxu1  ;;  %v3940_v21 = vsel %vm6478_vm4, %v8334_v18, %v8269_v51  ;;  %v3976_v34 = vshrl.u32 %v5557_v22, 16  ;;  %v9301_v51 = vld [vmem:[#allocation19_spill] sm:$0xff]  ;;  %v3989_v18 = vshrl.u32 %v8360_v27, 16 }
 0x135   : > { %6110 = vmatprep.mubr.msk.bf16.mxu0 %vm756_vm3, %v9298_v33  ;;  %v8362_v54 = vadd.f32 %v5901_v2, %v1147_v40  ;;  %v1139_v13 = vadd.f32 %v1138_v39, %v7898_v12  ;;  %v1576_v15 = vpop.f32.mrf.mxu0  ;;  %v3950_v40 = vsel %vm6478_vm4, %v3945_v32, %v3949_v38  ;;  %v3958_v2 = vor.u32 %v3957_v59, %v3954_v29  ;;  %v9302_v59 = vld [vmem:[#allocation15_spill] sm:$0xff] }
 0x136   : > { %v5870_v57 = vpop.f32.mrf.mxu1  ;;  %6073 = vmatmul.mubr.msk.bf16.gmra.mxu1 %vm756_vm3, %v9299_v16  ;;  %v3979_v12 = vshll.u32 %v5557_v22, 16  ;;  %v8385_v39 = vsel %vm6764_vm7, %v4503_v63, %v4504_v6  ;;  %v3968_v32 = vor.u32 %v3967_v9, %v8357_v52  ;;  %v3971_v38 = vshll.u32 %v5556_v1, 16 }
 0x137   : > { %v8376_v11 = vadd.f32 %v1563_v30, %v1139_v13  ;;  %v1160_v23 = vadd.f32 %v5870_v57, %v9300_v35  ;;  %v5905_v14 = vpop.f32.mrf.mxu0  ;;  %6076 = vmatprep.mubr.msk.bf16.mxu1 %vm756_vm3, %v9301_v51  ;;  %v5629_v30 = vrot.slane %v5613_v62, 9  ;;  %v4510_v13 = vrot.slane %v4508_v49, 4 }
 0x138   : > { %v1151_v45 = vpop.f32.mrf.mxu1  ;;  %v4511_v57 = vrot.slane %v5556_v1, 5  ;;  %v8393_v51 = vrot.slane %v3958_v2, 4  ;;  %v3978_v6 = vrot.slane %v3976_v34, 4  ;;  %v3981_v63 = vrot.slane %v3979_v12, 5  ;;  %v8403_v1 = vld [vmem:[%s6434_s13 + $0xb0] sm:$0x1] }
 0x139   : > { %v8388_v29 = vadd.f32 %v5904_v56, %v1160_v23  ;;  %v1152_v22 = vadd.f32 %v1151_v45, %v9302_v59  ;;  %v1579_v33 = vpop.f32.mrf.mxu0  ;;  %v8405_v23 = vrot.slane %v3985_v24, 5  ;;  %v3991_v2 = vrot.slane %v3989_v18, 4  ;;  %v9304_v12 = vld [vmem:[#allocation17_spill] sm:$0xff] }
 0x13a   : > { %v5871_v16 = vpop.f32.mrf.mxu1  ;;  %v8415_v43 = vrot.slane %v3968_v32, 4  ;;  %v8417_v17 = vrot.slane %v3971_v38, 5  ;;  %v8425_v58 = vsel %vm6764_vm7, %v5629_v30, %v4508_v49  ;;  %v8429_v36 = vsel %vm6764_vm7, %v4510_v13, %v4511_v57  ;;  %v8441_v30 = vld [vmem:[%s6434_s13 + $0xb8] sm:$0xf] }
 0x13b   : > { %v8395_v9 = vadd.f32 %v1576_v15, %v1152_v22  ;;  %v1163_v62 = vadd.f32 %v5871_v16, %v9303_v4  ;;  %v5908_v56 = vpop.f32.mrf.mxu0  ;;  %6111 = vmatmul.mubr.msk.bf16.gmra.mxu0 %vm756_vm3, %v5640_v10  ;;  %v8411_v15 = vcombine.low %v3940_v21, %v3950_v40  ;;  %v5614_v10 = vld [vmem:[%s6434_s13 + $0xa8] sm:$0xe]  ;;  %v3982_v32 = vor.u32 %v3981_v63, %v3978_v6  ;;  %v9306_v22 = vld [vmem:[#allocation12_spill] sm:$0xff] }
 0x13c   : > { %v1154_v45 = vpop.f32.mrf.mxu1  ;;  %6114 = vmatprep.mubr.msk.bf16.mxu0 %vm756_vm3, %v5641_v41  ;;  %v5560_v41 = vld [vmem:[%s6434_s13 + $0xb4] sm:$0xf]  ;;  %v9305_v40 = vld [vmem:[#allocation22_spill] sm:$0xff]  ;;  %v3995_v38 = vshll.u32 %v8403_v1, 16  ;;  %v4515_v49 = vrot.slane %v8360_v27, 5  ;;  %v3992_v16 = vor.u32 %v3991_v2, %v8405_v23  ;;  %v3974_v27 = vsel %vm6478_vm4, %v8415_v43, %v8417_v17 }
 0x13d   : > { %v8420_v34 = vadd.f32 %v5905_v14, %v1163_v62  ;;  %v1155_v24 = vadd.f32 %v1154_v45, %v9304_v12  ;;  %v1592_v18 = vpop.f32.mrf.mxu0  ;;  %v5630_v62 = vrot.slane %v5614_v10, 9  ;;  %v4000_v6 = vshrl.u32 %v5560_v41, 16 }
 0x13e   : > { %v5874_v21 = vpop.f32.mrf.mxu1  ;;  %6077 = vmatmul.mubr.msk.bf16.gmra.mxu1 %vm756_vm3, %v9305_v40  ;;  %v4003_v63 = vshll.u32 %v5560_v41, 16  ;;  %v4009_v2 = vshll.u32 %v8441_v30, 16  ;;  %v4013_v10 = vshrl.u32 %v8441_v30, 16  ;;  %v5563_v40 = vld [vmem:[%s6434_s13 + $0xc0] sm:$0xf]  ;;  %v3983_v4 = vrot.slane %v3982_v32, 4 }
 0x13f   : > { %v8443_v59 = vadd.f32 %v1579_v33, %v1155_v24  ;;  %v1176_v13 = vadd.f32 %v5874_v21, %v9306_v22  ;;  %v5909_v57 = vpop.f32.mrf.mxu0  ;;  %6080 = vmatprep.mubr.msk.bf16.mxu1 %vm756_vm3, %v8295_v46  ;;  %v9308_v24 = vld [vmem:[#allocation21_spill] sm:$0xff]  ;;  %v3997_v43 = vrot.slane %v3995_v38, 5  ;;  %v4517_v17 = vrot.slane %v4515_v49, 4 }
 0x140   : > { %v1167_v45 = vpop.f32.mrf.mxu1  ;;  %v4518_v33 = vrot.slane %v8403_v1, 5  ;;  %v8471_v14 = vsel %vm6764_vm7, %v5630_v62, %v4515_v49  ;;  %v8474_v32 = vld [vmem:[%s6434_s13 + $0xc4] sm:$0xf]  ;;  %v9312_v1 = vcombine.low %v8253_v25, %v8257_v50  ;;  %v8486_v62 = vrot.slane %v4009_v2, 5 }
 0x141   : > { %v8455_v12 = vadd.f32 %v5908_v56, %v1176_v13  ;;  %v1168_v21 = vadd.f32 %v1167_v45, %v9308_v24  ;;  %v1595_v46 = vpop.f32.mrf.mxu0  ;;  %v9310_v56 = vld [vmem:[#allocation24_spill] sm:$0xff]  ;;  %v9311_v45 = vcombine.low %v8241_v47, %v8245_v7  ;;  %v3993_v24 = vrot.slane %v3992_v16, 4  ;;  %v9313_v16 = vld [vmem:[#allocation26_spill] sm:$0xff] }
 0x142   : > { %v5875_v22 = vpop.f32.mrf.mxu1  ;;  %v4024_v47 = vshrl.u32 %v5563_v40, 16  ;;  %v4027_v7 = vshll.u32 %v5563_v40, 16  ;;  %v3988_v25 = vsel %vm6478_vm4, %v3983_v4, %v8405_v23  ;;  %v8495_v50 = vsel %vm6764_vm7, %v4517_v17, %v4518_v33  ;;  %v5615_v40 = vld [vmem:[%s6434_s13 + $0xb4] sm:$0xe] }
 0x143   : > { %9307 = vst [vmem:[#allocation14_spill] sm:$0xff] %v8455_v12  ;;  %v8462_v35 = vadd.f32 %v1592_v18, %v1168_v21  ;;  %v1179_v41 = vadd.f32 %v5875_v22, %v9310_v56  ;;  %v5912_v13 = vpop.f32.mrf.mxu0  ;;  %6115 = vmatmul.mubr.msk.bf16.gmra.mxu0 %vm756_vm3, %v9311_v45  ;;  %v8481_v18 = vld [vmem:[%s6434_s13 + $0xbc] sm:$0x1]  ;;  %v4002_v21 = vrot.slane %v4000_v6, 4  ;;  %v4005_v22 = vrot.slane %v4003_v63, 5 }
 0x144   : > { %v1170_v38 = vpop.f32.mrf.mxu1  ;;  %6118 = vmatprep.mubr.msk.bf16.mxu0 %vm756_vm3, %v9312_v1  ;;  %v4037_v6 = vshrl.u32 %v8474_v32, 16  ;;  %v4019_v23 = vshll.u32 %v8481_v18, 16  ;;  %v4522_v17 = vrot.slane %v8441_v30, 5  ;;  %v9314_v1 = vld [vmem:[#allocation28_spill] sm:$0xff] }
 0x145   : > { %9309 = vst [vmem:[#allocation11_spill] sm:$0xff] %v8462_v35  ;;  %v8483_v56 = vadd.f32 %v5909_v57, %v1179_v41  ;;  %v1171_v45 = vadd.f32 %v1170_v38, %v9313_v16  ;;  %v1608_v49 = vpop.f32.mrf.mxu0  ;;  %v4015_v35 = vrot.slane %v4013_v10, 4  ;;  %v4033_v57 = vshll.u32 %v8474_v32, 16 }
 0x146   : > { %v5878_v12 = vpop.f32.mrf.mxu1  ;;  %6081 = vmatmul.mubr.msk.bf16.gmra.mxu1 %vm756_vm3, %v8297_v61  ;;  %v3998_v61 = vsel %vm6478_vm4, %v3993_v24, %v3997_v43  ;;  %v4006_v33 = vor.u32 %v4005_v22, %v4002_v21  ;;  %v4026_v41 = vrot.slane %v4024_v47, 4  ;;  %v4029_v38 = vrot.slane %v4027_v7, 5 }
 0x147   : > { %v8499_v63 = vadd.f32 %v1595_v46, %v1171_v45  ;;  %v1192_v2 = vadd.f32 %v5878_v12, %v8205_v28  ;;  %v5913_v10 = vpop.f32.mrf.mxu0  ;;  %6084 = vmatprep.mubr.msk.bf16.mxu1 %vm756_vm3, %v8303_v60  ;;  %v9315_v60 = vsel %vm6478_vm4, %v8393_v51, %v8357_v52  ;;  %v4016_v24 = vor.u32 %v4015_v35, %v8486_v62 }
 0x148   : > { %v1183_v4 = vpop.f32.mrf.mxu1  ;;  %v8517_v43 = vcombine.low %v9315_v60, %v3974_v27  ;;  %v8520_v30 = vcombine.low %v3988_v25, %v3998_v61  ;;  %v8524_v22 = vrot.slane %v4033_v57, 5  ;;  %v4039_v47 = vrot.slane %v4037_v6, 4  ;;  %v5565_v27 = vld [vmem:[%s6434_s13 + $0xc8] sm:$0x1] }
 0x149   : > { %v8509_v46 = vadd.f32 %v5912_v13, %v1192_v2  ;;  %v1184_v28 = vadd.f32 %v1183_v4, %v9314_v1  ;;  %v1611_v12 = vpop.f32.mrf.mxu0  ;;  %v5647_v13 = vcombine.low %v8471_v14, %v8495_v50  ;;  %v9316_v52 = vcombine.low %v8323_v3, %v8345_v20  ;;  %v5566_v14 = vld [vmem:[%s6434_s13 + $0xcc] sm:$0xf]  ;;  %v8545_v20 = vld [vmem:[%s6434_s13 + $0xd0] sm:$0xf]  ;;  %v5616_v4 = vld [vmem:[%s6434_s13 + $0xc0] sm:$0xe] }
 0x14a   : > { %v5879_v21 = vpop.f32.mrf.mxu1  ;;  %v8533_v35 = vrot.slane %v4019_v23, 5  ;;  %v5631_v51 = vrot.slane %v5615_v40, 9  ;;  %v9317_v50 = vcombine.low %v8355_v53, %v8385_v39  ;;  %v4525_v57 = vrot.slane %v8481_v18, 5 }
 0x14b   : > { %v8526_v7 = vadd.f32 %v1608_v49, %v1184_v28  ;;  %v1195_v16 = vadd.f32 %v5879_v21, %v8228_v19  ;;  %v5916_v45 = vpop.f32.mrf.mxu0  ;;  %6119 = vmatmul.mubr.msk.bf16.gmra.mxu0 %vm756_vm3, %v9316_v52  ;;  %v8541_v49 = vrot.slane %v4006_v33, 4  ;;  %v4524_v19 = vrot.slane %v4522_v17, 4 }
 0x14c   : > { %v1186_v25 = vpop.f32.mrf.mxu1  ;;  %6122 = vmatprep.mubr.msk.bf16.mxu0 %vm756_vm3, %v9317_v50  ;;  %v4030_v3 = vor.u32 %v4029_v38, %v4026_v41  ;;  %v8550_v23 = vrot.slane %v4016_v24, 4  ;;  %v4529_v53 = vrot.slane %v8474_v32, 5  ;;  %v4040_v33 = vor.u32 %v4039_v47, %v8524_v22 }
 0x14d   : > { %v8547_v6 = vadd.f32 %v5913_v10, %v1195_v16  ;;  %v1187_v2 = vadd.f32 %v1186_v25, %v8260_v26  ;;  %v1624_v61 = vpop.f32.mrf.mxu0  ;;  %v4043_v18 = vshll.u32 %v5565_v27, 16  ;;  %v4048_v40 = vshrl.u32 %v5566_v14, 16  ;;  %v9320_v10 = vld [vmem:[#allocation7_spill] sm:$0xff]  ;;  %v9321_v16 = vld [vmem:[#allocation6_spill] sm:$0xff] }
 0x14e   : > { %v5882_v39 = vpop.f32.mrf.mxu1  ;;  %6085 = vmatmul.mubr.msk.bf16.gmra.mxu1 %vm756_vm3, %v8332_v48  ;;  %v4051_v41 = vshll.u32 %v5566_v14, 16  ;;  %v4057_v28 = vshll.u32 %v8545_v20, 16  ;;  %v4061_v32 = vshrl.u32 %v8545_v20, 16  ;;  %v4523_v48 = vsel %vm6764_vm7, %v5631_v51, %v4522_v17  ;;  %v9322_v17 = vld [vmem:[#allocation9_spill] sm:$0xff] }
 0x14f   : > { %9318 = vst [vmem:[#allocation19_spill] sm:$0xff] %v8547_v6  ;;  %v8557_v38 = vadd.f32 %v1611_v12, %v1187_v2  ;;  %v1208_v1 = vadd.f32 %v5882_v39, %v9320_v10  ;;  %v5917_v26 = vpop.f32.mrf.mxu0  ;;  %6088 = vmatprep.mubr.msk.bf16.mxu1 %vm756_vm3, %v8411_v15  ;;  %v4526_v24 = vsel %vm6764_vm7, %v4524_v19, %v4525_v57  ;;  %v4031_v21 = vrot.slane %v4030_v3, 4 }
 0x150   : > { %v1199_v60 = vpop.f32.mrf.mxu1  ;;  %v5632_v12 = vrot.slane %v5616_v4, 9  ;;  %v4531_v25 = vrot.slane %v4529_v53, 4  ;;  %v4532_v15 = vrot.slane %v5565_v27, 5  ;;  %v4041_v2 = vrot.slane %v4040_v33, 4  ;;  %v5568_v33 = vld [vmem:[%s6434_s13 + $0xd4] sm:$0x1] }
 0x151   : > { %9319 = vst [vmem:[#allocation15_spill] sm:$0xff] %v8557_v38  ;;  %v8568_v47 = vadd.f32 %v5916_v45, %v1208_v1  ;;  %v1200_v52 = vadd.f32 %v1199_v60, %v9321_v16  ;;  %v1627_v14 = vpop.f32.mrf.mxu0  ;;  %v4045_v39 = vrot.slane %v4043_v18, 5  ;;  %v4050_v10 = vrot.slane %v4048_v40, 4  ;;  %v9324_v18 = vld [vmem:[#allocation8_spill] sm:$0xff] }
 0x152   : > { %v5883_v50 = vpop.f32.mrf.mxu1  ;;  %v4053_v38 = vrot.slane %v4051_v41, 5  ;;  %v9323_v45 = vcombine.low %v8425_v58, %v8429_v36  ;;  %v8578_v57 = vrot.slane %v4057_v28, 5  ;;  %v4063_v27 = vrot.slane %v4061_v32, 4 }
 0x153   : > { %v8571_v6 = vadd.f32 %v1624_v61, %v1200_v52  ;;  %v1211_v51 = vadd.f32 %v5883_v50, %v9322_v17  ;;  %v5920_v19 = vpop.f32.mrf.mxu0  ;;  %v4012_v61 = vsel %vm6478_vm4, %v8541_v49, %v8486_v62  ;;  %v4022_v4 = vsel %vm6478_vm4, %v8550_v23, %v8533_v35  ;;  %v5617_v62 = vld [vmem:[%s6434_s13 + $0xcc] sm:$0xe] }
 0x154   : > { %6123 = vmatmul.mubr.msk.bf16.gmra.mxu0 %vm756_vm3, %v9323_v45  ;;  %v1202_v3 = vpop.f32.mrf.mxu1  ;;  %v4536_v58 = vrot.slane %v8545_v20, 5  ;;  %v4533_v1 = vsel %vm6764_vm7, %v4531_v25, %v4532_v15  ;;  %v5648_v35 = vcombine.low %v4523_v48, %v4526_v24  ;;  %v4036_v20 = vsel %vm6478_vm4, %v4031_v21, %v8524_v22  ;;  %v9326_v25 = vld [vmem:[#allocation13_spill] sm:$0xff] }
 0x155   : > { %6126 = vmatprep.mubr.msk.bf16.mxu0 %vm756_vm3, %v5647_v13  ;;  %v8591_v36 = vadd.f32 %v5917_v26, %v1211_v51  ;;  %v1203_v40 = vadd.f32 %v1202_v3, %v9324_v18  ;;  %v1640_v41 = vpop.f32.mrf.mxu0  ;;  %v4530_v13 = vsel %vm6764_vm7, %v5632_v12, %v4529_v53  ;;  %v4046_v23 = vsel %vm6478_vm4, %v4041_v2, %v4045_v39  ;;  %v9325_v53 = vld [vmem:[#allocation10_spill] sm:$0xff] }
 0x156   : > { %v5886_v49 = vpop.f32.mrf.mxu1  ;;  %6089 = vmatmul.mubr.msk.bf16.gmra.mxu1 %vm756_vm3, %v8517_v43  ;;  %v4054_v26 = vor.u32 %v4053_v38, %v4050_v10  ;;  %v4064_v12 = vor.u32 %v4063_v27, %v8578_v57  ;;  %v4067_v43 = vshll.u32 %v5568_v33, 16  ;;  %v5649_v24 = vcombine.low %v4530_v13, %v4533_v1 }
 0x157   : > { %v8606_v28 = vadd.f32 %v1627_v14, %v1203_v40  ;;  %v1224_v32 = vadd.f32 %v5886_v49, %v9325_v53  ;;  %v5921_v60 = vpop.f32.mrf.mxu0  ;;  %6092 = vmatprep.mubr.msk.bf16.mxu1 %vm756_vm3, %v8520_v30  ;;  %v5633_v16 = vrot.slane %v5617_v62, 9  ;;  %v4538_v52 = vrot.slane %v4536_v58, 4  ;;  %v9327_v30 = vld [vmem:[#allocation16_spill] sm:$0xff] }
 0x158   : > { %v1215_v48 = vpop.f32.mrf.mxu1  ;;  %v4539_v22 = vrot.slane %v5568_v33, 5  ;;  %v5583_v50 = vcombine.low %v4012_v61, %v4022_v4  ;;  %v5584_v2 = vcombine.low %v4036_v20, %v4046_v23  ;;  %v4055_v39 = vrot.slane %v4054_v26, 4  ;;  %v9328_v33 = vld [vmem:[#allocation18_spill] sm:$0xff]  ;;  %v9329_v62 = vld [vmem:[#allocation20_spill] sm:$0xff]  ;;  %v9330_v26 = vld [vmem:[#allocation23_spill] sm:$0xff] }
 0x159   : > { %v8612_v21 = vadd.f32 %v5920_v19, %v1224_v32  ;;  %v1216_v38 = vadd.f32 %v1215_v48, %v9326_v25  ;;  %v1643_v14 = vpop.f32.mrf.mxu0  ;;  %v4065_v45 = vrot.slane %v4064_v12, 4  ;;  %v4069_v27 = vrot.slane %v4067_v43, 5  ;;  %v9331_v43 = vld [vmem:[#allocation25_spill] sm:$0xff] }
 0x15a   : > { %v5887_v15 = vpop.f32.mrf.mxu1  ;;  %v4537_v19 = vsel %vm6764_vm7, %v5633_v16, %v4536_v58  ;;  %v4540_v61 = vsel %vm6764_vm7, %v4538_v52, %v4539_v22  ;;  %v4060_v13 = vsel %vm6478_vm4, %v4055_v39, %v8578_v57 }
 0x15b   : > { %v8615_v10 = vadd.f32 %v1640_v41, %v1216_v38  ;;  %v1227_v17 = vadd.f32 %v5887_v15, %v9327_v30  ;;  %v5924_v51 = vpop.f32.mrf.mxu0  ;;  %v4070_v0 = vsel %vm6478_vm4, %v4065_v45, %v4069_v27 }
 0x15c   : > { %6127 = vmatmul.mubr.msk.bf16.gmra.mxu0 %vm756_vm3, %v5648_v35  ;;  %v1218_v3 = vpop.f32.mrf.mxu1  ;;  %v5650_v35 = vcombine.low %v4537_v19, %v4540_v61  ;;  %v5585_v12 = vcombine.low %v4060_v13, %v4070_v0 }
 0x15d   : > { %6130 = vmatprep.mubr.msk.bf16.mxu0 %vm756_vm3, %v5649_v24  ;;  %v8624_v4 = vadd.f32 %v5921_v60, %v1227_v17  ;;  %v1219_v18 = vadd.f32 %v1218_v3, %v9328_v33  ;;  %v1656_v40 = vpop.f32.mrf.mxu0 }
 0x15e   : > { %v5890_v41 = vpop.f32.mrf.mxu1  ;;  %6093 = vmatmul.mubr.msk.bf16.gmra.mxu1 %vm756_vm3, %v5583_v50 }
 0x15f   : > { %v8631_v1 = vadd.f32 %v1643_v14, %v1219_v18  ;;  %v1240_v49 = vadd.f32 %v5890_v41, %v9329_v62  ;;  %v5925_v58 = vpop.f32.mrf.mxu0  ;;  %6096 = vmatprep.mubr.msk.bf16.mxu1 %vm756_vm3, %v5584_v2 }
 0x160   : > { %v1231_v20 = vpop.f32.mrf.mxu1 }
 0x161   : > { %v8637_v23 = vadd.f32 %v5924_v51, %v1240_v49  ;;  %v1232_v53 = vadd.f32 %v1231_v20, %v9330_v26  ;;  %v1659_v32 = vpop.f32.mrf.mxu0 }
 0x162   : > { %v5891_v60 = vpop.f32.mrf.mxu1 }
 0x163   : > { %v8640_v57 = vadd.f32 %v1656_v40, %v1232_v53  ;;  %v1243_v48 = vadd.f32 %v5891_v60, %v9331_v43  ;;  %v5928_v24 = vpop.f32.mrf.mxu0 }
 0x164   : > { %6131 = vmatmul.mubr.msk.bf16.gmra.mxu0 %vm756_vm3, %v5650_v35  ;;  %v1234_v16 = vpop.f32.mrf.mxu1 }
 0x165   : > { %v8644_v52 = vadd.f32 %v5925_v58, %v1243_v48  ;;  %v1235_v22 = vadd.f32 %v1234_v16, %v9332_v31  ;;  %v1672_v25 = vpop.f32.mrf.mxu0 }
 0x166   : > { %v5894_v38 = vpop.f32.mrf.mxu1  ;;  %6097 = vmatmul.mubr.msk.bf16.gmra.mxu1 %vm756_vm3, %v5585_v12 }
 0x167   : > { %v8648_v14 = vadd.f32 %v1659_v32, %v1235_v22  ;;  %v1256_v15 = vadd.f32 %v5894_v38, %v8220_v42  ;;  %v5929_v50 = vpop.f32.mrf.mxu0 }
 0x168   : > { %v1247_v2 = vpop.f32.mrf.mxu1 }
 0x169   : > { %v8651_v39 = vadd.f32 %v5928_v24, %v1256_v15  ;;  %v1248_v30 = vadd.f32 %v1247_v2, %v8247_v44  ;;  %v1675_v17 = vpop.f32.mrf.mxu0 }
 0x16a   : > { %v5895_v51 = vpop.f32.mrf.mxu1 }
 0x16b   : > { %v8654_v45 = vadd.f32 %v1672_v25, %v1248_v30  ;;  %v1259_v27 = vadd.f32 %v5895_v51, %v8262_v8  ;;  %v5968_v3 = vpop.f32.mrf.mxu0  ;;  %v9333_v30 = vld [vmem:[#allocation14_spill] sm:$0xff] }
 0x16c   : > { %v1250_v19 = vpop.f32.mrf.mxu1 }
 0x16d   : > { %v8657_v61 = vadd.f32 %v5929_v50, %v1259_v27  ;;  %v1251_v33 = vadd.f32 %v1250_v19, %v8284_v55  ;;  %v2648_v18 = vpop.f32.mrf.mxu0 }
 0x16e   : > { %v5934_v42 = vpop.f32.mrf.mxu1 }
 0x16f   : > { %v8660_v40 = vadd.f32 %v1675_v17, %v1251_v33  ;;  %v2051_v41 = vadd.f32 %v5934_v42, %v8329_v5  ;;  %v5969_v13 = vpop.f32.mrf.mxu0 }
 0x170   : > { %v1922_v44 = vpop.f32.mrf.mxu1 }
 0x171   : > { %v8663_v62 = vadd.f32 %v5968_v3, %v2051_v41  ;;  %v2049_v49 = vadd.f32 %v1922_v44, %v8336_v37  ;;  %v2651_v58 = vpop.f32.mrf.mxu0  ;;  %v9334_v3 = vld [vmem:[#allocation11_spill] sm:$0xff] }
 0x172   : > { %v5935_v8 = vpop.f32.mrf.mxu1 }
 0x173   : > { %v8666_v0 = vadd.f32 %v2648_v18, %v2049_v49  ;;  %v2052_v35 = vadd.f32 %v5935_v8, %v8362_v54  ;;  %v5972_v20 = vpop.f32.mrf.mxu0 }
 0x174   : > { %v1925_v55 = vpop.f32.mrf.mxu1 }
 0x175   : > { %v8669_v26 = vadd.f32 %v5969_v13, %v2052_v35  ;;  %v2050_v53 = vadd.f32 %v1925_v55, %v8376_v11  ;;  %v2664_v32 = vpop.f32.mrf.mxu0 }
 0x176   : > { %v5938_v5 = vpop.f32.mrf.mxu1 }
 0x177   : > { %v8672_v60 = vadd.f32 %v2651_v58, %v2050_v53  ;;  %v2055_v12 = vadd.f32 %v5938_v5, %v8388_v29  ;;  %v5973_v43 = vpop.f32.mrf.mxu0 }
 0x178   : > { %v1938_v37 = vpop.f32.mrf.mxu1 }
 0x179   : > { %v8675_v48 = vadd.f32 %v5972_v20, %v2055_v12  ;;  %v2053_v24 = vadd.f32 %v1938_v37, %v8395_v9  ;;  %v2667_v16 = vpop.f32.mrf.mxu0 }
 0x17a   : > { %v5939_v54 = vpop.f32.mrf.mxu1 }
 0x17b   : > { %v8678_v31 = vadd.f32 %v2664_v32, %v2053_v24  ;;  %v2056_v22 = vadd.f32 %v5939_v54, %v8420_v34  ;;  %v5976_v25 = vpop.f32.mrf.mxu0  ;;  %v9336_v54 = vld [vmem:[#allocation15_spill] sm:$0xff] }
 0x17c   : > { %v1941_v11 = vpop.f32.mrf.mxu1 }
 0x17d   : > { %v8681_v38 = vadd.f32 %v5973_v43, %v2056_v22  ;;  %v2054_v15 = vadd.f32 %v1941_v11, %v8443_v59  ;;  %v2680_v50 = vpop.f32.mrf.mxu0  ;;  %v9335_v43 = vld [vmem:[#allocation19_spill] sm:$0xff] }
 0x17e   : > { %v5942_v29 = vpop.f32.mrf.mxu1 }
 0x17f   : > { %v8684_v2 = vadd.f32 %v2667_v16, %v2054_v15  ;;  %v2059_v17 = vadd.f32 %v5942_v29, %v9333_v30  ;;  %v5977_v51 = vpop.f32.mrf.mxu0 }
 0x180   : > { %v1954_v9 = vpop.f32.mrf.mxu1 }
 0x181   : > { %v8687_v27 = vadd.f32 %v5976_v25, %v2059_v17  ;;  %v2057_v19 = vadd.f32 %v1954_v9, %v9334_v3  ;;  %v2683_v33 = vpop.f32.mrf.mxu0 }
 0x182   : > { %v5943_v34 = vpop.f32.mrf.mxu1 }
 0x183   : > { %v8690_v18 = vadd.f32 %v2680_v50, %v2057_v19  ;;  %v2060_v42 = vadd.f32 %v5943_v34, %v8483_v56  ;;  %v5980_v41 = vpop.f32.mrf.mxu0 }
 0x184   : > { %v1957_v59 = vpop.f32.mrf.mxu1 }
 0x185   : > { %v8693_v13 = vadd.f32 %v5977_v51, %v2060_v42  ;;  %v2058_v44 = vadd.f32 %v1957_v59, %v8499_v63  ;;  %v2696_v49 = vpop.f32.mrf.mxu0 }
 0x186   : > { %v5946_v58 = vpop.f32.mrf.mxu1 }
 0x187   : > { %v8696_v8 = vadd.f32 %v2683_v33, %v2058_v44  ;;  %v2063_v35 = vadd.f32 %v5946_v58, %v8509_v46  ;;  %v5981_v20 = vpop.f32.mrf.mxu0 }
 0x188   : > { %v1970_v55 = vpop.f32.mrf.mxu1 }
 0x189   : > { %v8699_v53 = vadd.f32 %v5980_v41, %v2063_v35  ;;  %v2061_v32 = vadd.f32 %v1970_v55, %v8526_v7  ;;  %v2699_v5 = vpop.f32.mrf.mxu0 }
 0x18a   : > { %v5947_v56 = vpop.f32.mrf.mxu1 }
 0x18b   : > { %v8702_v12 = vadd.f32 %v2696_v49, %v2061_v32  ;;  %v2064_v37 = vadd.f32 %v5947_v56, %v9335_v43  ;;  %v5984_v24 = vpop.f32.mrf.mxu0 }
 0x18c   : > { %v1973_v63 = vpop.f32.mrf.mxu1 }
 0x18d   : > { %v8705_v16 = vadd.f32 %v5981_v20, %v2064_v37  ;;  %v2062_v22 = vadd.f32 %v1973_v63, %v9336_v54  ;;  %v2712_v25 = vpop.f32.mrf.mxu0 }
 0x18e   : > { %v5950_v46 = vpop.f32.mrf.mxu1 }
 0x18f   : > { %v8708_v11 = vadd.f32 %v2699_v5, %v2062_v22  ;;  %v2067_v15 = vadd.f32 %v5950_v46, %v8568_v47  ;;  %v5985_v50 = vpop.f32.mrf.mxu0 }
 0x190   : > { %v1986_v7 = vpop.f32.mrf.mxu1 }
 0x191   : > { %v8711_v29 = vadd.f32 %v5984_v24, %v2067_v15  ;;  %v2065_v30 = vadd.f32 %v1986_v7, %v8571_v6  ;;  %v2715_v17 = vpop.f32.mrf.mxu0 }
 0x192   : > { %v5951_v51 = vpop.f32.mrf.mxu1 }
 0x193   : > { %v8714_v9 = vadd.f32 %v2712_v25, %v2065_v30  ;;  %v2068_v3 = vadd.f32 %v5951_v51, %v8591_v36  ;;  %v5988_v19 = vpop.f32.mrf.mxu0 }
 0x194   : > { %v1989_v33 = vpop.f32.mrf.mxu1 }
 0x195   : > { %v8717_v34 = vadd.f32 %v5985_v50, %v2068_v3  ;;  %v2066_v42 = vadd.f32 %v1989_v33, %v8606_v28  ;;  %v2728_v41 = vpop.f32.mrf.mxu0 }
 0x196   : > { %v5954_v47 = vpop.f32.mrf.mxu1 }
 0x197   : > { %9337 = vst [vmem:[#allocation5_spill] sm:$0xff] %v8717_v34  ;;  %v8720_v59 = vadd.f32 %v2715_v17, %v2066_v42  ;;  %v2071_v44 = vadd.f32 %v5954_v47, %v8612_v21  ;;  %v5989_v49 = vpop.f32.mrf.mxu0 }
 0x198   : > { %v2002_v6 = vpop.f32.mrf.mxu1 }
 0x199   : > { %9338 = vst [vmem:[#allocation17_spill] sm:$0xff] %v8720_v59  ;;  %v8723_v58 = vadd.f32 %v5988_v19, %v2071_v44  ;;  %v2069_v35 = vadd.f32 %v2002_v6, %v8615_v10  ;;  %v2731_v20 = vpop.f32.mrf.mxu0 }
 0x19a   : > { %v5955_v36 = vpop.f32.mrf.mxu1 }
 0x19b   : > { %9339 = vst [vmem:[#allocation22_spill] sm:$0xff] %v8723_v58  ;;  %v8726_v55 = vadd.f32 %v2728_v41, %v2069_v35  ;;  %v2072_v32 = vadd.f32 %v5955_v36, %v8624_v4  ;;  %v5992_v5 = vpop.f32.mrf.mxu0 }
 0x19c   : > { %v2005_v28 = vpop.f32.mrf.mxu1 }
 0x19d   : > { %9340 = vst [vmem:[#allocation12_spill] sm:$0xff] %v8726_v55  ;;  %v8729_v56 = vadd.f32 %v5989_v49, %v2072_v32  ;;  %v2070_v43 = vadd.f32 %v2005_v28, %v8631_v1  ;;  %v2744_v37 = vpop.f32.mrf.mxu0 }
 0x19e   : > { %v5958_v21 = vpop.f32.mrf.mxu1 }
 0x19f   : > { %9341 = vst [vmem:[#allocation21_spill] sm:$0xff] %v8729_v56  ;;  %v8732_v24 = vadd.f32 %v2731_v20, %v2070_v43  ;;  %v2075_v63 = vadd.f32 %v5958_v21, %v8637_v23  ;;  %v5993_v54 = vpop.f32.mrf.mxu0 }
 0x1a0   : > { %v2018_v10 = vpop.f32.mrf.mxu1 }
 0x1a1   : > { %9342 = vst [vmem:[#allocation24_spill] sm:$0xff] %v8732_v24  ;;  %v8735_v22 = vadd.f32 %v5992_v5, %v2075_v63  ;;  %v2073_v25 = vadd.f32 %v2018_v10, %v8640_v57  ;;  %v2747_v46 = vpop.f32.mrf.mxu0 }
 0x1a2   : > { %v5959_v4 = vpop.f32.mrf.mxu1 }
 0x1a3   : > { %9343 = vst [vmem:[#allocation26_spill] sm:$0xff] %v8735_v22  ;;  %v8738_v15 = vadd.f32 %v2744_v37, %v2073_v25  ;;  %v2076_v50 = vadd.f32 %v5959_v4, %v8644_v52  ;;  %v5996_v7 = vpop.f32.mrf.mxu0 }
 0x1a4   : > { %v2021_v1 = vpop.f32.mrf.mxu1 }
 0x1a5   : > { %9344 = vst [vmem:[#allocation28_spill] sm:$0xff] %v8738_v15  ;;  %v8741_v30 = vadd.f32 %v5993_v54, %v2076_v50  ;;  %v2074_v17 = vadd.f32 %v2021_v1, %v8648_v14  ;;  %v2760_v51 = vpop.f32.mrf.mxu0 }
 0x1a6   : > { %v5962_v23 = vpop.f32.mrf.mxu1 }
 0x1a7   : > { %9345 = vst [vmem:[#allocation7_spill] sm:$0xff] %v8741_v30  ;;  %v8744_v3 = vadd.f32 %v2747_v46, %v2074_v17  ;;  %v2079_v19 = vadd.f32 %v5962_v23, %v8651_v39  ;;  %v5997_v33 = vpop.f32.mrf.mxu0 }
 0x1a8   : > { %v2034_v57 = vpop.f32.mrf.mxu1 }
 0x1a9   : > { %9346 = vst [vmem:[#allocation6_spill] sm:$0xff] %v8744_v3  ;;  %v8747_v42 = vadd.f32 %v5996_v7, %v2079_v19  ;;  %v2077_v41 = vadd.f32 %v2034_v57, %v8654_v45  ;;  %v2763_v47 = vpop.f32.mrf.mxu0 }
 0x1aa   : > { %v5963_v52 = vpop.f32.mrf.mxu1 }
 0x1ab   : > { %9347 = vst [vmem:[#allocation9_spill] sm:$0xff] %v8747_v42  ;;  %v8750_v44 = vadd.f32 %v2760_v51, %v2077_v41  ;;  %v2080_v49 = vadd.f32 %v5963_v52, %v8657_v61  ;;  %v8753_v6 = vpop.f32.mrf.mxu0 }
 0x1ac   : > { %v2037_v14 = vpop.f32.mrf.mxu1 }
 0x1ad   : > { %9348 = vst [vmem:[#allocation8_spill] sm:$0xff] %v8750_v44  ;;  %v8755_v35 = vadd.f32 %v5997_v33, %v2080_v49  ;;  %v2078_v20 = vadd.f32 %v2037_v14, %v8660_v40  ;;  %v8758_v39 = vpop.f32.mrf.mxu0 }
 0x1ae   : > { %v6002_v36 = vpop.f32.mrf.mxu1 }
 0x1af   : > { %9349 = vst [vmem:[#allocation10_spill] sm:$0xff] %v8755_v35  ;;  %v8760_v32 = vadd.f32 %v2763_v47, %v2078_v20  ;;  %v8762_v5 = vpop.f32.mrf.mxu0 }
 0x1b0   : > { %v3118_v45 = vpop.f32.mrf.mxu1 }
 0x1b1   : > { %9350 = vst [vmem:[#allocation13_spill] sm:$0xff] %v8760_v32  ;;  %v8764_v28 = vpop.f32.mrf.mxu0 }
 0x1b2   : > { %v6003_v43 = vpop.f32.mrf.mxu1 }
 0x1b3   : > { %v8766_v37 = vpop.f32.mrf.mxu0 }
 0x1b4   : > { %v8768_v61 = vpop.f32.mrf.mxu1 }
 0x1b5   : > { %v8770_v21 = vpop.f32.mrf.mxu0 }
 0x1b6   : > { %v8772_v63 = vpop.f32.mrf.mxu1 }
 0x1b7   : > { %v8774_v40 = vpop.f32.mrf.mxu0 }
 0x1b8   : > { %v8776_v54 = vpop.f32.mrf.mxu1 }
 0x1b9   : > { %v8778_v10 = vpop.f32.mrf.mxu0 }
 0x1ba   : > { %v8780_v25 = vpop.f32.mrf.mxu1 }
 0x1bb   : > { %v8782_v46 = vpop.f32.mrf.mxu0 }
 0x1bc   : > { %v8784_v4 = vpop.f32.mrf.mxu1 }
 0x1bd   : > { %v8786_v50 = vpop.f32.mrf.mxu0 }
 0x1be   : > { %v8788_v7 = vpop.f32.mrf.mxu1 }
 0x1bf   : > { %v8790_v1 = vpop.f32.mrf.mxu0 }
 0x1c0   : > { %v8792_v17 = vpop.f32.mrf.mxu1 }
 0x1c1   : > { %v8794_v51 = vpop.f32.mrf.mxu0 }
 0x1c2   : > { %v8796_v23 = vpop.f32.mrf.mxu1 }
 0x1c3   : > { %v8798_v19 = vpop.f32.mrf.mxu0 }
 0x1c4   : > { %v8800_v33 = vpop.f32.mrf.mxu1 }
 0x1c5   : > { %v8802_v57 = vpop.f32.mrf.mxu0 }
 0x1c6   : > { %v8804_v41 = vpop.f32.mrf.mxu1 }
 0x1c7   : > { %v8806_v47 = vpop.f32.mrf.mxu0 }
 0x1c8   : > { %v8808_v52 = vpop.f32.mrf.mxu1 }
 0x1c9   : > { %v8810_v49 = vpop.f32.mrf.mxu0 }
 0x1ca   : > { %v8812_v14 = vpop.f32.mrf.mxu1 }
 0x1cb   : > { %v8814_v20 = vpop.f32.mrf.mxu0 }
 0x1cc   : > { %9351 = vst [vmem:[#allocation16_spill] sm:$0xff] %v8814_v20  ;;  %v8816_v32 = vpop.f32.mrf.mxu1 }
 0x1cd   : > { %v8818_v35 = vpop.f32.mrf.mxu0 }
 0x1ce   : > { %9352 = vst [vmem:[#allocation18_spill] sm:$0xff] %v8818_v35  ;;  %v8820_v44 = vpop.f32.mrf.mxu1 }
 0x1cf   : > { %v8822_v42 = vpop.f32.mrf.mxu0 }
 0x1d0   : > { %9353 = vst [vmem:[#allocation20_spill] sm:$0xff] %v8822_v42  ;;  %v8824_v3 = vpop.f32.mrf.mxu1 }
 0x1d1   : > { %v8826_v30 = vpop.f32.mrf.mxu0 }
 0x1d2   : > { %9354 = vst [vmem:[#allocation23_spill] sm:$0xff] %v8826_v30  ;;  %v8828_v15 = vpop.f32.mrf.mxu1 }
 0x1d3   : > { %9355 = vst [vmem:[#allocation25_spill] sm:$0xff] %v8828_v15  ;;  %v8830_v22 = vpop.f32.mrf.mxu0 }
 0x1d4   : > { %9356 = vst [vmem:[#allocation27_spill] sm:$0xff] %v8830_v22  ;;  %v8832_v24 = vpop.f32.mrf.mxu1 }
 0x1d5   : > { %9357 = vst [vmem:[#allocation14_spill] sm:$0xff] %v8832_v24  ;;  %v8834_v56 = vpop.f32.mrf.mxu0 }
 0x1d6   : > { %9358 = vst [vmem:[#allocation11_spill] sm:$0xff] %v8834_v56  ;;  %v8836_v55 = vpop.f32.mrf.mxu1 }
 0x1d7   : > { %9359 = vst [vmem:[#allocation19_spill] sm:$0xff] %v8836_v55  ;;  %v8838_v58 = vpop.f32.mrf.mxu0 }
 0x1d8   : > { %9360 = vst [vmem:[#allocation15_spill] sm:$0xff] %v8838_v58  ;;  %v8840_v59 = vpop.f32.mrf.mxu1 }
 0x1d9   : > { %9361 = vst [vmem:[#allocation29_spill] sm:$0xff] %v8840_v59  ;;  %v8842_v35 = vpop.f32.mrf.mxu0 }
 0x1da   : > { %9362 = vst [vmem:[#allocation30_spill] sm:$0xff] %v8842_v35  ;;  %v8844_v42 = vpop.f32.mrf.mxu1 }
 0x1db   : > { %9363 = vst [vmem:[#allocation31_spill] sm:$0xff] %v8844_v42  ;;  %v8846_v34 = vpop.f32.mrf.mxu0 }
 0x1dc   : > { %9364 = vst [vmem:[#allocation32_spill] sm:$0xff] %v8846_v34  ;;  %v8848_v30 = vpop.f32.mrf.mxu1 }
 0x1dd   : > { %9365 = vst [vmem:[#allocation33_spill] sm:$0xff] %v8848_v30  ;;  %v8850_v15 = vpop.f32.mrf.mxu0 }
 0x1de   : > { %9366 = vst [vmem:[#allocation34_spill] sm:$0xff] %v8850_v15  ;;  %v8852_v22 = vpop.f32.mrf.mxu1 }
 0x1df   : > { %9367 = vst [vmem:[#allocation35_spill] sm:$0xff] %v8852_v22  ;;  %v8854_v24 = vpop.f32.mrf.mxu0 }
 0x1e0   : > { %9368 = vst [vmem:[#allocation36_spill] sm:$0xff] %v8854_v24  ;;  %v8856_v56 = vpop.f32.mrf.mxu1  ;;  %v3247_v24 = vadd.f32 %v6002_v36, %v8663_v62  ;;  %v3246_v62 = vadd.f32 %v8768_v61, %v8672_v60  ;;  %v3249_v60 = vadd.f32 %v8776_v54, %v8678_v31 }
 0x1e1   : > { %9369 = vst [vmem:[#allocation37_spill] sm:$0xff] %v8856_v56  ;;  %v8858_v55 = vpop.f32.mrf.mxu0 }
 0x1e2   : > { %9370 = vst [vmem:[#allocation38_spill] sm:$0xff] %v8858_v55  ;;  %v8860_v58 = vpop.f32.mrf.mxu1 }
 0x1e3   : > { %9371 = vst [vmem:[#allocation39_spill] sm:$0xff] %v8860_v58  ;;  %v8862_v59 = vpop.f32.mrf.mxu0  ;;  %v3245_v58 = vadd.f32 %v3118_v45, %v8666_v0  ;;  %v8891_v0 = vld [vmem:[%s9142_s2] ss:$0 sm:$0xff] }
 0x1e4   : > { %9372 = vst [vmem:[#allocation40_spill] sm:$0xff] %v8862_v59  ;;  %v8864_v35 = vpop.f32.mrf.mxu1 }
 0x1e5   : > { %9373 = vst [vmem:[#allocation41_spill] sm:$0xff] %v8864_v35  ;;  %v8866_v42 = vpop.f32.mrf.mxu0  ;;  %v3607_v20 = vadd.f32 %v8758_v39, %v3245_v58  ;;  %v3251_v58 = vadd.f32 %v8772_v63, %v8675_v48  ;;  %v3608_v39 = vadd.f32 %v8764_v28, %v3246_v62  ;;  %v3252_v48 = vadd.f32 %v8780_v25, %v8681_v38 }
 0x1e6   : > { %9374 = vst [vmem:[#allocation42_spill] sm:$0xff] %v8866_v42  ;;  %v8868_v34 = vpop.f32.mrf.mxu1  ;;  %v3609_v42 = vadd.f32 %v8753_v6, %v3247_v24  ;;  %v3611_v62 = vadd.f32 %v8770_v21, %v3249_v60 }
 0x1e7   : > { %9375 = vst [vmem:[#allocation43_spill] sm:$0xff] %v8868_v34  ;;  %v8870_v30 = vpop.f32.mrf.mxu0  ;;  %v3248_v34 = vadd.f32 %v6003_v43, %v8669_v26  ;;  %v3613_v28 = vadd.f32 %v8766_v37, %v3251_v58 }
 0x1e8   : > { %9376 = vst [vmem:[#allocation44_spill] sm:$0xff] %v8870_v30  ;;  %v8872_v15 = vpop.f32.mrf.mxu1 }
 0x1e9   : > { %v8875_v56 = vpop.f32.mrf.mxu0  ;;  %v3610_v24 = vadd.f32 %v8762_v5, %v3248_v34 }
 0x1ea   : > { %9377 = vst [vmem:[#allocation45_spill] sm:$0xff] %v8875_v56  ;;  %v8877_v55 = vpop.f32.mrf.mxu1 }
 0x1eb   : > { %v6104_v59 = vpop.f32.mrf.mxu0 }
 0x1ec   : > { %v8880_v22 = vpop.f32.mrf.mxu1 }
 0x1ed   : > { %v4676_v35 = vpop.f32.mrf.mxu0 }
 0x1ee   : > { %v6070_v30 = vpop.f32.mrf.mxu1 }
 0x1ef   : > { %v4335_v36 = vadd.f32 %v6070_v30, %v3609_v42  ;;  %v6105_v56 = vpop.f32.mrf.mxu0  ;;  %v8901_v30 = vld [vmem:[%s9143_s3] ss:$0 sm:$0xff] }
 0x1f0   : > { %v4206_v45 = vpop.f32.mrf.mxu1 }
 0x1f1   : > { %v4805_v26 = vadd.f32 %v6104_v59, %v4335_v36  ;;  %v4333_v6 = vadd.f32 %v4206_v45, %v3607_v20  ;;  %v4679_v43 = vpop.f32.mrf.mxu0 }
 0x1f2   : > { %v6071_v42 = vpop.f32.mrf.mxu1 }
 0x1f3   : > { %v4844_v34 = vmul.f32 %v8891_v0, %v4805_v26  ;;  %v4803_v59 = vadd.f32 %v4676_v35, %v4333_v6  ;;  %v4336_v5 = vadd.f32 %v6071_v42, %v3610_v24  ;;  %v6108_v61 = vpop.f32.mrf.mxu0  ;;  %v3250_v35 = vadd.f32 %v8784_v4, %v8684_v2 }
 0x1f4   : > { %v4209_v63 = vpop.f32.mrf.mxu1 }
 0x1f5   : > { %v4883_v31 = vadd.f32 %v8901_v30, %v4844_v34  ;;  %v4842_v54 = vmul.f32 %v8891_v0, %v4803_v59  ;;  %v4806_v20 = vadd.f32 %v6105_v56, %v4336_v5  ;;  %v4334_v36 = vadd.f32 %v4209_v63, %v3608_v39  ;;  %v4692_v45 = vpop.f32.mrf.mxu0 }
 0x1f6   : > { %v6074_v24 = vpop.f32.mrf.mxu1  ;;  %v3614_v34 = vadd.f32 %v8774_v40, %v3252_v48  ;;  %v3255_v56 = vadd.f32 %v8788_v7, %v8687_v27  ;;  %v3612_v40 = vadd.f32 %v8778_v10, %v3250_v35 }
 0x1f7   : > { %v4915_v26 = vmax.f32 %v4883_v31, 0.0  ;;  %v4881_v6 = vadd.f32 %v8901_v30, %v4842_v54  ;;  %v4845_v38 = vmul.f32 %v8891_v0, %v4806_v20  ;;  %v4804_v25 = vadd.f32 %v4679_v43, %v4334_v36  ;;  %v6109_v42 = vpop.f32.mrf.mxu0 }
 0x1f8   : > { %v4339_v39 = vadd.f32 %v6074_v24, %v3613_v28  ;;  %v4222_v37 = vpop.f32.mrf.mxu1  ;;  %v3617_v31 = vadd.f32 %v8782_v46, %v3255_v56  ;;  %v3253_v54 = vadd.f32 %v8792_v17, %v8690_v18  ;;  %v3256_v20 = vadd.f32 %v8796_v23, %v8693_v13 }
 0x1f9   : > { %4947 = vst [vmem:[%s8920_s22 + $0x10] sm:$0xff] %v4915_v26  ;;  %v4913_v2 = vmax.f32 %v4881_v6, 0.0  ;;  %v4884_v21 = vadd.f32 %v8901_v30, %v4845_v38  ;;  %v4843_v4 = vmul.f32 %v8891_v0, %v4804_v25  ;;  %v4337_v58 = vadd.f32 %v4222_v37, %v3611_v62  ;;  %v4695_v43 = vpop.f32.mrf.mxu0 }
 0x1fa   : > { %v4809_v60 = vadd.f32 %v6108_v61, %v4339_v39  ;;  %v6075_v59 = vpop.f32.mrf.mxu1  ;;  %v3254_v24 = vadd.f32 %v8800_v33, %v8696_v8  ;;  %v3615_v38 = vadd.f32 %v8786_v50, %v3253_v54  ;;  %v3618_v25 = vadd.f32 %v8790_v1, %v3256_v20 }
 0x1fb   : > { %4945 = vst [vmem:[%s8920_s22] sm:$0xff] %v4913_v2  ;;  %v4916_v27 = vmax.f32 %v4884_v21, 0.0  ;;  %v4882_v7 = vadd.f32 %v8901_v30, %v4843_v4  ;;  %v4807_v5 = vadd.f32 %v4692_v45, %v4337_v58  ;;  %v4340_v48 = vadd.f32 %v6075_v59, %v3614_v34  ;;  %v6112_v63 = vpop.f32.mrf.mxu0 }
 0x1fc   : > { %v4848_v10 = vmul.f32 %v8891_v0, %v4809_v60  ;;  %v4225_v61 = vpop.f32.mrf.mxu1  ;;  %v3259_v8 = vadd.f32 %v8804_v41, %v8699_v53  ;;  %v3616_v21 = vadd.f32 %v8794_v51, %v3254_v24  ;;  %v3257_v50 = vadd.f32 %v8808_v52, %v8702_v12 }
 0x1fd   : > { %4948 = vst [vmem:[%s8920_s22 + $0x18] sm:$0xff] %v4916_v27  ;;  %v4914_v36 = vmax.f32 %v4882_v7, 0.0  ;;  %v4846_v28 = vmul.f32 %v8891_v0, %v4807_v5  ;;  %v4810_v62 = vadd.f32 %v6109_v42, %v4340_v48  ;;  %v4338_v45 = vadd.f32 %v4225_v61, %v3612_v40  ;;  %v4708_v35 = vpop.f32.mrf.mxu0 }
 0x1fe   : > { %v4887_v46 = vadd.f32 %v8901_v30, %v4848_v10  ;;  %v6078_v26 = vpop.f32.mrf.mxu1  ;;  %v3621_v60 = vadd.f32 %v8798_v19, %v3259_v8  ;;  %v3619_v48 = vadd.f32 %v8802_v57, %v3257_v50  ;;  %v9379_v8 = vld [vmem:[#allocation5_spill] sm:$0xff] }
 0x1ff   : > { %4946 = vst [vmem:[%s8920_s22 + $0x8] sm:$0xff] %v4914_v36  ;;  %v4885_v18 = vadd.f32 %v8901_v30, %v4846_v28  ;;  %v4849_v13 = vmul.f32 %v8891_v0, %v4810_v62  ;;  %v4808_v17 = vadd.f32 %v4695_v43, %v4338_v45  ;;  %v4343_v23 = vadd.f32 %v6078_v26, %v3617_v31  ;;  %v6113_v6 = vpop.f32.mrf.mxu0 }
 0x200   : > { %v4919_v33 = vmax.f32 %v4887_v46, 0.0  ;;  %v4238_v42 = vpop.f32.mrf.mxu1  ;;  %v3258_v31 = vadd.f32 %v8816_v32, %v8708_v11  ;;  %v3263_v62 = vadd.f32 %v8820_v44, %v8711_v29  ;;  %v3261_v29 = vadd.f32 %v8824_v3, %v8714_v9 }
 0x201   : > { %v4917_v34 = vmax.f32 %v4885_v18, 0.0  ;;  %v4888_v56 = vadd.f32 %v8901_v30, %v4849_v13  ;;  %v4847_v39 = vmul.f32 %v8891_v0, %v4808_v17  ;;  %v4813_v37 = vadd.f32 %v6112_v63, %v4343_v23  ;;  %v4711_v2 = vpop.f32.mrf.mxu0 }
 0x202   : > { %4951 = vst [vmem:[%s8920_s22 + $0x30] sm:$0xff] %v4919_v33  ;;  %v4341_v1 = vadd.f32 %v4238_v42, %v3615_v38  ;;  %v6079_v4 = vpop.f32.mrf.mxu1  ;;  %v3260_v63 = vadd.f32 %v8812_v14, %v8705_v16  ;;  %v3620_v46 = vadd.f32 %v8810_v49, %v3258_v31  ;;  %v9378_v38 = vld [vmem:[#allocation16_spill] sm:$0xff]  ;;  %v9380_v33 = vld [vmem:[#allocation25_spill] sm:$0xff] }
 0x203   : > { %4949 = vst [vmem:[%s8920_s22 + $0x20] sm:$0xff] %v4917_v34  ;;  %v4920_v53 = vmax.f32 %v4888_v56, 0.0  ;;  %v4886_v41 = vadd.f32 %v8901_v30, %v4847_v39  ;;  %v4852_v58 = vmul.f32 %v8891_v0, %v4813_v37  ;;  %v4344_v43 = vadd.f32 %v6079_v4, %v3618_v25  ;;  %v6116_v40 = vpop.f32.mrf.mxu0  ;;  %v9381_v37 = vld [vmem:[#allocation18_spill] sm:$0xff] }
 0x204   : > { %v4811_v59 = vadd.f32 %v4708_v35, %v4341_v1  ;;  %v4241_v27 = vpop.f32.mrf.mxu1  ;;  %v3622_v24 = vadd.f32 %v8806_v47, %v3260_v63  ;;  %v3625_v25 = vadd.f32 %v9378_v38, %v3263_v62  ;;  %v3264_v47 = vadd.f32 %v9380_v33, %v9379_v8  ;;  %v9394_v33 = vld [vmem:[#allocation24_spill] sm:$0xff] }
 0x205   : > { %4952 = vst [vmem:[%s8920_s22 + $0x38] sm:$0xff] %v4920_v53  ;;  %v4918_v51 = vmax.f32 %v4886_v41, 0.0  ;;  %v4891_v12 = vadd.f32 %v8901_v30, %v4852_v58  ;;  %v4814_v52 = vadd.f32 %v6113_v6, %v4344_v43  ;;  %v4342_v7 = vadd.f32 %v4241_v27, %v3616_v21  ;;  %v4724_v5 = vpop.f32.mrf.mxu0  ;;  %v9382_v43 = vld [vmem:[#allocation20_spill] sm:$0xff] }
 0x206   : > { %v4850_v19 = vmul.f32 %v8891_v0, %v4811_v59  ;;  %v6082_v54 = vpop.f32.mrf.mxu1  ;;  %v9384_v59 = vld [vmem:[#allocation14_spill] sm:$0xff] }
 0x207   : > { %4950 = vst [vmem:[%s8920_s22 + $0x28] sm:$0xff] %v4918_v51  ;;  %v4923_v20 = vmax.f32 %v4891_v12, 0.0  ;;  %v4853_v10 = vmul.f32 %v8891_v0, %v4814_v52  ;;  %v4812_v61 = vadd.f32 %v4711_v2, %v4342_v7  ;;  %v4347_v36 = vadd.f32 %v6082_v54, %v3621_v60  ;;  %v6117_v28 = vpop.f32.mrf.mxu0  ;;  %v9383_v60 = vld [vmem:[#allocation17_spill] sm:$0xff]  ;;  %v9385_v51 = vld [vmem:[#allocation22_spill] sm:$0xff]  ;;  %v9386_v12 = vld [vmem:[#allocation19_spill] sm:$0xff] }
 0x208   : > { %v4889_v57 = vadd.f32 %v8901_v30, %v4850_v19  ;;  %v4254_v45 = vpop.f32.mrf.mxu1  ;;  %v3623_v2 = vadd.f32 %v9381_v37, %v3261_v29  ;;  %v3262_v27 = vadd.f32 %v9384_v59, %v9383_v60  ;;  %v3267_v52 = vadd.f32 %v9386_v12, %v9385_v51  ;;  %v9392_v29 = vld [vmem:[#allocation31_spill] sm:$0xff]  ;;  %v9398_v59 = vld [vmem:[#allocation26_spill] sm:$0xff]  ;;  %v9400_v12 = vld [vmem:[#allocation28_spill] sm:$0xff] }
 0x209   : > { %4955 = vst [vmem:[%s8920_s22 + $0x50] sm:$0xff] %v4923_v20  ;;  %v4892_v16 = vadd.f32 %v8901_v30, %v4853_v10  ;;  %v4851_v11 = vmul.f32 %v8891_v0, %v4812_v61  ;;  %v4817_v32 = vadd.f32 %v6116_v40, %v4347_v36  ;;  %v4345_v14 = vadd.f32 %v4254_v45, %v3619_v48  ;;  %v4727_v35 = vpop.f32.mrf.mxu0  ;;  %v9387_v20 = vld [vmem:[#allocation12_spill] sm:$0xff]  ;;  %v9388_v10 = vld [vmem:[#allocation29_spill] sm:$0xff] }
 0x20a   : > { %v4921_v44 = vmax.f32 %v4889_v57, 0.0  ;;  %v6083_v26 = vpop.f32.mrf.mxu1  ;;  %v3626_v40 = vadd.f32 %v9382_v43, %v3264_v47  ;;  %v3265_v61 = vadd.f32 %v9388_v10, %v9387_v20  ;;  %v9395_v47 = vld [vmem:[#allocation33_spill] sm:$0xff]  ;;  %v9402_v10 = vld [vmem:[#allocation7_spill] sm:$0xff] }
 0x20b   : > { %v4924_v18 = vmax.f32 %v4892_v16, 0.0  ;;  %v4890_v13 = vadd.f32 %v8901_v30, %v4851_v11  ;;  %v4856_v17 = vmul.f32 %v8891_v0, %v4817_v32  ;;  %v4815_v23 = vadd.f32 %v4724_v5, %v4345_v14  ;;  %v6120_v6 = vpop.f32.mrf.mxu0  ;;  %v9389_v32 = vld [vmem:[#allocation23_spill] sm:$0xff] }
 0x20c   : > { %4953 = vst [vmem:[%s8920_s22 + $0x40] sm:$0xff] %v4921_v44  ;;  %v4348_v49 = vadd.f32 %v6083_v26, %v3622_v24  ;;  %v4257_v42 = vpop.f32.mrf.mxu1  ;;  %v3624_v14 = vadd.f32 %v9389_v32, %v3262_v27  ;;  %v9399_v27 = vld [vmem:[#allocation35_spill] sm:$0xff] }
 0x20d   : > { %4956 = vst [vmem:[%s8920_s22 + $0x58] sm:$0xff] %v4924_v18  ;;  %v4922_v9 = vmax.f32 %v4890_v13, 0.0  ;;  %v4895_v3 = vadd.f32 %v8901_v30, %v4856_v17  ;;  %v4854_v34 = vmul.f32 %v8891_v0, %v4815_v23  ;;  %v4346_v56 = vadd.f32 %v4257_v42, %v3620_v46  ;;  %v4740_v39 = vpop.f32.mrf.mxu0  ;;  %v9391_v46 = vld [vmem:[#allocation21_spill] sm:$0xff] }
 0x20e   : > { %v4818_v21 = vadd.f32 %v6117_v28, %v4348_v49  ;;  %v6086_v50 = vpop.f32.mrf.mxu1  ;;  %v3268_v44 = vadd.f32 %v9392_v29, %v9391_v46  ;;  %v3266_v49 = vadd.f32 %v9395_v47, %v9394_v33  ;;  %v3271_v51 = vadd.f32 %v9399_v27, %v9398_v59  ;;  %v9406_v29 = vld [vmem:[#allocation6_spill] sm:$0xff]  ;;  %v9409_v47 = vld [vmem:[#allocation9_spill] sm:$0xff]  ;;  %v9413_v27 = vld [vmem:[#allocation8_spill] sm:$0xff] }
 0x20f   : > { %4954 = vst [vmem:[%s8920_s22 + $0x48] sm:$0xff] %v4922_v9  ;;  %v4927_v1 = vmax.f32 %v4895_v3, 0.0  ;;  %v4893_v4 = vadd.f32 %v8901_v30, %v4854_v34  ;;  %v4816_v53 = vadd.f32 %v4727_v35, %v4346_v56  ;;  %v4351_v41 = vadd.f32 %v6086_v50, %v3625_v25  ;;  %v6121_v58 = vpop.f32.mrf.mxu0  ;;  %v9390_v35 = vld [vmem:[#allocation27_spill] sm:$0xff] }
 0x210   : > { %v4857_v7 = vmul.f32 %v8891_v0, %v4818_v21  ;;  %v4270_v5 = vpop.f32.mrf.mxu1  ;;  %v3629_v24 = vadd.f32 %v9390_v35, %v3267_v52  ;;  %v9393_v25 = vld [vmem:[#allocation11_spill] sm:$0xff]  ;;  %v9401_v52 = vld [vmem:[#allocation37_spill] sm:$0xff] }
 0x211   : > { %4959 = vst [vmem:[%s8920_s22 + $0x70] sm:$0xff] %v4927_v1  ;;  %v4925_v48 = vmax.f32 %v4893_v4, 0.0  ;;  %v4855_v63 = vmul.f32 %v8891_v0, %v4816_v53  ;;  %v4821_v31 = vadd.f32 %v6120_v6, %v4351_v41  ;;  %v4349_v19 = vadd.f32 %v4270_v5, %v3623_v2  ;;  %v4743_v54 = vpop.f32.mrf.mxu0  ;;  %v9396_v2 = vld [vmem:[#allocation15_spill] sm:$0xff] }
 0x212   : > { %v4896_v36 = vadd.f32 %v8901_v30, %v4857_v7  ;;  %v6087_v28 = vpop.f32.mrf.mxu1  ;;  %v3627_v8 = vadd.f32 %v9393_v25, %v3265_v61  ;;  %v3630_v21 = vadd.f32 %v9396_v2, %v3268_v44  ;;  %v3269_v7 = vadd.f32 %v9401_v52, %v9400_v12  ;;  %v9403_v61 = vld [vmem:[#allocation39_spill] sm:$0xff]  ;;  %v9407_v44 = vld [vmem:[#allocation41_spill] sm:$0xff]  ;;  %v9414_v12 = vld [vmem:[#allocation10_spill] sm:$0xff] }
 0x213   : > { %4957 = vst [vmem:[%s8920_s22 + $0x60] sm:$0xff] %v4925_v48  ;;  %v4894_v62 = vadd.f32 %v8901_v30, %v4855_v63  ;;  %v4860_v57 = vmul.f32 %v8891_v0, %v4821_v31  ;;  %v4819_v45 = vadd.f32 %v4740_v39, %v4349_v19  ;;  %v4352_v16 = vadd.f32 %v6087_v28, %v3626_v40  ;;  %v9397_v40 = vld [vmem:[#allocation30_spill] sm:$0xff] }
 0x214   : > { %v6124_v11 = vpop.f32.mrf.mxu0  ;;  %v4928_v26 = vmax.f32 %v4896_v36, 0.0  ;;  %v4273_v18 = vpop.f32.mrf.mxu1  ;;  %v3628_v60 = vadd.f32 %v9397_v40, %v3266_v49  ;;  %v3272_v36 = vadd.f32 %v9403_v61, %v9402_v10  ;;  %v9410_v49 = vld [vmem:[#allocation43_spill] sm:$0xff]  ;;  %v3276_v52 = vadd.f32 %v8877_v55, %v9414_v12 }
 0x215   : > { %v4926_v13 = vmax.f32 %v4894_v62, 0.0  ;;  %v4899_v17 = vadd.f32 %v8901_v30, %v4860_v57  ;;  %v4858_v23 = vmul.f32 %v8891_v0, %v4819_v45  ;;  %v4822_v6 = vadd.f32 %v6121_v58, %v4352_v16 }
 0x216   : > { %v4756_v38 = vpop.f32.mrf.mxu0  ;;  %4960 = vst [vmem:[%s8920_s22 + $0x78] sm:$0xff] %v4928_v26  ;;  %v4350_v42 = vadd.f32 %v4273_v18, %v3624_v14  ;;  %v6090_v9 = vpop.f32.mrf.mxu1  ;;  %v9404_v14 = vld [vmem:[#allocation32_spill] sm:$0xff]  ;;  %v3270_v26 = vadd.f32 %v9407_v44, %v9406_v29  ;;  %v9418_v29 = vld [vmem:[#allocation45_spill] sm:$0xff] }
 0x217   : > { %4958 = vst [vmem:[%s8920_s22 + $0x68] sm:$0xff] %v4926_v13  ;;  %v4931_v3 = vmax.f32 %v4899_v17, 0.0  ;;  %v4897_v34 = vadd.f32 %v8901_v30, %v4858_v23  ;;  %v4861_v56 = vmul.f32 %v8891_v0, %v4822_v6  ;;  %v4355_v39 = vadd.f32 %v6090_v9, %v3629_v24  ;;  %v9405_v24 = vld [vmem:[#allocation34_spill] sm:$0xff] }
 0x218   : > { %v6125_v37 = vpop.f32.mrf.mxu0  ;;  %v4820_v50 = vadd.f32 %v4743_v54, %v4350_v42  ;;  %v4286_v1 = vpop.f32.mrf.mxu1  ;;  %v3633_v35 = vadd.f32 %v9404_v14, %v3271_v51  ;;  %v3631_v46 = vadd.f32 %v9405_v24, %v3269_v7  ;;  %v3275_v42 = vadd.f32 %v9410_v49, %v9409_v47 }
 0x219   : > { %4963 = vst [vmem:[%s8920_s22 + $0x90] sm:$0xff] %v4931_v3  ;;  %v4929_v4 = vmax.f32 %v4897_v34, 0.0  ;;  %v4900_v53 = vadd.f32 %v8901_v30, %v4861_v56  ;;  %v4825_v41 = vadd.f32 %v6124_v11, %v4355_v39  ;;  %v4353_v58 = vadd.f32 %v4286_v1, %v3627_v8  ;;  %v9408_v8 = vld [vmem:[#allocation36_spill] sm:$0xff] }
 0x21a   : > { %v4759_v43 = vpop.f32.mrf.mxu0  ;;  %v4859_v5 = vmul.f32 %v8891_v0, %v4820_v50  ;;  %v6091_v48 = vpop.f32.mrf.mxu1  ;;  %v3634_v33 = vadd.f32 %v9408_v8, %v3272_v36  ;;  %v3273_v51 = vadd.f32 %v8872_v15, %v9413_v27 }
 0x21b   : > { %4961 = vst [vmem:[%s8920_s22 + $0x80] sm:$0xff] %v4929_v4  ;;  %v4932_v63 = vmax.f32 %v4900_v53, 0.0  ;;  %v4864_v31 = vmul.f32 %v8891_v0, %v4825_v41  ;;  %v4823_v19 = vadd.f32 %v4756_v38, %v4353_v58  ;;  %v4356_v54 = vadd.f32 %v6091_v48, %v3630_v21  ;;  %v9411_v21 = vld [vmem:[#allocation38_spill] sm:$0xff] }
 0x21c   : > { %v6128_v20 = vpop.f32.mrf.mxu0  ;;  %v4898_v28 = vadd.f32 %v8901_v30, %v4859_v5  ;;  %v4289_v62 = vpop.f32.mrf.mxu1  ;;  %v3632_v50 = vadd.f32 %v9411_v21, %v3270_v26 }
 0x21d   : > { %4964 = vst [vmem:[%s8920_s22 + $0x98] sm:$0xff] %v4932_v63  ;;  %v4903_v57 = vadd.f32 %v8901_v30, %v4864_v31  ;;  %v4862_v45 = vmul.f32 %v8891_v0, %v4823_v19  ;;  %v4826_v16 = vadd.f32 %v6125_v37, %v4356_v54  ;;  %v4354_v11 = vadd.f32 %v4289_v62, %v3628_v60  ;;  %v9412_v60 = vld [vmem:[#allocation40_spill] sm:$0xff]  ;;  %v9415_v54 = vld [vmem:[#allocation13_spill] sm:$0xff] }
 0x21e   : > { %v4772_v32 = vpop.f32.mrf.mxu0  ;;  %v4930_v18 = vmax.f32 %v4898_v28, 0.0  ;;  %v6094_v13 = vpop.f32.mrf.mxu1  ;;  %v3637_v59 = vadd.f32 %v9412_v60, %v3275_v42 }
 0x21f   : > { %v4935_v17 = vmax.f32 %v4903_v57, 0.0  ;;  %v4901_v23 = vadd.f32 %v8901_v30, %v4862_v45  ;;  %v4865_v6 = vmul.f32 %v8891_v0, %v4826_v16  ;;  %v4824_v38 = vadd.f32 %v4759_v43, %v4354_v11  ;;  %v9416_v57 = vld [vmem:[#allocation42_spill] sm:$0xff]  ;;  %v9417_v16 = vld [vmem:[#allocation44_spill] sm:$0xff] }
 0x220   : > { %v6129_v25 = vpop.f32.mrf.mxu0  ;;  %4962 = vst [vmem:[%s8920_s22 + $0x88] sm:$0xff] %v4930_v18  ;;  %v4359_v9 = vadd.f32 %v6094_v13, %v3633_v35  ;;  %v4302_v3 = vpop.f32.mrf.mxu1  ;;  %v3635_v45 = vadd.f32 %v9416_v57, %v3273_v51  ;;  %v3638_v11 = vadd.f32 %v9417_v16, %v3276_v52 }
 0x221   : > { %4967 = vst [vmem:[%s8920_s22 + $0xb0] sm:$0xff] %v4935_v17  ;;  %v4933_v34 = vmax.f32 %v4901_v23, 0.0  ;;  %v4904_v56 = vadd.f32 %v8901_v30, %v4865_v6  ;;  %v4863_v39 = vmul.f32 %v8891_v0, %v4824_v38  ;;  %v4357_v37 = vadd.f32 %v4302_v3, %v3631_v46 }
 0x222   : > { %v4775_v2 = vpop.f32.mrf.mxu0  ;;  %v4829_v1 = vadd.f32 %v6128_v20, %v4359_v9  ;;  %v6095_v4 = vpop.f32.mrf.mxu1  ;;  %v3274_v20 = vadd.f32 %v8880_v22, %v9415_v54 }
 0x223   : > { %4965 = vst [vmem:[%s8920_s22 + $0xa0] sm:$0xff] %v4933_v34  ;;  %v4936_v53 = vmax.f32 %v4904_v56, 0.0  ;;  %v4902_v41 = vadd.f32 %v8901_v30, %v4863_v39  ;;  %v4827_v58 = vadd.f32 %v4772_v32, %v4357_v37  ;;  %v4360_v43 = vadd.f32 %v6095_v4, %v3634_v33 }
 0x224   : > { %v6132_v40 = vpop.f32.mrf.mxu0  ;;  %v4868_v7 = vmul.f32 %v8891_v0, %v4829_v1  ;;  %v4305_v5 = vpop.f32.mrf.mxu1  ;;  %v3636_v44 = vadd.f32 %v9418_v29, %v3274_v20 }
 0x225   : > { %4968 = vst [vmem:[%s8920_s22 + $0xb8] sm:$0xff] %v4936_v53  ;;  %v4934_v48 = vmax.f32 %v4902_v41, 0.0  ;;  %v4866_v63 = vmul.f32 %v8891_v0, %v4827_v58  ;;  %v4830_v31 = vadd.f32 %v6129_v25, %v4360_v43  ;;  %v4358_v19 = vadd.f32 %v4305_v5, %v3632_v50 }
 0x226   : > { %v4907_v10 = vadd.f32 %v8901_v30, %v4868_v7  ;;  %v6098_v61 = vpop.f32.mrf.mxu1  ;;  %v4788_v15 = vpop.f32.mrf.mxu0 }
 0x227   : > { %4966 = vst [vmem:[%s8920_s22 + $0xa8] sm:$0xff] %v4934_v48  ;;  %v4905_v55 = vadd.f32 %v8901_v30, %v4866_v63  ;;  %v4869_v36 = vmul.f32 %v8891_v0, %v4830_v31  ;;  %v4828_v28 = vadd.f32 %v4775_v2, %v4358_v19  ;;  %v4363_v62 = vadd.f32 %v6098_v61, %v3637_v59 }
 0x228   : > { %v4939_v32 = vmax.f32 %v4907_v10, 0.0  ;;  %v4318_v14 = vpop.f32.mrf.mxu1  ;;  %v6133_v13 = vpop.f32.mrf.mxu0 }
 0x229   : > { %v4937_v22 = vmax.f32 %v4905_v55, 0.0  ;;  %v4908_v35 = vadd.f32 %v8901_v30, %v4869_v36  ;;  %v4867_v24 = vmul.f32 %v8891_v0, %v4828_v28  ;;  %v4833_v46 = vadd.f32 %v6132_v40, %v4363_v62 }
 0x22a   : > { %4971 = vst [vmem:[%s8920_s22 + $0xd0] sm:$0xff] %v4939_v32  ;;  %v4361_v26 = vadd.f32 %v4318_v14, %v3635_v45  ;;  %v6099_v18 = vpop.f32.mrf.mxu1  ;;  %v4791_v3 = vpop.f32.mrf.mxu0 }
 0x22b   : > { %4969 = vst [vmem:[%s8920_s22 + $0xc0] sm:$0xff] %v4937_v22  ;;  %v4940_v17 = vmax.f32 %v4908_v35, 0.0  ;;  %v4906_v23 = vadd.f32 %v8901_v30, %v4867_v24  ;;  %v4872_v6 = vmul.f32 %v8891_v0, %v4833_v46  ;;  %v4364_v38 = vadd.f32 %v6099_v18, %v3638_v11 }
 0x22c   : > { %v4831_v25 = vadd.f32 %v4788_v15, %v4361_v26  ;;  %v4321_v8 = vpop.f32.mrf.mxu1 }
 0x22d   : > { %4972 = vst [vmem:[%s8920_s22 + $0xd8] sm:$0xff] %v4940_v17  ;;  %v4938_v33 = vmax.f32 %v4906_v23, 0.0  ;;  %v4911_v47 = vadd.f32 %v8901_v30, %v4872_v6  ;;  %v4834_v49 = vadd.f32 %v6133_v13, %v4364_v38  ;;  %v4362_v42 = vadd.f32 %v4321_v8, %v3636_v44 }
 0x22e   : > { %v4870_v9 = vmul.f32 %v8891_v0, %v4831_v25 }
 0x22f   : > { %4970 = vst [vmem:[%s8920_s22 + $0xc8] sm:$0xff] %v4938_v33  ;;  %v4943_v34 = vmax.f32 %v4911_v47, 0.0  ;;  %v4873_v56 = vmul.f32 %v8891_v0, %v4834_v49  ;;  %v4832_v39 = vadd.f32 %v4791_v3, %v4362_v42 }
 0x230   : > { %v4909_v37 = vadd.f32 %v8901_v30, %v4870_v9 }
 0x231   : > { %4975 = vst [vmem:[%s8920_s22 + $0xf0] sm:$0xff] %v4943_v34  ;;  %v4912_v2 = vadd.f32 %v8901_v30, %v4873_v56  ;;  %v4871_v21 = vmul.f32 %v8891_v0, %v4832_v39 }
 0x232   : > { %v4941_v50 = vmax.f32 %v4909_v37, 0.0 }
 0x233   : > { %v4944_v1 = vmax.f32 %v4912_v2, 0.0  ;;  %v4910_v4 = vadd.f32 %v8901_v30, %v4871_v21 }
 0x234   : > { %4973 = vst [vmem:[%s8920_s22 + $0xe0] sm:$0xff] %v4941_v50 }
 0x235   : > { %4976 = vst [vmem:[%s8920_s22 + $0xf8] sm:$0xff] %v4944_v1  ;;  %v4942_v53 = vmax.f32 %v4910_v4, 0.0 }
 0x237   : > { %4974 = vst [vmem:[%s8920_s22 + $0xe8] sm:$0xff] %v4942_v53 }
 0x238   : > { %6267 = shalt.err (!%p6264_p5)
}
 0x239   : > { %s6268_s10 = scalar_lea.hbm %s9087_s5, 4096  ;;  %s6272_s13 = scalar_lea.hbm %s9144_s4, 8192 }
 0x23a   : > { %p6269_p6 = scmp.ne.s32.totalorder %s9087_s5, %s6268_s10  ;;  %p6273_p10 = scmp.lt.s32.totalorder %s9087_s5, %s9144_s4 }
 0x23b   : > { %p6274_p11 = scmp.lt.s32.totalorder %s6272_s13, %s6268_s10 }
 0x23c   : > { %p6270_p7 = pnand %p6269_p6, %p6400_p4 }
 0x23d   : > { %p6275_p12 = por %p6274_p11, %p6273_p10 }
 0x23e   : > { %p6271_p9 = pneg %p6270_p7 }
 0x240   : > { %p6276_p13 = pnand %p6275_p12, %p6271_p9 }
 0x242   : > { %6279 = shalt.err (!%p6276_p13)
}
 0x243   : > { %s6333_s22 = smov 128   ;;  %s6334_s24 = smov 8  }
 0x244   : > { %6147 = dma.vmem_to_hbm [thread:$0]  (%p6400_p4), %s9089_s26, 4096, %s9087_s5, %s9095_s18, %s6333_s22, %s6333_s22, %s6334_s24  }
 0x245 PF: > { %p6153_p0 = scmp.ge.s32.totalorder %s6330_s20, 2  ;;  %s5010_s29 = sand.u32 1, %s6310_s15  }
 0x246   : > { %s5011_s30 = scalar_lea.sflag [#allocation3], %s5010_s29 }
 0x247   : > { %p6150_p1 = pnand %p6153_p0, %p6407_p8 }
 0x249   : > { %p6151_p2 = pneg %p6150_p1 }
 0x24b   : > { %6305 = dma.done.wait (%p6151_p2), %s5011_s30, 4096  }
 0x24c   : > { %6307 = vsyncadd (%p6151_p2), %s5011_s30, 4294963200  ;;  %s17_s20 = sadd.s32 1, %s6330_s20   ;;  %s9419_s15 = smov %s6314_s16 }
 0x24d   : > { %p14_p3 = scmp.ge.s32.totalorder %s17_s20, 4   ;;  %s9420_s16 = smov %s6318_s17 }
 0x24e   : > { %s9421_s17 = smov %s6413_s28  ;;  %s9422_s18 = smov %s6326_s19 }
 0x24f   : > { %s9423_s19 = smov %s9425_s23  ;;  %16 = sbr.rel (!%p14_p3) target bundleno = 4 (0x4), region = 91 }
 0x254   :  { %5016 = vsyncpa [#allocation3], 1 }
 0x255   :  { %5018 = vsyncpa [#allocation3 + $0x1], 1 }

</bundles_post_ra>
